<compile_context>
chip_gen: v5e
topology: v5e:2x2
jax: 0.10.0
libtpu: 0.0.40
codegen_flags: <defaults>
</compile_context>

<pallas_src>
import numpy as np

import jax
import jax.numpy as jnp
from jax.experimental import pallas as pl
from jax.experimental.pallas import tpu as pltpu  # noqa: F401  (TPU backend)

# ----------------------------- configuration --------------------------------
BATCH = 2
C_IN = 4                 # encoder input channels (is_conditional=False)
H = W = 16               # input_size
DOWN = 2                 # encoder downsample factor == decoder upsample factor
HD, WD = H // DOWN, W // DOWN
C_ENC = 8                # encoder out_channels
C_DEC = 8                # decoder in_channels
C_OUT = 4                # decoder out_channels (reconstruction channels)
EMBED = 8                # embed_dim
RANK = 2                 # low-rank posterior rank
NUM_PARTICLES = 2
COV_FACTOR_INIT_SCALE = 1.0
IS_CONDITIONAL = False

FLAT_ENC = C_ENC * HD * WD            # fc_encode input features   (512)
FLAT_DEC = C_DEC * HD * WD            # fc_decode output features  (512)
ENC_OUT_FEATS = EMBED * (2 + RANK)    # loc | log-diag | cov_factor (32)
IN_FEATS = C_IN * H * W               # flattened encoder input    (1024)
OUT_FEATS = C_OUT * H * W             # flattened reconstruction   (1024)


# --------------------------- fused Pallas kernel ------------------------------
def _vae_kernel(x_ref, encw_ref, encb_ref, few_ref, feb_ref,
                fdw_ref, fdb_ref, decw_ref, decb_ref,
                epsw_ref, epsd_ref,
                xhat_ref, loc_ref, diag_ref, cf_ref):
    f32 = jnp.float32
    bf16 = jnp.bfloat16

    # ---- encoder Conv2d(3x3, s2, p1) + h.view(B, -1), folded into one matmul.
    #      Expanded weight lives in HBM/VMEM as bf16 (half the DMA traffic);
    #      the activation is cast in-register -> single-pass bf16 MXU matmul
    #      with f32 accumulation.
    h = jnp.dot(x_ref[...].astype(bf16), encw_ref[...],
                preferred_element_type=f32) + encb_ref[...]

    # ---- fc_encode = Tanh -> Linear (weight columns pre-permuted so the
    #      cov_factor block is (r, e)-major -> contiguous slices below)
    dp = jnp.dot(jnp.tanh(h), few_ref[...], preferred_element_type=f32) + feb_ref[...]

    loc = dp[:, :EMBED]                                   # (B, E)
    diag = jnp.exp(dp[:, EMBED:2 * EMBED])                # (B, E)  cov_diag
    cf = COV_FACTOR_INIT_SCALE * dp[:, 2 * EMBED:]        # (B, R*E), (r, e) order
    loc_ref[...] = loc
    diag_ref[...] = diag
    cf_ref[...] = cf

    # ---- rsample: z = loc + cov_factor @ eps_w + sqrt(cov_diag) * eps_d
    z = loc[None, :, :] + jnp.sqrt(diag)[None, :, :] * epsd_ref[...]   # (P, B, E)
    ew = epsw_ref[...]                                                 # (P, B, R)
    for r in range(RANK):          # static unroll: element-wise FMA on the VPU
        z = z + cf[:, r * EMBED:(r + 1) * EMBED][None, :, :] * ew[:, :, r:r + 1]
    zf = z.reshape(z.shape[0] * z.shape[1], EMBED)        # leading-dim collapse only

    # ---- fc_decode = Linear -> Tanh  (tiny f32 weights)
    hd = jnp.tanh(jnp.dot(zf, fdw_ref[...], preferred_element_type=f32) + fdb_ref[...])

    # ---- decoder ConvTranspose2d(2x2, s2) folded into one lane-dense bf16
    #      matmul; output rows are (p, b), cols are (c_out, h, w) -> final
    #      NCHW layout, 1024-wide unmasked stores.
    xhat_ref[...] = jnp.dot(hd.astype(bf16), decw_ref[...],
                            preferred_element_type=f32) + decb_ref[...]


def _full_spec(shape):
    zeros = (0,) * len(shape)
    return pl.BlockSpec(shape, lambda: zeros)


def fused_vae_forward(kp, x_flat, eps_w, eps_d):
    B = x_flat.shape[0]
    PB = NUM_PARTICLES * B

    in_arrays = (
        x_flat,
        kp["enc_w_big"], kp["enc_b_row"],
        kp["fc_enc_w"], kp["fc_enc_b"],
        kp["fc_dec_w"], kp["fc_dec_b"],
        kp["dec_w_big"], kp["dec_b_row"],
        eps_w, eps_d,
    )
    out_shapes = (
        jax.ShapeDtypeStruct((PB, OUT_FEATS), jnp.float32),      # x_hat slab (lane-dense)
        jax.ShapeDtypeStruct((B, EMBED), jnp.float32),           # loc
        jax.ShapeDtypeStruct((B, EMBED), jnp.float32),           # cov_diag
        jax.ShapeDtypeStruct((B, RANK * EMBED), jnp.float32),    # cov_factor, (r, e) order
    )
    return pl.pallas_call(
        _vae_kernel,
        out_shape=out_shapes,
        in_specs=[_full_spec(a.shape) for a in in_arrays],
        out_specs=tuple(_full_spec(s.shape) for s in out_shapes),
    )(*in_arrays)


# ------------------------------ forward wrapper -------------------------------
def vae_forward(kp, x, eps_w, eps_d):
    """Returns (x_hat, (loc, cov_factor, cov_diag)) matching VAE.forward semantics."""
    B = x.shape[0]
    x_flat = x.reshape(B, IN_FEATS)                                   # free (row-major)
    xhat_slab, loc, diag, cf = fused_vae_forward(kp, x_flat, eps_w, eps_d)
    x_hat = xhat_slab.reshape(NUM_PARTICLES, B, C_OUT, H, W)          # free (row-major)
    cov_factor = cf.reshape(B, RANK, EMBED).transpose(0, 2, 1)        # (B, E, R), tiny
    return x_hat, (loc, cov_factor, diag)


# ------------------------- parameters (torch layout) ---------------------------
def init_torch_params(key):
    ks = jax.random.split(key, 8)

    def w(k, shape, fan_in):
        return jax.random.normal(k, shape, jnp.float32) / jnp.sqrt(float(fan_in))

    def snap_bf16(a):
        # Conv weights are snapped to bf16-representable values so the bf16
        # expanded matmul weights used by the kernel are exactly the reference
        # weights (storage-dtype change introduces no extra quantization error).
        return a.astype(jnp.bfloat16).astype(jnp.float32)

    return dict(
        enc_w=snap_bf16(w(ks[0], (C_ENC, C_IN, 3, 3), C_IN * 9)),  # Conv2d weight
        enc_b=w(ks[1], (C_ENC,), C_IN * 9),
        fc_enc_w=w(ks[2], (ENC_OUT_FEATS, FLAT_ENC), FLAT_ENC),    # torch Linear (out, in)
        fc_enc_b=w(ks[3], (ENC_OUT_FEATS,), FLAT_ENC),
        fc_dec_w=w(ks[4], (FLAT_DEC, EMBED), EMBED),               # torch Linear (out, in)
        fc_dec_b=w(ks[5], (FLAT_DEC,), EMBED),
        dec_w=snap_bf16(w(ks[6], (C_DEC, C_OUT, 2, 2), C_DEC * 4)),  # ConvTranspose2d weight
        dec_b=w(ks[7], (C_OUT,), C_DEC * 4),
    )


def prepare_params(tp):
    """Hoist every re-layout out of the traced forward (done once at init).

    Folds the encoder conv and decoder transposed conv into block-sparse matmul
    weights (stored bf16 to halve HBM traffic) so the fused kernel needs no
    im2col, no in-kernel reshapes, and emits the reconstruction directly in its
    final NCHW layout.
    """
    enc_w = np.asarray(tp["enc_w"], np.float32)
    enc_b = np.asarray(tp["enc_b"], np.float32)
    dec_w = np.asarray(tp["dec_w"], np.float32)
    dec_b = np.asarray(tp["dec_b"], np.float32)

    # Conv2d(C_IN, C_ENC, k=3, s=2, p=1) + NCHW flatten  ==  x.reshape(B,-1) @ enc_big
    enc_big = np.zeros((IN_FEATS, FLAT_ENC), np.float32)
    for oc in range(C_ENC):
        for ic in range(C_IN):
            for i in range(HD):
                for j in range(WD):
                    for kh in range(3):
                        for kw in range(3):
                            r, s = 2 * i + kh - 1, 2 * j + kw - 1
                            if 0 <= r < H and 0 <= s < W:
                                enc_big[ic * H * W + r * W + s,
                                        oc * HD * WD + i * WD + j] = enc_w[oc, ic, kh, kw]

    # ConvTranspose2d(C_DEC, C_OUT, k=2, s=2)  ==  hd.reshape(N,-1) @ dec_big (NCHW output)
    dec_big = np.zeros((FLAT_DEC, OUT_FEATS), np.float32)
    for ic in range(C_DEC):
        for oc in range(C_OUT):
            for i in range(HD):
                for j in range(WD):
                    for kh in range(2):
                        for kw in range(2):
                            dec_big[ic * HD * WD + i * WD + j,
                                    oc * H * W + (2 * i + kh) * W + (2 * j + kw)] = dec_w[ic, oc, kh, kw]

    # fc_encode: store (in, out); permute output columns so the cov_factor block is
    # (r, e)-major -> the kernel slices cf_r contiguously.  Undone by a tiny
    # transpose in the wrapper when returning cov_factor.
    perm = list(range(2 * EMBED)) + [2 * EMBED + e * RANK + r
                                     for r in range(RANK) for e in range(EMBED)]
    fc_enc_w = np.asarray(tp["fc_enc_w"], np.float32).T[:, perm]       # (FLAT_ENC, 32)
    fc_enc_b = np.asarray(tp["fc_enc_b"], np.float32)[perm][None, :]   # (1, 32)

    return dict(
        # big expanded conv weights stored bf16 (exact: conv weights are bf16-snapped)
        enc_w_big=jnp.asarray(enc_big, dtype=jnp.bfloat16),
        enc_b_row=jnp.asarray(np.repeat(enc_b, HD * WD)[None, :]),     # (1, FLAT_ENC) f32
        fc_enc_w=jnp.asarray(fc_enc_w),
        fc_enc_b=jnp.asarray(fc_enc_b),
        fc_dec_w=jnp.asarray(np.asarray(tp["fc_dec_w"], np.float32).T),        # (EMBED, FLAT_DEC)
        fc_dec_b=jnp.asarray(np.asarray(tp["fc_dec_b"], np.float32)[None, :]),  # (1, FLAT_DEC)
        dec_w_big=jnp.asarray(dec_big, dtype=jnp.bfloat16),
        dec_b_row=jnp.asarray(np.repeat(dec_b, H * W)[None, :]),       # (1, OUT_FEATS) f32
    )


# --------------------- plain-JAX reference (for validation) --------------------
def reference_forward(tp, x, eps_w, eps_d):
    """Direct (non-Pallas) implementation of the torch module's forward."""
    B = x.shape[0]
    hi = jax.lax.Precision.HIGHEST
    # encoder: Conv2d 3x3 / stride 2 / pad 1
    xp = jnp.pad(x, ((0, 0), (0, 0), (1, 1), (1, 1)))
    cols = [xp[:, :, kh:kh + 2 * HD:2, kw:kw + 2 * WD:2]
            for kh in range(3) for kw in range(3)]
    pat = jnp.stack(cols, axis=2)                                     # (B, C_IN, 9, HD, WD)
    h = jnp.einsum("bckij,ock->boij", pat,
                   tp["enc_w"].reshape(C_ENC, C_IN, 9), precision=hi)
    h = h + tp["enc_b"][None, :, None, None]
    h = h.reshape(B, FLAT_ENC)                                        # NCHW flatten
    dp = jnp.dot(jnp.tanh(h), tp["fc_enc_w"].T, precision=hi) + tp["fc_enc_b"]
    loc = dp[:, :EMBED]
    diag = jnp.exp(dp[:, EMBED:2 * EMBED])
    cf = (COV_FACTOR_INIT_SCALE * dp[:, 2 * EMBED:]).reshape(B, EMBED, RANK)
    z = (loc[None] + jnp.einsum("ber,pbr->pbe", cf, eps_w, precision=hi)
         + jnp.sqrt(diag)[None] * eps_d)
    hd = jnp.tanh(jnp.dot(z.reshape(NUM_PARTICLES * B, EMBED),
                          tp["fc_dec_w"].T, precision=hi) + tp["fc_dec_b"])
    hd = hd.reshape(NUM_PARTICLES * B, C_DEC, HD, WD)
    # decoder: ConvTranspose2d 2x2 / stride 2
    y = jnp.einsum("ncij,cokl->noikjl", hd, tp["dec_w"], precision=hi)
    y = y.reshape(NUM_PARTICLES * B, C_OUT, H, W) + tp["dec_b"][None, :, None, None]
    return y.reshape(NUM_PARTICLES, B, C_OUT, H, W), (loc, cf, diag)


# ----------------------------------- main --------------------------------------
if __name__ == "__main__":
    key = jax.random.PRNGKey(0)
    k_par, k_x, k_w, k_d = jax.random.split(key, 4)

    torch_params = init_torch_params(k_par)        # "torch"-layout parameters
    kparams = prepare_params(torch_params)         # kernel-ready layouts, built once

    x = jax.random.normal(k_x, (BATCH, C_IN, H, W), jnp.float32)
    eps_w = jax.random.normal(k_w, (NUM_PARTICLES, BATCH, RANK), jnp.float32)
    eps_d = jax.random.normal(k_d, (NUM_PARTICLES, BATCH, EMBED), jnp.float32)

    fwd = jax.jit(vae_forward)
    x_hat, (loc, cov_factor, diag) = fwd(kparams, x, eps_w, eps_d)
    jax.block_until_ready(x_hat)

    assert x_hat.shape == (NUM_PARTICLES, BATCH, C_OUT, H, W)
    assert loc.shape == (BATCH, EMBED)
    assert cov_factor.shape == (BATCH, EMBED, RANK)
    assert diag.shape == (BATCH, EMBED)

    # numerical check against the plain-JAX reference of the torch module
    rx_hat, (rloc, rcf, rdiag) = reference_forward(torch_params, x, eps_w, eps_d)
    for got, want in ((x_hat, rx_hat), (loc, rloc), (cov_factor, rcf), (diag, rdiag)):
        np.testing.assert_allclose(np.asarray(got), np.asarray(want), rtol=2e-2, atol=2e-2)

    print("KERNEL_OK")
</pallas_src>

<mosaic_0001>
module attributes {stable_mosaic.version = 11 : i64} {
  func.func @_vae_kernel(%arg0: memref<2x1024xf32, #tpu.memory_space<vmem>>, %arg1: memref<1024x512xbf16, #tpu.memory_space<vmem>>, %arg2: memref<1x512xf32, #tpu.memory_space<vmem>>, %arg3: memref<512x32xf32, #tpu.memory_space<vmem>>, %arg4: memref<1x32xf32, #tpu.memory_space<vmem>>, %arg5: memref<8x512xf32, #tpu.memory_space<vmem>>, %arg6: memref<1x512xf32, #tpu.memory_space<vmem>>, %arg7: memref<512x1024xbf16, #tpu.memory_space<vmem>>, %arg8: memref<1x1024xf32, #tpu.memory_space<vmem>>, %arg9: memref<2x2x2xf32, #tpu.memory_space<vmem>>, %arg10: memref<2x2x8xf32, #tpu.memory_space<vmem>>, %arg11: memref<4x1024xf32, #tpu.memory_space<vmem>>, %arg12: memref<2x8xf32, #tpu.memory_space<vmem>>, %arg13: memref<2x8xf32, #tpu.memory_space<vmem>>, %arg14: memref<2x16xf32, #tpu.memory_space<vmem>>) attributes {dimension_semantics = [], scalar_prefetch = 0 : i64, scratch_operands = 0 : i64, tpu.core_type = #tpu.core_type<tc>} {
    %c0 = arith.constant 0 : index
    %c0_0 = arith.constant 0 : index
    %0 = vector.load %arg0[%c0, %c0_0] : memref<2x1024xf32, #tpu.memory_space<vmem>>, vector<2x1024xf32>
    %1 = arith.truncf %0 : vector<2x1024xf32> to vector<2x1024xbf16>
    %c0_1 = arith.constant 0 : index
    %c0_2 = arith.constant 0 : index
    %2 = vector.load %arg1[%c0_1, %c0_2] : memref<1024x512xbf16, #tpu.memory_space<vmem>>, vector<1024x512xbf16>
    %cst = arith.constant dense<0.000000e+00> : vector<2x512xf32>
    %3 = tpu.matmul %1, %2, %cst {dimension_numbers = #tpu.dot_dimension_numbers<[1], [0], [0], [1], [0, 0, 1, 1], [], []>} : vector<2x1024xbf16>, vector<1024x512xbf16>, vector<2x512xf32> -> vector<2x512xf32>
    %c0_3 = arith.constant 0 : index
    %c0_4 = arith.constant 0 : index
    %4 = vector.load %arg2[%c0_3, %c0_4] : memref<1x512xf32, #tpu.memory_space<vmem>>, vector<1x512xf32>
    %5 = vector.broadcast %4 : vector<1x512xf32> to vector<2x512xf32>
    %6 = arith.addf %3, %5 : vector<2x512xf32>
    %7 = math.tanh %6 : vector<2x512xf32>
    %c0_5 = arith.constant 0 : index
    %c0_6 = arith.constant 0 : index
    %8 = vector.load %arg3[%c0_5, %c0_6] : memref<512x32xf32, #tpu.memory_space<vmem>>, vector<512x32xf32>
    %cst_7 = arith.constant dense<0.000000e+00> : vector<2x32xf32>
    %9 = tpu.matmul %7, %8, %cst_7 {dimension_numbers = #tpu.dot_dimension_numbers<[1], [0], [0], [1], [0, 0, 1, 1], [], []>} : vector<2x512xf32>, vector<512x32xf32>, vector<2x32xf32> -> vector<2x32xf32>
    %c0_8 = arith.constant 0 : index
    %c0_9 = arith.constant 0 : index
    %10 = vector.load %arg4[%c0_8, %c0_9] : memref<1x32xf32, #tpu.memory_space<vmem>>, vector<1x32xf32>
    %11 = vector.broadcast %10 : vector<1x32xf32> to vector<2x32xf32>
    %12 = arith.addf %9, %11 : vector<2x32xf32>
    %13 = vector.extract_strided_slice %12 {offsets = [0, 0], sizes = [2, 8], strides = [1, 1]} : vector<2x32xf32> to vector<2x8xf32>
    %14 = vector.extract_strided_slice %12 {offsets = [0, 8], sizes = [2, 8], strides = [1, 1]} : vector<2x32xf32> to vector<2x8xf32>
    %15 = math.exp %14 : vector<2x8xf32>
    %16 = vector.extract_strided_slice %12 {offsets = [0, 16], sizes = [2, 16], strides = [1, 1]} : vector<2x32xf32> to vector<2x16xf32>
    %cst_10 = arith.constant 1.000000e+00 : f32
    %17 = vector.broadcast %cst_10 : f32 to vector<2x16xf32>
    %18 = arith.mulf %17, %16 : vector<2x16xf32>
    %c0_11 = arith.constant 0 : index
    %c0_12 = arith.constant 0 : index
    %19 = vector.load %arg12[%c0_11, %c0_12] : memref<2x8xf32, #tpu.memory_space<vmem>>, vector<2x8xf32>
    tpu.vector_store %arg12[%c0_11, %c0_12], %13 {strides = array<i32>} : memref<2x8xf32, #tpu.memory_space<vmem>>, vector<2x8xf32>,
    %c0_13 = arith.constant 0 : index
    %c0_14 = arith.constant 0 : index
    %20 = vector.load %arg13[%c0_13, %c0_14] : memref<2x8xf32, #tpu.memory_space<vmem>>, vector<2x8xf32>
    tpu.vector_store %arg13[%c0_13, %c0_14], %15 {strides = array<i32>} : memref<2x8xf32, #tpu.memory_space<vmem>>, vector<2x8xf32>,
    %c0_15 = arith.constant 0 : index
    %c0_16 = arith.constant 0 : index
    %21 = vector.load %arg14[%c0_15, %c0_16] : memref<2x16xf32, #tpu.memory_space<vmem>>, vector<2x16xf32>
    tpu.vector_store %arg14[%c0_15, %c0_16], %18 {strides = array<i32>} : memref<2x16xf32, #tpu.memory_space<vmem>>, vector<2x16xf32>,
    %22 = vector.shape_cast %13 : vector<2x8xf32> to vector<1x2x8xf32>
    %23 = math.sqrt %15 : vector<2x8xf32>
    %24 = vector.shape_cast %23 : vector<2x8xf32> to vector<1x2x8xf32>
    %c0_17 = arith.constant 0 : index
    %c0_18 = arith.constant 0 : index
    %c0_19 = arith.constant 0 : index
    %25 = vector.load %arg10[%c0_17, %c0_18, %c0_19] : memref<2x2x8xf32, #tpu.memory_space<vmem>>, vector<2x2x8xf32>
    %26 = vector.broadcast %24 : vector<1x2x8xf32> to vector<2x2x8xf32>
    %27 = arith.mulf %26, %25 : vector<2x2x8xf32>
    %28 = vector.broadcast %22 : vector<1x2x8xf32> to vector<2x2x8xf32>
    %29 = arith.addf %28, %27 : vector<2x2x8xf32>
    %c0_20 = arith.constant 0 : index
    %c0_21 = arith.constant 0 : index
    %c0_22 = arith.constant 0 : index
    %30 = vector.load %arg9[%c0_20, %c0_21, %c0_22] : memref<2x2x2xf32, #tpu.memory_space<vmem>>, vector<2x2x2xf32>
    %31 = vector.extract_strided_slice %18 {offsets = [0, 0], sizes = [2, 8], strides = [1, 1]} : vector<2x16xf32> to vector<2x8xf32>
    %32 = vector.shape_cast %31 : vector<2x8xf32> to vector<1x2x8xf32>
    %33 = vector.extract_strided_slice %30 {offsets = [0, 0, 0], sizes = [2, 2, 1], strides = [1, 1, 1]} : vector<2x2x2xf32> to vector<2x2x1xf32>
    %34 = vector.broadcast %32 : vector<1x2x8xf32> to vector<2x2x8xf32>
    %35 = vector.broadcast %33 : vector<2x2x1xf32> to vector<2x2x8xf32>
    %36 = arith.mulf %34, %35 : vector<2x2x8xf32>
    %37 = arith.addf %29, %36 : vector<2x2x8xf32>
    %38 = vector.extract_strided_slice %18 {offsets = [0, 8], sizes = [2, 8], strides = [1, 1]} : vector<2x16xf32> to vector<2x8xf32>
    %39 = vector.shape_cast %38 : vector<2x8xf32> to vector<1x2x8xf32>
    %40 = vector.extract_strided_slice %30 {offsets = [0, 0, 1], sizes = [2, 2, 1], strides = [1, 1, 1]} : vector<2x2x2xf32> to vector<2x2x1xf32>
    %41 = vector.broadcast %39 : vector<1x2x8xf32> to vector<2x2x8xf32>
    %42 = vector.broadcast %40 : vector<2x2x1xf32> to vector<2x2x8xf32>
    %43 = arith.mulf %41, %42 : vector<2x2x8xf32>
    %44 = arith.addf %37, %43 : vector<2x2x8xf32>
    %45 = vector.shape_cast %44 : vector<2x2x8xf32> to vector<4x8xf32>
    %c0_23 = arith.constant 0 : index
    %c0_24 = arith.constant 0 : index
    %46 = vector.load %arg5[%c0_23, %c0_24] : memref<8x512xf32, #tpu.memory_space<vmem>>, vector<8x512xf32>
    %cst_25 = arith.constant dense<0.000000e+00> : vector<4x512xf32>
    %47 = tpu.matmul %45, %46, %cst_25 {dimension_numbers = #tpu.dot_dimension_numbers<[1], [0], [0], [1], [0, 0, 1, 1], [], []>} : vector<4x8xf32>, vector<8x512xf32>, vector<4x512xf32> -> vector<4x512xf32>
    %c0_26 = arith.constant 0 : index
    %c0_27 = arith.constant 0 : index
    %48 = vector.load %arg6[%c0_26, %c0_27] : memref<1x512xf32, #tpu.memory_space<vmem>>, vector<1x512xf32>
    %49 = vector.broadcast %48 : vector<1x512xf32> to vector<4x512xf32>
    %50 = arith.addf %47, %49 : vector<4x512xf32>
    %51 = math.tanh %50 : vector<4x512xf32>
    %52 = arith.truncf %51 : vector<4x512xf32> to vector<4x512xbf16>
    %c0_28 = arith.constant 0 : index
    %c0_29 = arith.constant 0 : index
    %53 = vector.load %arg7[%c0_28, %c0_29] : memref<512x1024xbf16, #tpu.memory_space<vmem>>, vector<512x1024xbf16>
    %cst_30 = arith.constant dense<0.000000e+00> : vector<4x1024xf32>
    %54 = tpu.matmul %52, %53, %cst_30 {dimension_numbers = #tpu.dot_dimension_numbers<[1], [0], [0], [1], [0, 0, 1, 1], [], []>} : vector<4x512xbf16>, vector<512x1024xbf16>, vector<4x1024xf32> -> vector<4x1024xf32>
    %c0_31 = arith.constant 0 : index
    %c0_32 = arith.constant 0 : index
    %55 = vector.load %arg8[%c0_31, %c0_32] : memref<1x1024xf32, #tpu.memory_space<vmem>>, vector<1x1024xf32>
    %56 = vector.broadcast %55 : vector<1x1024xf32> to vector<4x1024xf32>
    %57 = arith.addf %54, %56 : vector<4x1024xf32>
    %c0_33 = arith.constant 0 : index
    %c0_34 = arith.constant 0 : index
    %58 = vector.load %arg11[%c0_33, %c0_34] : memref<4x1024xf32, #tpu.memory_space<vmem>>, vector<4x1024xf32>
    tpu.vector_store %arg11[%c0_33, %c0_34], %57 {strides = array<i32>} : memref<4x1024xf32, #tpu.memory_space<vmem>>, vector<4x1024xf32>,
    return
  }
}

</mosaic_0001>

<bundles_post_ra>
// kernel: vae_forward.1
= control target key start
LH: loop header
LB: loop body
LE: loop exit
PB: predicated region body
PF: predicated region fallthrough
CT: control target
= control target key end

     0   :  { %20 = vsyncpa [#allocation3], 0  ;;  %s7683_s0 = inlined_call_operand.vmem [shape: f32[2,1024], index: 0, kind: input, shape index: {}]   ;;  %s7684_s1 = inlined_call_operand.hbm [shape: bf16[1024,512], index: 1, kind: input, shape index: {}]   ;;  %s7685_s2 = inlined_call_operand.vmem [shape: f32[1,512], index: 2, kind: input, shape index: {}]   ;;  %s7686_s3 = inlined_call_operand.vmem [shape: f32[512,32], index: 3, kind: input, shape index: {}]   ;;  %s7687_s4 = inlined_call_operand.vmem [shape: f32[1,32], index: 4, kind: input, shape index: {}]   ;;  %s7688_s5 = inlined_call_operand.vmem [shape: f32[8,512], index: 5, kind: input, shape index: {}]   ;;  %s7689_s6 = inlined_call_operand.vmem [shape: f32[1,512], index: 6, kind: input, shape index: {}]   ;;  %s7690_s7 = inlined_call_operand.hbm [shape: bf16[512,1024], index: 7, kind: input, shape index: {}]   ;;  %s7691_s8 = inlined_call_operand.vmem [shape: f32[1,1024], index: 8, kind: input, shape index: {}]   ;;  %s7692_s9 = inlined_call_operand.vmem [shape: f32[2,2,2], index: 9, kind: input, shape index: {}]   ;;  %s7693_s10 = inlined_call_operand.vmem [shape: f32[2,2,8], index: 10, kind: input, shape index: {}]   ;;  %s7694_s11 = inlined_call_operand.vmem [shape: f32[4,1024], index: 11, kind: output, shape index: {0}]   ;;  %s7695_s12 = inlined_call_operand.hbm [shape: f32[2,8], index: 12, kind: output, shape index: {1}]   ;;  %s7696_s13 = inlined_call_operand.hbm [shape: f32[2,8], index: 13, kind: output, shape index: {2}]   ;;  %s7697_s14 = inlined_call_operand.vmem [shape: f32[2,16], index: 14, kind: output, shape index: {3}]  }
   0x1   :  { %21 = vsyncpa [#allocation6], 0 }
   0x2   :  { %22 = vsyncpa [#allocation4], 0 }
   0x3   :  { %23 = vsyncpa [#allocation9], 0  ;;  %s30_s15 = sshll.u32 %s7684_s1, 4  ;;  %s7169_s16 = smov [#allocation2]   ;;  %s31_s15 = int_to_ptr.hbm [resolvable:$true] %s30_s15 }
   0x4   :  { %s32_s17 = sshll.u32 %s7169_s16, 4  ;;  %s53_s20 = sshll.u32 %s7690_s7, 4  ;;  %s33_s17 = int_to_ptr.vmem [resolvable:$true] %s32_s17  ;;  %s54_s20 = int_to_ptr.hbm [resolvable:$true] %s53_s20 }
   0x5   :  { %s7170_s21 = smov 256   ;;  %s7171_s22 = smov 16  }
   0x6   :  { %38 = dma.hbm_to_vmem [thread:$0]  %s31_s15, 32768, %s33_s17, [#allocation3], %s7170_s21, %s7170_s21, %s7171_s22  }
   0x7   :  { %s7172_s23 = smov [#allocation5]   ;;  %s7173_s25 = smov 512  }
   0x8   :  { %s55_s24 = sshll.u32 %s7172_s23, 4  ;;  %s7174_s26 = smov 32   ;;  %s56_s24 = int_to_ptr.vmem [resolvable:$true] %s55_s24 }
   0x9   :  { %61 = dma.hbm_to_vmem [thread:$0]  %s54_s20, 32768, %s56_s24, [#allocation6], %s7173_s25, %s7173_s25, %s7174_s26  }
   0xa   :  { %7161 = dma.done.wait [#allocation3], 32768  }
   0xb   :  { %7162 = vsyncadd [#allocation3], 4294934528 }
   0xc   :  { %7163 = dma.done.wait [#allocation6], 32768  }
   0xd   :  { %7164 = vsyncadd [#allocation6], 4294934528  ;;  %v4576_v0 = vld [vmem:[#allocation2 + $0xe0] sm:$0xf]  ;;  %v6544_v1 = vld [vmem:[#allocation2 + $0xec] sm:$0xf0] }
   0xe   :  { %v4704_v2 = vld [vmem:[#allocation2 + $0x1e0] sm:$0xf]  ;;  %v4577_v3 = vor.u32 %v6544_v1, %v4576_v0  ;;  %v6576_v4 = vld [vmem:[#allocation2 + $0x1ec] sm:$0xf0]  ;;  %s7177_s15 = smov 8   ;;  %vm2223_vm0 = vcmask 58368  }
   0xf   :  { %v4832_v5 = vld [vmem:[#allocation2 + $0x2e0] sm:$0xf]  ;;  %v6608_v6 = vld [vmem:[#allocation2 + $0x2ec] sm:$0xf0]  ;;  %v4705_v7 = vor.u32 %v6576_v4, %v4704_v2  ;;  %s7180_s19 = smov 120   ;;  %vm2234_vm3 = vcmask 123904  }
  0x10   :  { %v4833_v8 = vor.u32 %v6608_v6, %v4832_v5  ;;  %v4960_v9 = vld [vmem:[#allocation2 + $0x3e0] sm:$0xf]  ;;  %v6640_v10 = vld [vmem:[#allocation2 + $0x3ec] sm:$0xf0]  ;;  %1653 = vmatpush.bf16.msra.mxu0 %v4577_v3  ;;  %vm2334_vm4 = vcmask 64512   ;;  %vm4407_vm5 = vcmask 1043456  }
  0x11   :  { %v4560_v11 = vld [vmem:[#allocation2 + $0xc0] sm:$0xf]  ;;  %v4961_v12 = vor.u32 %v6640_v10, %v4960_v9  ;;  %v6540_v13 = vld [vmem:[#allocation2 + $0xcc] sm:$0xf0]  ;;  %1666 = vmatpush.bf16.msra.mxu1 %v4705_v7  ;;  %s7182_s16 = smov [#allocation8]  }
  0x12   :  { %v4688_v14 = vld [vmem:[#allocation2 + $0x1c0] sm:$0xf]  ;;  %v6572_v15 = vld [vmem:[#allocation2 + $0x1cc] sm:$0xf0]  ;;  %1679 = vmatpush.bf16.msra.mxu2 %v4833_v8  ;;  %v4561_v16 = vor.u32 %v6540_v13, %v4560_v11  ;;  %s4438_s17 = sshll.u32 %s7182_s16, 4  ;;  %s4439_s17 = int_to_ptr.vmem [resolvable:$true] %s4438_s17 }
  0x13   :  { %v4689_v17 = vor.u32 %v6572_v15, %v4688_v14  ;;  %v4816_v18 = vld [vmem:[#allocation2 + $0x2c0] sm:$0xf]  ;;  %v6604_v19 = vld [vmem:[#allocation2 + $0x2cc] sm:$0xf0]  ;;  %1692 = vmatpush.bf16.msra.mxu3 %v4961_v12 }
  0x14   :  { %v4944_v20 = vld [vmem:[#allocation2 + $0x3c0] sm:$0xf]  ;;  %v4817_v21 = vor.u32 %v6604_v19, %v4816_v18  ;;  %v6636_v22 = vld [vmem:[#allocation2 + $0x3cc] sm:$0xf0]  ;;  %1654 = vmatpush.bf16.msra.mxu0 %v4561_v16 }
  0x15   :  { %v4544_v23 = vld [vmem:[#allocation2 + $0xa0] sm:$0xf]  ;;  %v6536_v24 = vld [vmem:[#allocation2 + $0xac] sm:$0xf0]  ;;  %v4945_v25 = vor.u32 %v6636_v22, %v4944_v20  ;;  %1667 = vmatpush.bf16.msra.mxu1 %v4689_v17 }
  0x16   :  { %v4672_v26 = vld [vmem:[#allocation2 + $0x1a0] sm:$0xf]  ;;  %v6568_v27 = vld [vmem:[#allocation2 + $0x1ac] sm:$0xf0]  ;;  %v4545_v29 = vor.u32 %v6536_v24, %v4544_v23  ;;  %1680 = vmatpush.bf16.msra.mxu2 %v4817_v21 }
  0x17   :  { %v4800_v28 = vld [vmem:[#allocation2 + $0x2a0] sm:$0xf]  ;;  %v6600_v30 = vld [vmem:[#allocation2 + $0x2ac] sm:$0xf0]  ;;  %v4673_v33 = vor.u32 %v6568_v27, %v4672_v26  ;;  %1693 = vmatpush.bf16.msra.mxu3 %v4945_v25 }
  0x18   :  { %v4928_v31 = vld [vmem:[#allocation2 + $0x3a0] sm:$0xf]  ;;  %v6632_v32 = vld [vmem:[#allocation2 + $0x3ac] sm:$0xf0]  ;;  %v4801_v34 = vor.u32 %v6600_v30, %v4800_v28  ;;  %1655 = vmatpush.bf16.msra.mxu0 %v4545_v29 }
  0x19   :  { %v4528_v35 = vld [vmem:[#allocation2 + $0x80] sm:$0xf]  ;;  %v6532_v36 = vld [vmem:[#allocation2 + $0x8c] sm:$0xf0]  ;;  %v4929_v38 = vor.u32 %v6632_v32, %v4928_v31  ;;  %1668 = vmatpush.bf16.msra.mxu1 %v4673_v33 }
  0x1a   :  { %v4656_v37 = vld [vmem:[#allocation2 + $0x180] sm:$0xf]  ;;  %v6564_v39 = vld [vmem:[#allocation2 + $0x18c] sm:$0xf0]  ;;  %v4529_v44 = vor.u32 %v6532_v36, %v4528_v35  ;;  %1681 = vmatpush.bf16.msra.mxu2 %v4801_v34 }
  0x1b   :  { %v4784_v40 = vld [vmem:[#allocation2 + $0x280] sm:$0xf]  ;;  %v6596_v41 = vld [vmem:[#allocation2 + $0x28c] sm:$0xf0]  ;;  %v4657_v45 = vor.u32 %v6564_v39, %v4656_v37  ;;  %1694 = vmatpush.bf16.msra.mxu3 %v4929_v38 }
  0x1c   :  { %v4912_v42 = vld [vmem:[#allocation2 + $0x380] sm:$0xf]  ;;  %v6628_v43 = vld [vmem:[#allocation2 + $0x38c] sm:$0xf0]  ;;  %v4785_v46 = vor.u32 %v6596_v41, %v4784_v40  ;;  %1656 = vmatpush.bf16.msra.mxu0 %v4529_v44 }
  0x1d   :  { %v4512_v47 = vld [vmem:[#allocation2 + $0x60] sm:$0xf]  ;;  %v6528_v48 = vld [vmem:[#allocation2 + $0x6c] sm:$0xf0]  ;;  %v4913_v50 = vor.u32 %v6628_v43, %v4912_v42  ;;  %1669 = vmatpush.bf16.msra.mxu1 %v4657_v45 }
  0x1e   :  { %v4640_v49 = vld [vmem:[#allocation2 + $0x160] sm:$0xf]  ;;  %v6560_v51 = vld [vmem:[#allocation2 + $0x16c] sm:$0xf0]  ;;  %v4513_v56 = vor.u32 %v6528_v48, %v4512_v47  ;;  %1682 = vmatpush.bf16.msra.mxu2 %v4785_v46 }
  0x1f   :  { %v4768_v52 = vld [vmem:[#allocation2 + $0x260] sm:$0xf]  ;;  %v6592_v53 = vld [vmem:[#allocation2 + $0x26c] sm:$0xf0]  ;;  %v4641_v57 = vor.u32 %v6560_v51, %v4640_v49  ;;  %1695 = vmatpush.bf16.msra.mxu3 %v4913_v50 }
  0x20   :  { %v4896_v54 = vld [vmem:[#allocation2 + $0x360] sm:$0xf]  ;;  %v6624_v55 = vld [vmem:[#allocation2 + $0x36c] sm:$0xf0]  ;;  %v4769_v58 = vor.u32 %v6592_v53, %v4768_v52  ;;  %1657 = vmatpush.bf16.msra.mxu0 %v4513_v56 }
  0x21   :  { %v4496_v59 = vld [vmem:[#allocation2 + $0x40] sm:$0xf]  ;;  %v6524_v60 = vld [vmem:[#allocation2 + $0x4c] sm:$0xf0]  ;;  %v4897_v62 = vor.u32 %v6624_v55, %v4896_v54  ;;  %1670 = vmatpush.bf16.msra.mxu1 %v4641_v57 }
  0x22   :  { %v4624_v61 = vld [vmem:[#allocation2 + $0x140] sm:$0xf]  ;;  %v6556_v63 = vld [vmem:[#allocation2 + $0x14c] sm:$0xf0]  ;;  %v4497_v4 = vor.u32 %v6524_v60, %v4496_v59  ;;  %1683 = vmatpush.bf16.msra.mxu2 %v4769_v58 }
  0x23   :  { %v4752_v0 = vld [vmem:[#allocation2 + $0x240] sm:$0xf]  ;;  %v6588_v1 = vld [vmem:[#allocation2 + $0x24c] sm:$0xf0]  ;;  %v4625_v5 = vor.u32 %v6556_v63, %v4624_v61  ;;  %1696 = vmatpush.bf16.msra.mxu3 %v4897_v62 }
  0x24   :  { %v4880_v2 = vld [vmem:[#allocation2 + $0x340] sm:$0xf]  ;;  %v6620_v3 = vld [vmem:[#allocation2 + $0x34c] sm:$0xf0]  ;;  %v4753_v6 = vor.u32 %v6588_v1, %v4752_v0  ;;  %1658 = vmatpush.bf16.msra.mxu0 %v4497_v4 }
  0x25   :  { %v4480_v7 = vld [vmem:[#allocation2 + $0x20] sm:$0xf]  ;;  %v6520_v8 = vld [vmem:[#allocation2 + $0x2c] sm:$0xf0]  ;;  %v4881_v10 = vor.u32 %v6620_v3, %v4880_v2  ;;  %1671 = vmatpush.bf16.msra.mxu1 %v4625_v5  ;;  %v76_v2 = vld [vmem:[%s7683_s0] sm:$0xff] }
  0x26   :  { %v4608_v9 = vld [vmem:[#allocation2 + $0x120] sm:$0xf]  ;;  %v6552_v11 = vld [vmem:[#allocation2 + $0x12c] sm:$0xf0]  ;;  %v4481_v16 = vor.u32 %v6520_v8, %v4480_v7  ;;  %1684 = vmatpush.bf16.msra.mxu2 %v4753_v6  ;;  %80 = vst [vmem:[#allocation1] ss:$4 sm:$0xff] %v76_v2 }
  0x27   :  { %v4736_v12 = vld [vmem:[#allocation2 + $0x220] sm:$0xf]  ;;  %v6584_v13 = vld [vmem:[#allocation2 + $0x22c] sm:$0xf0]  ;;  %v4609_v19 = vor.u32 %v6552_v11, %v4608_v9  ;;  %1697 = vmatpush.bf16.msra.mxu3 %v4881_v10 }
  0x28   :  { %v4864_v14 = vld [vmem:[#allocation2 + $0x320] sm:$0xf]  ;;  %v6616_v15 = vld [vmem:[#allocation2 + $0x32c] sm:$0xf0]  ;;  %v4737_v20 = vor.u32 %v6584_v13, %v4736_v12  ;;  %1659 = vmatpush.bf16.msra.mxu0 %v4481_v16 }
  0x29   :  { %v4464_v17 = vld [vmem:[#allocation2] sm:$0xf]  ;;  %v6516_v18 = vld [vmem:[#allocation2 + $0xc] sm:$0xf0]  ;;  %v4865_v24 = vor.u32 %v6616_v15, %v4864_v14  ;;  %1672 = vmatpush.bf16.msra.mxu1 %v4609_v19 }
  0x2a   :  { %v4592_v21 = vld [vmem:[#allocation2 + $0x100] sm:$0xf]  ;;  %v6548_v22 = vld [vmem:[#allocation2 + $0x10c] sm:$0xf0]  ;;  %v4465_v31 = vor.u32 %v6516_v18, %v4464_v17  ;;  %1685 = vmatpush.bf16.msra.mxu2 %v4737_v20 }
  0x2b   :  { %v4720_v23 = vld [vmem:[#allocation2 + $0x200] sm:$0xf]  ;;  %v6580_v25 = vld [vmem:[#allocation2 + $0x20c] sm:$0xf0]  ;;  %v4593_v35 = vor.u32 %v6548_v22, %v4592_v21  ;;  %1698 = vmatpush.bf16.msra.mxu3 %v4865_v24 }
  0x2c   :  { %v4848_v26 = vld [vmem:[#allocation2 + $0x300] sm:$0xf]  ;;  %v6612_v27 = vld [vmem:[#allocation2 + $0x30c] sm:$0xf0]  ;;  %v4721_v36 = vor.u32 %v6580_v25, %v4720_v23  ;;  %1660 = vmatpush.bf16.msra.mxu0 %v4465_v31 }
  0x2d   :  { %v5088_v28 = vld [vmem:[#allocation2 + $0x4e0] sm:$0xf]  ;;  %v6672_v29 = vld [vmem:[#allocation2 + $0x4ec] sm:$0xf0]  ;;  %v4849_v39 = vor.u32 %v6612_v27, %v4848_v26  ;;  %1673 = vmatpush.bf16.msra.mxu1 %v4593_v35 }
  0x2e   :  { %v5216_v30 = vld [vmem:[#allocation2 + $0x5e0] sm:$0xf]  ;;  %v6704_v32 = vld [vmem:[#allocation2 + $0x5ec] sm:$0xf0]  ;;  %v5089_v40 = vor.u32 %v6672_v29, %v5088_v28  ;;  %1686 = vmatpush.bf16.msra.mxu2 %v4721_v36 }
  0x2f   :  { %v5344_v33 = vld [vmem:[#allocation2 + $0x6e0] sm:$0xf]  ;;  %v6736_v34 = vld [vmem:[#allocation2 + $0x6ec] sm:$0xf0]  ;;  %v5217_v41 = vor.u32 %v6704_v32, %v5216_v30  ;;  %1699 = vmatpush.bf16.msra.mxu3 %v4849_v39 }
  0x30   :  { %v5472_v37 = vld [vmem:[#allocation2 + $0x7e0] sm:$0xf]  ;;  %v6768_v38 = vld [vmem:[#allocation2 + $0x7ec] sm:$0xf0]  ;;  %v5345_v42 = vor.u32 %v6736_v34, %v5344_v33  ;;  %1705 = vmatpush.bf16.msrb.mxu0 %v5089_v40 }
  0x31   :  { %v5072_v43 = vld [vmem:[#allocation2 + $0x4c0] sm:$0xf]  ;;  %v6668_v44 = vld [vmem:[#allocation2 + $0x4cc] sm:$0xf0]  ;;  %v5473_v46 = vor.u32 %v6768_v38, %v5472_v37  ;;  %1718 = vmatpush.bf16.msrb.mxu1 %v5217_v41 }
  0x32   :  { %v5200_v45 = vld [vmem:[#allocation2 + $0x5c0] sm:$0xf]  ;;  %v6700_v47 = vld [vmem:[#allocation2 + $0x5cc] sm:$0xf0]  ;;  %v5073_v52 = vor.u32 %v6668_v44, %v5072_v43  ;;  %1731 = vmatpush.bf16.msrb.mxu2 %v5345_v42 }
  0x33   :  { %v5328_v48 = vld [vmem:[#allocation2 + $0x6c0] sm:$0xf]  ;;  %v6732_v49 = vld [vmem:[#allocation2 + $0x6cc] sm:$0xf0]  ;;  %v5201_v53 = vor.u32 %v6700_v47, %v5200_v45  ;;  %1744 = vmatpush.bf16.msrb.mxu3 %v5473_v46 }
  0x34   :  { %v5456_v50 = vld [vmem:[#allocation2 + $0x7c0] sm:$0xf]  ;;  %v6764_v51 = vld [vmem:[#allocation2 + $0x7cc] sm:$0xf0]  ;;  %v5329_v54 = vor.u32 %v6732_v49, %v5328_v48  ;;  %1706 = vmatpush.bf16.msrb.mxu0 %v5073_v52 }
  0x35   :  { %v5056_v55 = vld [vmem:[#allocation2 + $0x4a0] sm:$0xf]  ;;  %v6664_v56 = vld [vmem:[#allocation2 + $0x4ac] sm:$0xf0]  ;;  %v5457_v58 = vor.u32 %v6764_v51, %v5456_v50  ;;  %1719 = vmatpush.bf16.msrb.mxu1 %v5201_v53 }
  0x36   :  { %v5184_v57 = vld [vmem:[#allocation2 + $0x5a0] sm:$0xf]  ;;  %v6696_v59 = vld [vmem:[#allocation2 + $0x5ac] sm:$0xf0]  ;;  %v5057_v0 = vor.u32 %v6664_v56, %v5056_v55  ;;  %1732 = vmatpush.bf16.msrb.mxu2 %v5329_v54 }
  0x37   :  { %v5312_v60 = vld [vmem:[#allocation2 + $0x6a0] sm:$0xf]  ;;  %v6728_v61 = vld [vmem:[#allocation2 + $0x6ac] sm:$0xf0]  ;;  %v5185_v3 = vor.u32 %v6696_v59, %v5184_v57  ;;  %1745 = vmatpush.bf16.msrb.mxu3 %v5457_v58 }
  0x38   :  { %v5440_v62 = vld [vmem:[#allocation2 + $0x7a0] sm:$0xf]  ;;  %v6760_v63 = vld [vmem:[#allocation2 + $0x7ac] sm:$0xf0]  ;;  %v5313_v4 = vor.u32 %v6728_v61, %v5312_v60  ;;  %1707 = vmatpush.bf16.msrb.mxu0 %v5057_v0 }
  0x39   :  { %v5040_v1 = vld [vmem:[#allocation2 + $0x480] sm:$0xf]  ;;  %v6660_v5 = vld [vmem:[#allocation2 + $0x48c] sm:$0xf0]  ;;  %v5441_v7 = vor.u32 %v6760_v63, %v5440_v62  ;;  %1720 = vmatpush.bf16.msrb.mxu1 %v5185_v3 }
  0x3a   :  { %v5168_v6 = vld [vmem:[#allocation2 + $0x580] sm:$0xf]  ;;  %v6692_v8 = vld [vmem:[#allocation2 + $0x58c] sm:$0xf0]  ;;  %v5041_v13 = vor.u32 %v6660_v5, %v5040_v1  ;;  %1733 = vmatpush.bf16.msrb.mxu2 %v5313_v4 }
  0x3b   :  { %v5296_v9 = vld [vmem:[#allocation2 + $0x680] sm:$0xf]  ;;  %v6724_v10 = vld [vmem:[#allocation2 + $0x68c] sm:$0xf0]  ;;  %v5169_v15 = vor.u32 %v6692_v8, %v5168_v6  ;;  %1746 = vmatpush.bf16.msrb.mxu3 %v5441_v7  ;;  %v6542_v6 = vld [vmem:[#allocation2 + $0xe4] sm:$0xf] }
  0x3c   :  { %v5424_v11 = vld [vmem:[#allocation2 + $0x780] sm:$0xf]  ;;  %v6756_v12 = vld [vmem:[#allocation2 + $0x78c] sm:$0xf0]  ;;  %v5297_v16 = vor.u32 %v6724_v10, %v5296_v9  ;;  %1708 = vmatpush.bf16.msrb.mxu0 %v5041_v13  ;;  %v4578_v7 = vld [vmem:[#allocation2 + $0xf0] sm:$0xf0] }
  0x3d   :  { %v5024_v14 = vld [vmem:[#allocation2 + $0x460] sm:$0xf]  ;;  %v6656_v17 = vld [vmem:[#allocation2 + $0x46c] sm:$0xf0]  ;;  %v5425_v20 = vor.u32 %v6756_v12, %v5424_v11  ;;  %1721 = vmatpush.bf16.msrb.mxu1 %v5169_v15  ;;  %v6574_v8 = vld [vmem:[#allocation2 + $0x1e4] sm:$0xf] }
  0x3e   :  { %v5152_v18 = vld [vmem:[#allocation2 + $0x560] sm:$0xf]  ;;  %v6688_v19 = vld [vmem:[#allocation2 + $0x56c] sm:$0xf0]  ;;  %v5025_v27 = vor.u32 %v6656_v17, %v5024_v14  ;;  %1734 = vmatpush.bf16.msrb.mxu2 %v5297_v16  ;;  %v4706_v9 = vld [vmem:[#allocation2 + $0x1f0] sm:$0xf0] }
  0x3f   :  { %v5280_v21 = vld [vmem:[#allocation2 + $0x660] sm:$0xf]  ;;  %v6720_v22 = vld [vmem:[#allocation2 + $0x66c] sm:$0xf0]  ;;  %v5153_v28 = vor.u32 %v6688_v19, %v5152_v18  ;;  %1747 = vmatpush.bf16.msrb.mxu3 %v5425_v20  ;;  %v6606_v10 = vld [vmem:[#allocation2 + $0x2e4] sm:$0xf] }
  0x40   :  { %v5408_v23 = vld [vmem:[#allocation2 + $0x760] sm:$0xf]  ;;  %v6752_v24 = vld [vmem:[#allocation2 + $0x76c] sm:$0xf0]  ;;  %v5281_v32 = vor.u32 %v6720_v22, %v5280_v21  ;;  %1709 = vmatpush.bf16.msrb.mxu0 %v5025_v27  ;;  %v4834_v12 = vld [vmem:[#allocation2 + $0x2f0] sm:$0xf0]  ;;  %v4581_v21 = vor.u32 %v6542_v6, %v4578_v7 }
  0x41   :  { %v5008_v25 = vld [vmem:[#allocation2 + $0x440] sm:$0xf]  ;;  %v6652_v26 = vld [vmem:[#allocation2 + $0x44c] sm:$0xf0]  ;;  %v5409_v37 = vor.u32 %v6752_v24, %v5408_v23  ;;  %1722 = vmatpush.bf16.msrb.mxu1 %v5153_v28  ;;  %v6638_v13 = vld [vmem:[#allocation2 + $0x3e4] sm:$0xf]  ;;  %v4709_v24 = vor.u32 %v6574_v8, %v4706_v9 }
  0x42   :  { %v5136_v29 = vld [vmem:[#allocation2 + $0x540] sm:$0xf]  ;;  %v85_v30 = vld.sshfl [vmem:[#allocation1 + $0x10] sm:$0xff pattern:$0x73625140]  ;;  %v5009_v45 = vor.u32 %v6652_v26, %v5008_v25  ;;  %1735 = vmatpush.bf16.msrb.mxu2 %v5281_v32  ;;  %v4837_v25 = vor.u32 %v6606_v10, %v4834_v12 }
  0x43   :  { %v83_v31 = vld.sshfl [vmem:[#allocation1] sm:$0xff pattern:$0x73625140]  ;;  %v7267_v33 = vpack.c.bf16 %v85_v30, %v85_v30  ;;  %v86_v35 = vld.sshfl [vmem:[#allocation1 + $0x18] sm:$0xff pattern:$0x73625140]  ;;  %1748 = vmatpush.bf16.msrb.mxu3 %v5409_v37 }
  0x44   :  { %v7269_v34 = vpack.c.bf16 %v83_v31, %v83_v31  ;;  %v84_v36 = vld.sshfl [vmem:[#allocation1 + $0x8] sm:$0xff pattern:$0x73625140]  ;;  %v6684_v38 = vld [vmem:[#allocation2 + $0x54c] sm:$0xf0]  ;;  %v7271_v41 = vpack.c.bf16 %v86_v35, %v86_v35  ;;  %1710 = vmatpush.bf16.msrb.mxu0 %v5009_v45 }
  0x45   :  { %v5264_v39 = vld [vmem:[#allocation2 + $0x640] sm:$0xf]  ;;  %v6716_v40 = vld [vmem:[#allocation2 + $0x64c] sm:$0xf0]  ;;  %v7273_v42 = vpack.c.bf16 %v84_v36, %v84_v36  ;;  %1687 = vmatmul.bf16.vlgmr.msra.gmra.mxu2 %v7267_v33  ;;  %v5137_v48 = vor.u32 %v6684_v38, %v5136_v29  ;;  %v4962_v14 = vld [vmem:[#allocation2 + $0x3f0] sm:$0xf0] }
  0x46   :  { %v5392_v43 = vld [vmem:[#allocation2 + $0x740] sm:$0xf]  ;;  %v6748_v44 = vld [vmem:[#allocation2 + $0x74c] sm:$0xf0]  ;;  %1661 = vmatmul.bf16.vlgmr.msra.gmra.mxu0 %v7269_v34  ;;  %1700 = vmatmul.bf16.vlgmr.msra.gmra.mxu3 %v7271_v41  ;;  %v5265_v49 = vor.u32 %v6716_v40, %v5264_v39  ;;  %v6538_v17 = vld [vmem:[#allocation2 + $0xc4] sm:$0xf]  ;;  %v4965_v28 = vor.u32 %v6638_v13, %v4962_v14 }
  0x47   :  { %v4992_v46 = vld [vmem:[#allocation2 + $0x420] sm:$0xf]  ;;  %v6648_v47 = vld [vmem:[#allocation2 + $0x42c] sm:$0xf0]  ;;  %v5393_v53 = vor.u32 %v6748_v44, %v5392_v43  ;;  %1674 = vmatmul.bf16.vlgmr.msra.gmra.mxu1 %v7273_v42  ;;  %v4562_v18 = vld [vmem:[#allocation2 + $0xd0] sm:$0xf0] }
  0x48   :  { %v5120_v50 = vld [vmem:[#allocation2 + $0x520] sm:$0xf]  ;;  %v6680_v51 = vld [vmem:[#allocation2 + $0x52c] sm:$0xf0]  ;;  %v4993_v59 = vor.u32 %v6648_v47, %v4992_v46  ;;  %1723 = vmatpush.bf16.msrb.mxu1 %v5137_v48  ;;  %1736 = vmatpush.bf16.msrb.mxu2 %v5265_v49  ;;  %v6570_v26 = vld [vmem:[#allocation2 + $0x1c4] sm:$0xf]  ;;  %v4565_v39 = vor.u32 %v6538_v17, %v4562_v18 }
  0x49   :  { %v77_v52 = vld [vmem:[%s7683_s0 + $0x8] sm:$0xff]  ;;  %v6712_v55 = vld [vmem:[#allocation2 + $0x62c] sm:$0xf0]  ;;  %v5121_v63 = vor.u32 %v6680_v51, %v5120_v50  ;;  %1749 = vmatpush.bf16.msrb.mxu3 %v5393_v53  ;;  %v4690_v29 = vld [vmem:[#allocation2 + $0x1d0] sm:$0xf0] }
  0x4a   :  { %v5248_v54 = vld [vmem:[#allocation2 + $0x620] sm:$0xf]  ;;  %82 = vst [vmem:[#allocation1 + $0x20] ss:$4 sm:$0xff] %v77_v52  ;;  %v6744_v57 = vld [vmem:[#allocation2 + $0x72c] sm:$0xf0]  ;;  %1711 = vmatpush.bf16.msrb.mxu0 %v4993_v59  ;;  %v4693_v43 = vor.u32 %v6570_v26, %v4690_v29 }
  0x4b   :  { %v5376_v56 = vld [vmem:[#allocation2 + $0x720] sm:$0xf]  ;;  %v6644_v60 = vld [vmem:[#allocation2 + $0x40c] sm:$0xf0]  ;;  %v5249_v0 = vor.u32 %v6712_v55, %v5248_v54  ;;  %v6602_v30 = vld [vmem:[#allocation2 + $0x2c4] sm:$0xf] }
  0x4c   :  { %v4976_v58 = vld [vmem:[#allocation2 + $0x400] sm:$0xf]  ;;  %v6676_v62 = vld [vmem:[#allocation2 + $0x50c] sm:$0xf0]  ;;  %v5377_v4 = vor.u32 %v6744_v57, %v5376_v56  ;;  %1724 = vmatpush.bf16.msrb.mxu1 %v5121_v63  ;;  %v4818_v31 = vld [vmem:[#allocation2 + $0x2d0] sm:$0xf0] }
  0x4d   :  { %v5104_v61 = vld [vmem:[#allocation2 + $0x500] sm:$0xf]  ;;  %v6708_v2 = vld [vmem:[#allocation2 + $0x60c] sm:$0xf0]  ;;  %v4977_v11 = vor.u32 %v6644_v60, %v4976_v58  ;;  %1737 = vmatpush.bf16.msrb.mxu2 %v5249_v0  ;;  %v6634_v35 = vld [vmem:[#allocation2 + $0x3c4] sm:$0xf]  ;;  %v4821_v44 = vor.u32 %v6602_v30, %v4818_v31 }
  0x4e   :  { %v5232_v1 = vld [vmem:[#allocation2 + $0x600] sm:$0xf]  ;;  %v6740_v5 = vld [vmem:[#allocation2 + $0x70c] sm:$0xf0]  ;;  %v5105_v15 = vor.u32 %v6676_v62, %v5104_v61  ;;  %1750 = vmatpush.bf16.msrb.mxu3 %v5377_v4  ;;  %v4946_v36 = vld [vmem:[#allocation2 + $0x3d0] sm:$0xf0] }
  0x4f   :  { %v5360_v3 = vld [vmem:[#allocation2 + $0x700] sm:$0xf]  ;;  %v5233_v16 = vor.u32 %v6708_v2, %v5232_v1  ;;  %1712 = vmatpush.bf16.msrb.mxu0 %v4977_v11  ;;  %v6534_v45 = vld [vmem:[#allocation2 + $0xa4] sm:$0xf]  ;;  %v4546_v46 = vld [vmem:[#allocation2 + $0xb0] sm:$0xf0]  ;;  %v4949_v48 = vor.u32 %v6634_v35, %v4946_v36 }
  0x50   :  { %v5361_v20 = vor.u32 %v6740_v5, %v5360_v3  ;;  %1725 = vmatpush.bf16.msrb.mxu1 %v5105_v15  ;;  %v6566_v47 = vld [vmem:[#allocation2 + $0x1a4] sm:$0xf]  ;;  %v4674_v49 = vld [vmem:[#allocation2 + $0x1b0] sm:$0xf0]  ;;  %v4549_v54 = vor.u32 %v6534_v45, %v4546_v46 }
  0x51   :  { %v89_v19 = vld.sshfl [vmem:[#allocation1 + $0x30] sm:$0xff pattern:$0x73625140]  ;;  %v87_v22 = vld.sshfl [vmem:[#allocation1 + $0x20] sm:$0xff pattern:$0x73625140]  ;;  %1738 = vmatpush.bf16.msrb.mxu2 %v5233_v16  ;;  %v4677_v55 = vor.u32 %v6566_v47, %v4674_v49 }
  0x52   :  { %v90_v23 = vld.sshfl [vmem:[#allocation1 + $0x38] sm:$0xff pattern:$0x73625140]  ;;  %v88_v27 = vld.sshfl [vmem:[#allocation1 + $0x28] sm:$0xff pattern:$0x73625140]  ;;  %v7282_v32 = vpack.c.bf16 %v89_v19, %v89_v19  ;;  %v7284_v37 = vpack.c.bf16 %v87_v22, %v87_v22  ;;  %1751 = vmatpush.bf16.msrb.mxu3 %v5361_v20 }
  0x53   :  { %v7286_v38 = vpack.c.bf16 %v90_v23, %v90_v23  ;;  %1757 = vmatpush.bf16.msra.mxu0 %v4581_v21  ;;  %v7288_v40 = vpack.c.bf16 %v88_v27, %v88_v27  ;;  %v6598_v50 = vld [vmem:[#allocation2 + $0x2a4] sm:$0xf]  ;;  %v4802_v51 = vld [vmem:[#allocation2 + $0x2b0] sm:$0xf0] }
  0x54   :  { %1770 = vmatpush.bf16.msra.mxu1 %v4709_v24  ;;  %v6630_v52 = vld [vmem:[#allocation2 + $0x3a4] sm:$0xf]  ;;  %v4930_v53 = vld [vmem:[#allocation2 + $0x3b0] sm:$0xf0]  ;;  %v4805_v56 = vor.u32 %v6598_v50, %v4802_v51 }
  0x55   :  { %1783 = vmatpush.bf16.msra.mxu2 %v4837_v25  ;;  %v6530_v57 = vld [vmem:[#allocation2 + $0x84] sm:$0xf]  ;;  %v4530_v58 = vld [vmem:[#allocation2 + $0x90] sm:$0xf0]  ;;  %v4933_v60 = vor.u32 %v6630_v52, %v4930_v53 }
  0x56   :  { %1796 = vmatpush.bf16.msra.mxu3 %v4965_v28  ;;  %1739 = vmatmul.bf16.vlgmr.msrb.gmra.mxu2 %v7282_v32  ;;  %v6562_v59 = vld [vmem:[#allocation2 + $0x184] sm:$0xf]  ;;  %v4658_v61 = vld [vmem:[#allocation2 + $0x190] sm:$0xf0]  ;;  %v4533_v2 = vor.u32 %v6530_v57, %v4530_v58 }
  0x57   :  { %1713 = vmatmul.bf16.vlgmr.msrb.gmra.mxu0 %v7284_v37  ;;  %1752 = vmatmul.bf16.vlgmr.msrb.gmra.mxu3 %v7286_v38  ;;  %v6594_v62 = vld [vmem:[#allocation2 + $0x284] sm:$0xf]  ;;  %v4786_v63 = vld [vmem:[#allocation2 + $0x290] sm:$0xf0]  ;;  %v4661_v3 = vor.u32 %v6562_v59, %v4658_v61 }
  0x58   :  { %1758 = vmatpush.bf16.msra.mxu0 %v4565_v39  ;;  %1726 = vmatmul.bf16.vlgmr.msrb.gmra.mxu1 %v7288_v40  ;;  %v6626_v0 = vld [vmem:[#allocation2 + $0x384] sm:$0xf]  ;;  %v4914_v1 = vld [vmem:[#allocation2 + $0x390] sm:$0xf0]  ;;  %v4789_v4 = vor.u32 %v6594_v62, %v4786_v63 }
  0x59   :  { %1771 = vmatpush.bf16.msra.mxu1 %v4693_v43  ;;  %1784 = vmatpush.bf16.msra.mxu2 %v4821_v44  ;;  %v6526_v5 = vld [vmem:[#allocation2 + $0x64] sm:$0xf]  ;;  %v4514_v6 = vld [vmem:[#allocation2 + $0x70] sm:$0xf0]  ;;  %v4917_v8 = vor.u32 %v6626_v0, %v4914_v1 }
  0x5a   :  { %1797 = vmatpush.bf16.msra.mxu3 %v4949_v48  ;;  %v6558_v7 = vld [vmem:[#allocation2 + $0x164] sm:$0xf]  ;;  %v4642_v9 = vld [vmem:[#allocation2 + $0x170] sm:$0xf0]  ;;  %v4517_v14 = vor.u32 %v6526_v5, %v4514_v6 }
  0x5b   :  { %v6590_v10 = vld [vmem:[#allocation2 + $0x264] sm:$0xf]  ;;  %v4770_v11 = vld [vmem:[#allocation2 + $0x270] sm:$0xf0]  ;;  %v4645_v15 = vor.u32 %v6558_v7, %v4642_v9 }
  0x5c   :  { %1759 = vmatpush.bf16.msra.mxu0 %v4549_v54  ;;  %v6622_v12 = vld [vmem:[#allocation2 + $0x364] sm:$0xf]  ;;  %v4898_v13 = vld [vmem:[#allocation2 + $0x370] sm:$0xf0]  ;;  %v4773_v16 = vor.u32 %v6590_v10, %v4770_v11 }
  0x5d   :  { %1772 = vmatpush.bf16.msra.mxu1 %v4677_v55  ;;  %1785 = vmatpush.bf16.msra.mxu2 %v4805_v56  ;;  %v6522_v17 = vld [vmem:[#allocation2 + $0x44] sm:$0xf]  ;;  %v4498_v18 = vld [vmem:[#allocation2 + $0x50] sm:$0xf0]  ;;  %v4901_v20 = vor.u32 %v6622_v12, %v4898_v13 }
  0x5e   :  { %1798 = vmatpush.bf16.msra.mxu3 %v4933_v60  ;;  %v6554_v19 = vld [vmem:[#allocation2 + $0x144] sm:$0xf]  ;;  %v4626_v21 = vld [vmem:[#allocation2 + $0x150] sm:$0xf0]  ;;  %v4501_v26 = vor.u32 %v6522_v17, %v4498_v18 }
  0x5f   :  { %v6586_v22 = vld [vmem:[#allocation2 + $0x244] sm:$0xf]  ;;  %v4754_v23 = vld [vmem:[#allocation2 + $0x250] sm:$0xf0]  ;;  %v4629_v27 = vor.u32 %v6554_v19, %v4626_v21 }
  0x60   :  { %1760 = vmatpush.bf16.msra.mxu0 %v4533_v2  ;;  %v6618_v24 = vld [vmem:[#allocation2 + $0x344] sm:$0xf]  ;;  %v4882_v25 = vld [vmem:[#allocation2 + $0x350] sm:$0xf0]  ;;  %v4757_v28 = vor.u32 %v6586_v22, %v4754_v23 }
  0x61   :  { %1773 = vmatpush.bf16.msra.mxu1 %v4661_v3  ;;  %1786 = vmatpush.bf16.msra.mxu2 %v4789_v4  ;;  %v6518_v29 = vld [vmem:[#allocation2 + $0x24] sm:$0xf]  ;;  %v4482_v30 = vld [vmem:[#allocation2 + $0x30] sm:$0xf0]  ;;  %v4885_v35 = vor.u32 %v6618_v24, %v4882_v25 }
  0x62   :  { %1799 = vmatpush.bf16.msra.mxu3 %v4917_v8  ;;  %v6550_v31 = vld [vmem:[#allocation2 + $0x124] sm:$0xf]  ;;  %v4610_v36 = vld [vmem:[#allocation2 + $0x130] sm:$0xf0]  ;;  %v4485_v46 = vor.u32 %v6518_v29, %v4482_v30 }
  0x63   :  { %v6582_v39 = vld [vmem:[#allocation2 + $0x224] sm:$0xf]  ;;  %v4738_v43 = vld [vmem:[#allocation2 + $0x230] sm:$0xf0]  ;;  %v4613_v49 = vor.u32 %v6550_v31, %v4610_v36 }
  0x64   :  { %1761 = vmatpush.bf16.msra.mxu0 %v4517_v14  ;;  %v6614_v44 = vld [vmem:[#allocation2 + $0x324] sm:$0xf]  ;;  %v4866_v45 = vld [vmem:[#allocation2 + $0x330] sm:$0xf0]  ;;  %v4741_v50 = vor.u32 %v6582_v39, %v4738_v43 }
  0x65   :  { %1774 = vmatpush.bf16.msra.mxu1 %v4645_v15  ;;  %1787 = vmatpush.bf16.msra.mxu2 %v4773_v16  ;;  %v6514_v47 = vld [vmem:[#allocation2 + $0x4] sm:$0xf]  ;;  %v4466_v48 = vld [vmem:[#allocation2 + $0x10] sm:$0xf0]  ;;  %v4869_v54 = vor.u32 %v6614_v44, %v4866_v45 }
  0x66   :  { %1800 = vmatpush.bf16.msra.mxu3 %v4901_v20  ;;  %v6546_v51 = vld [vmem:[#allocation2 + $0x104] sm:$0xf]  ;;  %v4594_v52 = vld [vmem:[#allocation2 + $0x110] sm:$0xf0]  ;;  %v4469_v61 = vor.u32 %v6514_v47, %v4466_v48 }
  0x67   :  { %v6578_v53 = vld [vmem:[#allocation2 + $0x204] sm:$0xf]  ;;  %v4722_v55 = vld [vmem:[#allocation2 + $0x210] sm:$0xf0]  ;;  %v4597_v1 = vor.u32 %v6546_v51, %v4594_v52 }
  0x68   :  { %1762 = vmatpush.bf16.msra.mxu0 %v4501_v26  ;;  %v6610_v56 = vld [vmem:[#allocation2 + $0x304] sm:$0xf]  ;;  %v4850_v57 = vld [vmem:[#allocation2 + $0x310] sm:$0xf0]  ;;  %v4725_v2 = vor.u32 %v6578_v53, %v4722_v55 }
  0x69   :  { %1775 = vmatpush.bf16.msra.mxu1 %v4629_v27  ;;  %1788 = vmatpush.bf16.msra.mxu2 %v4757_v28  ;;  %v6670_v58 = vld [vmem:[#allocation2 + $0x4e4] sm:$0xf]  ;;  %v5090_v59 = vld [vmem:[#allocation2 + $0x4f0] sm:$0xf0]  ;;  %v4853_v5 = vor.u32 %v6610_v56, %v4850_v57 }
  0x6a   :  { %1801 = vmatpush.bf16.msra.mxu3 %v4885_v35  ;;  %v6702_v60 = vld [vmem:[#allocation2 + $0x5e4] sm:$0xf]  ;;  %v5218_v62 = vld [vmem:[#allocation2 + $0x5f0] sm:$0xf0]  ;;  %v5093_v6 = vor.u32 %v6670_v58, %v5090_v59 }
  0x6b   :  { %v6734_v63 = vld [vmem:[#allocation2 + $0x6e4] sm:$0xf]  ;;  %v5346_v0 = vld [vmem:[#allocation2 + $0x6f0] sm:$0xf0]  ;;  %v5221_v7 = vor.u32 %v6702_v60, %v5218_v62 }
  0x6c   :  { %1763 = vmatpush.bf16.msra.mxu0 %v4485_v46  ;;  %v6766_v3 = vld [vmem:[#allocation2 + $0x7e4] sm:$0xf]  ;;  %v5474_v4 = vld [vmem:[#allocation2 + $0x7f0] sm:$0xf0]  ;;  %v5349_v8 = vor.u32 %v6734_v63, %v5346_v0 }
  0x6d   :  { %1776 = vmatpush.bf16.msra.mxu1 %v4613_v49  ;;  %1789 = vmatpush.bf16.msra.mxu2 %v4741_v50  ;;  %v6666_v9 = vld [vmem:[#allocation2 + $0x4c4] sm:$0xf]  ;;  %v5074_v10 = vld [vmem:[#allocation2 + $0x4d0] sm:$0xf0]  ;;  %v5477_v12 = vor.u32 %v6766_v3, %v5474_v4 }
  0x6e   :  { %1802 = vmatpush.bf16.msra.mxu3 %v4869_v54  ;;  %v6698_v11 = vld [vmem:[#allocation2 + $0x5c4] sm:$0xf]  ;;  %v5202_v13 = vld [vmem:[#allocation2 + $0x5d0] sm:$0xf0]  ;;  %v5077_v18 = vor.u32 %v6666_v9, %v5074_v10 }
  0x6f   :  { %v6730_v14 = vld [vmem:[#allocation2 + $0x6c4] sm:$0xf]  ;;  %v5330_v15 = vld [vmem:[#allocation2 + $0x6d0] sm:$0xf0]  ;;  %v5205_v19 = vor.u32 %v6698_v11, %v5202_v13 }
  0x70   :  { %1764 = vmatpush.bf16.msra.mxu0 %v4469_v61  ;;  %v6762_v16 = vld [vmem:[#allocation2 + $0x7c4] sm:$0xf]  ;;  %v5458_v17 = vld [vmem:[#allocation2 + $0x7d0] sm:$0xf0]  ;;  %v5333_v20 = vor.u32 %v6730_v14, %v5330_v15 }
  0x71   :  { %1777 = vmatpush.bf16.msra.mxu1 %v4597_v1  ;;  %1790 = vmatpush.bf16.msra.mxu2 %v4725_v2  ;;  %v6662_v21 = vld [vmem:[#allocation2 + $0x4a4] sm:$0xf]  ;;  %v5058_v22 = vld [vmem:[#allocation2 + $0x4b0] sm:$0xf0]  ;;  %v5461_v24 = vor.u32 %v6762_v16, %v5458_v17 }
  0x72   :  { %1803 = vmatpush.bf16.msra.mxu3 %v4853_v5  ;;  %v6694_v23 = vld [vmem:[#allocation2 + $0x5a4] sm:$0xf]  ;;  %v5186_v25 = vld [vmem:[#allocation2 + $0x5b0] sm:$0xf0]  ;;  %v5061_v30 = vor.u32 %v6662_v21, %v5058_v22 }
  0x73   :  { %v6726_v26 = vld [vmem:[#allocation2 + $0x6a4] sm:$0xf]  ;;  %v5314_v27 = vld [vmem:[#allocation2 + $0x6b0] sm:$0xf0]  ;;  %1765 = vmatmul.bf16.vlgmr.msra.gmra.mxu0 %v7269_v34  ;;  %v5189_v31 = vor.u32 %v6694_v23, %v5186_v25 }
  0x74   :  { %1809 = vmatpush.bf16.msrb.mxu0 %v5093_v6  ;;  %1791 = vmatmul.bf16.vlgmr.msra.gmra.mxu2 %v7267_v33  ;;  %v6758_v28 = vld [vmem:[#allocation2 + $0x7a4] sm:$0xf]  ;;  %v5442_v29 = vld [vmem:[#allocation2 + $0x7b0] sm:$0xf0]  ;;  %v5317_v35 = vor.u32 %v6726_v26, %v5314_v27 }
  0x75   :  { %1822 = vmatpush.bf16.msrb.mxu1 %v5221_v7  ;;  %1835 = vmatpush.bf16.msrb.mxu2 %v5349_v8  ;;  %v6658_v36 = vld [vmem:[#allocation2 + $0x484] sm:$0xf]  ;;  %v5042_v39 = vld [vmem:[#allocation2 + $0x490] sm:$0xf0]  ;;  %v5445_v44 = vor.u32 %v6758_v28, %v5442_v29 }
  0x76   :  { %1848 = vmatpush.bf16.msrb.mxu3 %v5477_v12  ;;  %1778 = vmatmul.bf16.vlgmr.msra.gmra.mxu1 %v7273_v42  ;;  %v6690_v43 = vld [vmem:[#allocation2 + $0x584] sm:$0xf]  ;;  %v5170_v45 = vld [vmem:[#allocation2 + $0x590] sm:$0xf0]  ;;  %v5045_v50 = vor.u32 %v6658_v36, %v5042_v39  ;;  %v4584_v39 = vld [vmem:[#allocation2 + $0xe8] sm:$0xf] }
  0x77   :  { %1804 = vmatmul.bf16.vlgmr.msra.gmra.mxu3 %v7271_v41  ;;  %v6722_v46 = vld [vmem:[#allocation2 + $0x684] sm:$0xf]  ;;  %v5298_v47 = vld [vmem:[#allocation2 + $0x690] sm:$0xf0]  ;;  %v5173_v51 = vor.u32 %v6690_v43, %v5170_v45  ;;  %v6545_v43 = vld [vmem:[#allocation2 + $0xf4] sm:$0xf0] }
  0x78   :  { %1810 = vmatpush.bf16.msrb.mxu0 %v5077_v18  ;;  %v6754_v48 = vld [vmem:[#allocation2 + $0x784] sm:$0xf]  ;;  %v5426_v49 = vld [vmem:[#allocation2 + $0x790] sm:$0xf0]  ;;  %v5301_v52 = vor.u32 %v6722_v46, %v5298_v47  ;;  %v6577_v46 = vld [vmem:[#allocation2 + $0x1f4] sm:$0xf0] }
  0x79   :  { %1823 = vmatpush.bf16.msrb.mxu1 %v5205_v19  ;;  %1836 = vmatpush.bf16.msrb.mxu2 %v5333_v20  ;;  %v6654_v53 = vld [vmem:[#allocation2 + $0x464] sm:$0xf]  ;;  %v5026_v54 = vld [vmem:[#allocation2 + $0x470] sm:$0xf0]  ;;  %v5429_v56 = vor.u32 %v6754_v48, %v5426_v49  ;;  %v4840_v47 = vld [vmem:[#allocation2 + $0x2e8] sm:$0xf] }
  0x7a   :  { %1849 = vmatpush.bf16.msrb.mxu3 %v5461_v24  ;;  %v6686_v55 = vld [vmem:[#allocation2 + $0x564] sm:$0xf]  ;;  %v5154_v57 = vld [vmem:[#allocation2 + $0x570] sm:$0xf0]  ;;  %v5029_v62 = vor.u32 %v6654_v53, %v5026_v54  ;;  %v6609_v48 = vld [vmem:[#allocation2 + $0x2f4] sm:$0xf0]  ;;  %v4585_v54 = vor.u32 %v6545_v43, %v4584_v39 }
  0x7b   :  { %v6718_v58 = vld [vmem:[#allocation2 + $0x664] sm:$0xf]  ;;  %v5282_v59 = vld [vmem:[#allocation2 + $0x670] sm:$0xf0]  ;;  %v5157_v63 = vor.u32 %v6686_v55, %v5154_v57  ;;  %v4568_v57 = vld [vmem:[#allocation2 + $0xc8] sm:$0xf] }
  0x7c   :  { %1811 = vmatpush.bf16.msrb.mxu0 %v5061_v30  ;;  %v6750_v60 = vld [vmem:[#allocation2 + $0x764] sm:$0xf]  ;;  %v5410_v61 = vld [vmem:[#allocation2 + $0x770] sm:$0xf0]  ;;  %v5285_v0 = vor.u32 %v6718_v58, %v5282_v59  ;;  %v6541_v58 = vld [vmem:[#allocation2 + $0xd4] sm:$0xf0] }
  0x7d   :  { %1824 = vmatpush.bf16.msrb.mxu1 %v5189_v31  ;;  %1837 = vmatpush.bf16.msrb.mxu2 %v5317_v35  ;;  %v6650_v1 = vld [vmem:[#allocation2 + $0x444] sm:$0xf]  ;;  %v5010_v2 = vld [vmem:[#allocation2 + $0x450] sm:$0xf0]  ;;  %v5413_v4 = vor.u32 %v6750_v60, %v5410_v61  ;;  %v4696_v59 = vld [vmem:[#allocation2 + $0x1c8] sm:$0xf] }
  0x7e   :  { %1850 = vmatpush.bf16.msrb.mxu3 %v5445_v44  ;;  %v6682_v3 = vld [vmem:[#allocation2 + $0x544] sm:$0xf]  ;;  %v5138_v5 = vld [vmem:[#allocation2 + $0x550] sm:$0xf0]  ;;  %v5013_v10 = vor.u32 %v6650_v1, %v5010_v2  ;;  %v4712_v44 = vld [vmem:[#allocation2 + $0x1e8] sm:$0xf]  ;;  %v4569_v2 = vor.u32 %v6541_v58, %v4568_v57 }
  0x7f   :  { %v6714_v6 = vld [vmem:[#allocation2 + $0x644] sm:$0xf]  ;;  %v5266_v7 = vld [vmem:[#allocation2 + $0x650] sm:$0xf0]  ;;  %v5141_v11 = vor.u32 %v6682_v3, %v5138_v5  ;;  %v4713_v55 = vor.u32 %v6577_v46, %v4712_v44  ;;  %v6573_v61 = vld [vmem:[#allocation2 + $0x1d4] sm:$0xf0] }
  0x80   :  { %1812 = vmatpush.bf16.msrb.mxu0 %v5045_v50  ;;  %v6746_v8 = vld [vmem:[#allocation2 + $0x744] sm:$0xf]  ;;  %v5394_v9 = vld [vmem:[#allocation2 + $0x750] sm:$0xf0]  ;;  %v5269_v12 = vor.u32 %v6714_v6, %v5266_v7  ;;  %v6637_v1 = vld [vmem:[#allocation2 + $0x3d4] sm:$0xf0]  ;;  %v4697_v3 = vor.u32 %v6573_v61, %v4696_v59 }
  0x81   :  { %1825 = vmatpush.bf16.msrb.mxu1 %v5173_v51  ;;  %1838 = vmatpush.bf16.msrb.mxu2 %v5301_v52  ;;  %v6646_v13 = vld [vmem:[#allocation2 + $0x424] sm:$0xf]  ;;  %v4994_v14 = vld [vmem:[#allocation2 + $0x430] sm:$0xf0]  ;;  %v5397_v16 = vor.u32 %v6746_v8, %v5394_v9  ;;  %v4968_v51 = vld [vmem:[#allocation2 + $0x3e8] sm:$0xf] }
  0x82   :  { %1851 = vmatpush.bf16.msrb.mxu3 %v5429_v56  ;;  %v6678_v15 = vld [vmem:[#allocation2 + $0x524] sm:$0xf]  ;;  %v5122_v17 = vld [vmem:[#allocation2 + $0x530] sm:$0xf0]  ;;  %v4997_v22 = vor.u32 %v6646_v13, %v4994_v14  ;;  %v6641_v52 = vld [vmem:[#allocation2 + $0x3f4] sm:$0xf0]  ;;  %v4841_v56 = vor.u32 %v6609_v48, %v4840_v47 }
  0x83   :  { %v6710_v18 = vld [vmem:[#allocation2 + $0x624] sm:$0xf]  ;;  %v5250_v19 = vld [vmem:[#allocation2 + $0x630] sm:$0xf0]  ;;  %v5125_v25 = vor.u32 %v6678_v15, %v5122_v17  ;;  %v4969_v60 = vor.u32 %v6641_v52, %v4968_v51  ;;  %v4552_v5 = vld [vmem:[#allocation2 + $0xa8] sm:$0xf] }
  0x84   :  { %1813 = vmatpush.bf16.msrb.mxu0 %v5029_v62  ;;  %v6742_v20 = vld [vmem:[#allocation2 + $0x724] sm:$0xf]  ;;  %v5378_v21 = vld [vmem:[#allocation2 + $0x730] sm:$0xf0]  ;;  %v5253_v26 = vor.u32 %v6710_v18, %v5250_v19  ;;  %v4824_v62 = vld [vmem:[#allocation2 + $0x2c8] sm:$0xf] }
  0x85   :  { %1826 = vmatpush.bf16.msrb.mxu1 %v5157_v63  ;;  %1839 = vmatpush.bf16.msrb.mxu2 %v5285_v0  ;;  %v6642_v23 = vld [vmem:[#allocation2 + $0x404] sm:$0xf]  ;;  %v4978_v24 = vld [vmem:[#allocation2 + $0x410] sm:$0xf0]  ;;  %v5381_v30 = vor.u32 %v6742_v20, %v5378_v21  ;;  %v6605_v63 = vld [vmem:[#allocation2 + $0x2d4] sm:$0xf0] }
  0x86   :  { %1852 = vmatpush.bf16.msrb.mxu3 %v5413_v4  ;;  %v6674_v27 = vld [vmem:[#allocation2 + $0x504] sm:$0xf]  ;;  %v5106_v28 = vld [vmem:[#allocation2 + $0x510] sm:$0xf0]  ;;  %v4981_v45 = vor.u32 %v6642_v23, %v4978_v24  ;;  %v4952_v0 = vld [vmem:[#allocation2 + $0x3c8] sm:$0xf]  ;;  %v4825_v4 = vor.u32 %v6605_v63, %v4824_v62 }
  0x87   :  { %v6706_v29 = vld [vmem:[#allocation2 + $0x604] sm:$0xf]  ;;  %v5234_v31 = vld [vmem:[#allocation2 + $0x610] sm:$0xf0]  ;;  %v5109_v49 = vor.u32 %v6674_v27, %v5106_v28  ;;  %v6537_v6 = vld [vmem:[#allocation2 + $0xb4] sm:$0xf0]  ;;  %v4953_v8 = vor.u32 %v6637_v1, %v4952_v0 }
  0x88   :  { %1814 = vmatpush.bf16.msrb.mxu0 %v5013_v10  ;;  %v6738_v35 = vld [vmem:[#allocation2 + $0x704] sm:$0xf]  ;;  %v5362_v36 = vld [vmem:[#allocation2 + $0x710] sm:$0xf0]  ;;  %v5237_v50 = vor.u32 %v6706_v29, %v5234_v31  ;;  %v4680_v7 = vld [vmem:[#allocation2 + $0x1a8] sm:$0xf]  ;;  %v4553_v14 = vor.u32 %v6537_v6, %v4552_v5 }
  0x89   :  { %1827 = vmatpush.bf16.msrb.mxu1 %v5141_v11  ;;  %1840 = vmatpush.bf16.msrb.mxu2 %v5269_v12  ;;  %v5365_v53 = vor.u32 %v6738_v35, %v5362_v36  ;;  %v6569_v9 = vld [vmem:[#allocation2 + $0x1b4] sm:$0xf0]  ;;  %v4808_v10 = vld [vmem:[#allocation2 + $0x2a8] sm:$0xf] }
  0x8a   :  { %1853 = vmatpush.bf16.msrb.mxu3 %v5397_v16  ;;  %v6601_v11 = vld [vmem:[#allocation2 + $0x2b4] sm:$0xf0]  ;;  %v4936_v12 = vld [vmem:[#allocation2 + $0x3a8] sm:$0xf]  ;;  %v4681_v15 = vor.u32 %v6569_v9, %v4680_v7 }
  0x8b   :  { %v6633_v13 = vld [vmem:[#allocation2 + $0x3b4] sm:$0xf0]  ;;  %v4809_v16 = vor.u32 %v6601_v11, %v4808_v10  ;;  %v4536_v17 = vld [vmem:[#allocation2 + $0x88] sm:$0xf] }
  0x8c   :  { %1815 = vmatpush.bf16.msrb.mxu0 %v4997_v22  ;;  %v6533_v18 = vld [vmem:[#allocation2 + $0x94] sm:$0xf0]  ;;  %v4664_v19 = vld [vmem:[#allocation2 + $0x188] sm:$0xf]  ;;  %v4937_v20 = vor.u32 %v6633_v13, %v4936_v12 }
  0x8d   :  { %1828 = vmatpush.bf16.msrb.mxu1 %v5125_v25  ;;  %1841 = vmatpush.bf16.msrb.mxu2 %v5253_v26  ;;  %v6565_v21 = vld [vmem:[#allocation2 + $0x194] sm:$0xf0]  ;;  %v4792_v22 = vld [vmem:[#allocation2 + $0x288] sm:$0xf]  ;;  %v4537_v26 = vor.u32 %v6533_v18, %v4536_v17 }
  0x8e   :  { %1854 = vmatpush.bf16.msrb.mxu3 %v5381_v30  ;;  %v6597_v23 = vld [vmem:[#allocation2 + $0x294] sm:$0xf0]  ;;  %v4920_v24 = vld [vmem:[#allocation2 + $0x388] sm:$0xf]  ;;  %v4665_v27 = vor.u32 %v6565_v21, %v4664_v19 }
  0x8f   :  { %v6629_v25 = vld [vmem:[#allocation2 + $0x394] sm:$0xf0]  ;;  %v4793_v28 = vor.u32 %v6597_v23, %v4792_v22  ;;  %v4520_v29 = vld [vmem:[#allocation2 + $0x68] sm:$0xf] }
  0x90   :  { %1816 = vmatpush.bf16.msrb.mxu0 %v4981_v45  ;;  %v6529_v30 = vld [vmem:[#allocation2 + $0x74] sm:$0xf0]  ;;  %v4648_v31 = vld [vmem:[#allocation2 + $0x168] sm:$0xf]  ;;  %v4921_v35 = vor.u32 %v6629_v25, %v4920_v24 }
  0x91   :  { %1829 = vmatpush.bf16.msrb.mxu1 %v5109_v49  ;;  %1842 = vmatpush.bf16.msrb.mxu2 %v5237_v50  ;;  %v6561_v36 = vld [vmem:[#allocation2 + $0x174] sm:$0xf0]  ;;  %v4776_v39 = vld [vmem:[#allocation2 + $0x268] sm:$0xf]  ;;  %v4521_v46 = vor.u32 %v6529_v30, %v4520_v29 }
  0x92   :  { %1855 = vmatpush.bf16.msrb.mxu3 %v5365_v53  ;;  %v6593_v43 = vld [vmem:[#allocation2 + $0x274] sm:$0xf0]  ;;  %v4904_v44 = vld [vmem:[#allocation2 + $0x368] sm:$0xf]  ;;  %v4649_v47 = vor.u32 %v6561_v36, %v4648_v31 }
  0x93   :  { %1817 = vmatmul.bf16.vlgmr.msrb.gmra.mxu0 %v7284_v37  ;;  %v6625_v45 = vld [vmem:[#allocation2 + $0x374] sm:$0xf0]  ;;  %v4777_v48 = vor.u32 %v6593_v43, %v4776_v39  ;;  %v4504_v49 = vld [vmem:[#allocation2 + $0x48] sm:$0xf] }
  0x94   :  { %1861 = vmatpush.bf16.msra.mxu0 %v4585_v54  ;;  %1843 = vmatmul.bf16.vlgmr.msrb.gmra.mxu2 %v7282_v32  ;;  %v6525_v50 = vld [vmem:[#allocation2 + $0x54] sm:$0xf0]  ;;  %v4632_v51 = vld [vmem:[#allocation2 + $0x148] sm:$0xf]  ;;  %v4905_v52 = vor.u32 %v6625_v45, %v4904_v44 }
  0x95   :  { %1874 = vmatpush.bf16.msra.mxu1 %v4713_v55  ;;  %1887 = vmatpush.bf16.msra.mxu2 %v4841_v56  ;;  %v6557_v53 = vld [vmem:[#allocation2 + $0x154] sm:$0xf0]  ;;  %v4760_v54 = vld [vmem:[#allocation2 + $0x248] sm:$0xf]  ;;  %v4505_v58 = vor.u32 %v6525_v50, %v4504_v49 }
  0x96   :  { %1900 = vmatpush.bf16.msra.mxu3 %v4969_v60  ;;  %1830 = vmatmul.bf16.vlgmr.msrb.gmra.mxu1 %v7288_v40  ;;  %v6589_v55 = vld [vmem:[#allocation2 + $0x254] sm:$0xf0]  ;;  %v4888_v56 = vld [vmem:[#allocation2 + $0x348] sm:$0xf]  ;;  %v4633_v59 = vor.u32 %v6557_v53, %v4632_v51 }
  0x97   :  { %1856 = vmatmul.bf16.vlgmr.msrb.gmra.mxu3 %v7286_v38  ;;  %v6621_v57 = vld [vmem:[#allocation2 + $0x354] sm:$0xf0]  ;;  %v4761_v60 = vor.u32 %v6589_v55, %v4760_v54  ;;  %v4488_v61 = vld [vmem:[#allocation2 + $0x28] sm:$0xf] }
  0x98   :  { %1862 = vmatpush.bf16.msra.mxu0 %v4569_v2  ;;  %v6521_v62 = vld [vmem:[#allocation2 + $0x34] sm:$0xf0]  ;;  %v4616_v63 = vld [vmem:[#allocation2 + $0x128] sm:$0xf]  ;;  %v4889_v0 = vor.u32 %v6621_v57, %v4888_v56 }
  0x99   :  { %1875 = vmatpush.bf16.msra.mxu1 %v4697_v3  ;;  %1888 = vmatpush.bf16.msra.mxu2 %v4825_v4  ;;  %v6553_v1 = vld [vmem:[#allocation2 + $0x134] sm:$0xf0]  ;;  %v4744_v2 = vld [vmem:[#allocation2 + $0x228] sm:$0xf]  ;;  %v4489_v6 = vor.u32 %v6521_v62, %v4488_v61 }
  0x9a   :  { %1901 = vmatpush.bf16.msra.mxu3 %v4953_v8  ;;  %v6585_v3 = vld [vmem:[#allocation2 + $0x234] sm:$0xf0]  ;;  %v4872_v4 = vld [vmem:[#allocation2 + $0x328] sm:$0xf]  ;;  %v4617_v9 = vor.u32 %v6553_v1, %v4616_v63 }
  0x9b   :  { %v6617_v5 = vld [vmem:[#allocation2 + $0x334] sm:$0xf0]  ;;  %v4472_v7 = vld [vmem:[#allocation2 + $0x8] sm:$0xf]  ;;  %v4745_v10 = vor.u32 %v6585_v3, %v4744_v2 }
  0x9c   :  { %1863 = vmatpush.bf16.msra.mxu0 %v4553_v14  ;;  %v6517_v8 = vld [vmem:[#allocation2 + $0x14] sm:$0xf0]  ;;  %v4600_v11 = vld [vmem:[#allocation2 + $0x108] sm:$0xf]  ;;  %v4873_v14 = vor.u32 %v6617_v5, %v4872_v4 }
  0x9d   :  { %1876 = vmatpush.bf16.msra.mxu1 %v4681_v15  ;;  %1889 = vmatpush.bf16.msra.mxu2 %v4809_v16  ;;  %v6549_v12 = vld [vmem:[#allocation2 + $0x114] sm:$0xf0]  ;;  %v4728_v13 = vld [vmem:[#allocation2 + $0x208] sm:$0xf]  ;;  %v4473_v21 = vor.u32 %v6517_v8, %v4472_v7 }
  0x9e   :  { %1902 = vmatpush.bf16.msra.mxu3 %v4937_v20  ;;  %v6581_v15 = vld [vmem:[#allocation2 + $0x214] sm:$0xf0]  ;;  %v4856_v16 = vld [vmem:[#allocation2 + $0x308] sm:$0xf]  ;;  %v4601_v25 = vor.u32 %v6549_v12, %v4600_v11 }
  0x9f   :  { %v6613_v17 = vld [vmem:[#allocation2 + $0x314] sm:$0xf0]  ;;  %v5096_v18 = vld [vmem:[#allocation2 + $0x4e8] sm:$0xf] }
  0xa0   :  { %1864 = vmatpush.bf16.msra.mxu0 %v4537_v26  ;;  %v6673_v19 = vld [vmem:[#allocation2 + $0x4f4] sm:$0xf0]  ;;  %v5224_v20 = vld [vmem:[#allocation2 + $0x5e8] sm:$0xf]  ;;  %v4729_v26 = vor.u32 %v6581_v15, %v4728_v13  ;;  %v4857_v29 = vor.u32 %v6613_v17, %v4856_v16 }
  0xa1   :  { %1877 = vmatpush.bf16.msra.mxu1 %v4665_v27  ;;  %1890 = vmatpush.bf16.msra.mxu2 %v4793_v28  ;;  %v6705_v22 = vld [vmem:[#allocation2 + $0x5f4] sm:$0xf0]  ;;  %v5352_v23 = vld [vmem:[#allocation2 + $0x6e8] sm:$0xf]  ;;  %v5097_v30 = vor.u32 %v6673_v19, %v5096_v18 }
  0xa2   :  { %1903 = vmatpush.bf16.msra.mxu3 %v4921_v35  ;;  %v6737_v24 = vld [vmem:[#allocation2 + $0x6f4] sm:$0xf0]  ;;  %v5480_v27 = vld [vmem:[#allocation2 + $0x7e8] sm:$0xf]  ;;  %v5225_v31 = vor.u32 %v6705_v22, %v5224_v20 }
  0xa3   :  { %v6769_v28 = vld [vmem:[#allocation2 + $0x7f4] sm:$0xf0]  ;;  %v5353_v35 = vor.u32 %v6737_v24, %v5352_v23  ;;  %v5080_v36 = vld [vmem:[#allocation2 + $0x4c8] sm:$0xf] }
  0xa4   :  { %1865 = vmatpush.bf16.msra.mxu0 %v4521_v46  ;;  %v6669_v39 = vld [vmem:[#allocation2 + $0x4d4] sm:$0xf0]  ;;  %v5208_v43 = vld [vmem:[#allocation2 + $0x5c8] sm:$0xf]  ;;  %v5481_v44 = vor.u32 %v6769_v28, %v5480_v27 }
  0xa5   :  { %1878 = vmatpush.bf16.msra.mxu1 %v4649_v47  ;;  %1891 = vmatpush.bf16.msra.mxu2 %v4777_v48  ;;  %v6701_v45 = vld [vmem:[#allocation2 + $0x5d4] sm:$0xf0]  ;;  %v5336_v46 = vld [vmem:[#allocation2 + $0x6c8] sm:$0xf]  ;;  %v5081_v50 = vor.u32 %v6669_v39, %v5080_v36 }
  0xa6   :  { %1904 = vmatpush.bf16.msra.mxu3 %v4905_v52  ;;  %v6733_v47 = vld [vmem:[#allocation2 + $0x6d4] sm:$0xf0]  ;;  %v5464_v48 = vld [vmem:[#allocation2 + $0x7c8] sm:$0xf]  ;;  %v5209_v51 = vor.u32 %v6701_v45, %v5208_v43 }
  0xa7   :  { %v6765_v49 = vld [vmem:[#allocation2 + $0x7d4] sm:$0xf0]  ;;  %v5337_v52 = vor.u32 %v6733_v47, %v5336_v46  ;;  %v5064_v53 = vld [vmem:[#allocation2 + $0x4a8] sm:$0xf] }
  0xa8   :  { %1866 = vmatpush.bf16.msra.mxu0 %v4505_v58  ;;  %v6665_v54 = vld [vmem:[#allocation2 + $0x4b4] sm:$0xf0]  ;;  %v5192_v55 = vld [vmem:[#allocation2 + $0x5a8] sm:$0xf]  ;;  %v5465_v56 = vor.u32 %v6765_v49, %v5464_v48 }
  0xa9   :  { %1879 = vmatpush.bf16.msra.mxu1 %v4633_v59  ;;  %1892 = vmatpush.bf16.msra.mxu2 %v4761_v60  ;;  %v6697_v57 = vld [vmem:[#allocation2 + $0x5b4] sm:$0xf0]  ;;  %v5320_v58 = vld [vmem:[#allocation2 + $0x6a8] sm:$0xf]  ;;  %v5065_v62 = vor.u32 %v6665_v54, %v5064_v53 }
  0xaa   :  { %1905 = vmatpush.bf16.msra.mxu3 %v4889_v0  ;;  %v6729_v59 = vld [vmem:[#allocation2 + $0x6b4] sm:$0xf0]  ;;  %v5448_v60 = vld [vmem:[#allocation2 + $0x7a8] sm:$0xf]  ;;  %v5193_v63 = vor.u32 %v6697_v57, %v5192_v55 }
  0xab   :  { %v6761_v61 = vld [vmem:[#allocation2 + $0x7b4] sm:$0xf0]  ;;  %v5321_v0 = vor.u32 %v6729_v59, %v5320_v58  ;;  %v5048_v1 = vld [vmem:[#allocation2 + $0x488] sm:$0xf] }
  0xac   :  { %1867 = vmatpush.bf16.msra.mxu0 %v4489_v6  ;;  %v6661_v2 = vld [vmem:[#allocation2 + $0x494] sm:$0xf0]  ;;  %v5176_v3 = vld [vmem:[#allocation2 + $0x588] sm:$0xf]  ;;  %v5449_v4 = vor.u32 %v6761_v61, %v5448_v60 }
  0xad   :  { %1880 = vmatpush.bf16.msra.mxu1 %v4617_v9  ;;  %1893 = vmatpush.bf16.msra.mxu2 %v4745_v10  ;;  %v6693_v5 = vld [vmem:[#allocation2 + $0x594] sm:$0xf0]  ;;  %v5304_v6 = vld [vmem:[#allocation2 + $0x688] sm:$0xf]  ;;  %v5049_v10 = vor.u32 %v6661_v2, %v5048_v1 }
  0xae   :  { %1906 = vmatpush.bf16.msra.mxu3 %v4873_v14  ;;  %v6725_v7 = vld [vmem:[#allocation2 + $0x694] sm:$0xf0]  ;;  %v5432_v8 = vld [vmem:[#allocation2 + $0x788] sm:$0xf]  ;;  %v5177_v11 = vor.u32 %v6693_v5, %v5176_v3 }
  0xaf   :  { %v6757_v9 = vld [vmem:[#allocation2 + $0x794] sm:$0xf0]  ;;  %v5305_v12 = vor.u32 %v6725_v7, %v5304_v6  ;;  %v5032_v13 = vld [vmem:[#allocation2 + $0x468] sm:$0xf]  ;;  %v6543_v6 = vld [vmem:[#allocation2 + $0xec] sm:$0xf] }
  0xb0   :  { %1868 = vmatpush.bf16.msra.mxu0 %v4473_v21  ;;  %v6657_v14 = vld [vmem:[#allocation2 + $0x474] sm:$0xf0]  ;;  %v5160_v15 = vld [vmem:[#allocation2 + $0x568] sm:$0xf]  ;;  %v5433_v16 = vor.u32 %v6757_v9, %v5432_v8  ;;  %v4586_v7 = vld [vmem:[#allocation2 + $0xf8] sm:$0xf0] }
  0xb1   :  { %1881 = vmatpush.bf16.msra.mxu1 %v4601_v25  ;;  %1894 = vmatpush.bf16.msra.mxu2 %v4729_v26  ;;  %v6689_v17 = vld [vmem:[#allocation2 + $0x574] sm:$0xf0]  ;;  %v5288_v18 = vld [vmem:[#allocation2 + $0x668] sm:$0xf]  ;;  %v5033_v22 = vor.u32 %v6657_v14, %v5032_v13  ;;  %v6575_v8 = vld [vmem:[#allocation2 + $0x1ec] sm:$0xf] }
  0xb2   :  { %1907 = vmatpush.bf16.msra.mxu3 %v4857_v29  ;;  %v6721_v19 = vld [vmem:[#allocation2 + $0x674] sm:$0xf0]  ;;  %v5416_v20 = vld [vmem:[#allocation2 + $0x768] sm:$0xf]  ;;  %v5161_v24 = vor.u32 %v6689_v17, %v5160_v15  ;;  %v4842_v13 = vld [vmem:[#allocation2 + $0x2f8] sm:$0xf0] }
  0xb3   :  { %1869 = vmatmul.bf16.vlgmr.msra.gmra.mxu0 %v7269_v34  ;;  %v6753_v21 = vld [vmem:[#allocation2 + $0x774] sm:$0xf0]  ;;  %v5016_v23 = vld [vmem:[#allocation2 + $0x448] sm:$0xf]  ;;  %v5289_v25 = vor.u32 %v6721_v19, %v5288_v18  ;;  %v6639_v17 = vld [vmem:[#allocation2 + $0x3ec] sm:$0xf] }
  0xb4   :  { %1913 = vmatpush.bf16.msrb.mxu0 %v5097_v30  ;;  %1895 = vmatmul.bf16.vlgmr.msra.gmra.mxu2 %v7267_v33  ;;  %v6653_v26 = vld [vmem:[#allocation2 + $0x454] sm:$0xf0]  ;;  %v5144_v27 = vld [vmem:[#allocation2 + $0x548] sm:$0xf]  ;;  %v5417_v29 = vor.u32 %v6753_v21, %v5416_v20  ;;  %v4970_v18 = vld [vmem:[#allocation2 + $0x3f8] sm:$0xf0]  ;;  %v4589_v20 = vor.u32 %v6543_v6, %v4586_v7 }
  0xb5   :  { %1926 = vmatpush.bf16.msrb.mxu1 %v5225_v31  ;;  %1939 = vmatpush.bf16.msrb.mxu2 %v5353_v35  ;;  %v6685_v28 = vld [vmem:[#allocation2 + $0x554] sm:$0xf0]  ;;  %v5272_v30 = vld [vmem:[#allocation2 + $0x648] sm:$0xf]  ;;  %v5017_v43 = vor.u32 %v6653_v26, %v5016_v23  ;;  %v6571_v26 = vld [vmem:[#allocation2 + $0x1cc] sm:$0xf] }
  0xb6   :  { %1952 = vmatpush.bf16.msrb.mxu3 %v5481_v44  ;;  %1882 = vmatmul.bf16.vlgmr.msra.gmra.mxu1 %v7273_v42  ;;  %v6717_v31 = vld [vmem:[#allocation2 + $0x654] sm:$0xf0]  ;;  %v5400_v36 = vld [vmem:[#allocation2 + $0x748] sm:$0xf]  ;;  %v5145_v45 = vor.u32 %v6685_v28, %v5144_v27  ;;  %v4794_v6 = vld [vmem:[#allocation2 + $0x298] sm:$0xf0] }
  0xb7   :  { %1908 = vmatmul.bf16.vlgmr.msra.gmra.mxu3 %v7271_v41  ;;  %v7309_v35 = vld [vmem:[%s7685_s2] sm:$0xf]  ;;  %v5000_v44 = vld [vmem:[#allocation2 + $0x428] sm:$0xf]  ;;  %v5273_v46 = vor.u32 %v6717_v31, %v5272_v30  ;;  %v4698_v30 = vld [vmem:[#allocation2 + $0x1d8] sm:$0xf0] }
  0xb8   :  { %1914 = vmatpush.bf16.msrb.mxu0 %v5081_v50  ;;  %v6749_v39 = vld [vmem:[#allocation2 + $0x754] sm:$0xf0]  ;;  %v5128_v48 = vld [vmem:[#allocation2 + $0x528] sm:$0xf]  ;;  %v365_v49 = vperm.slane %v7309_v35, 0 }
  0xb9   :  { %1927 = vmatpush.bf16.msrb.mxu1 %v5209_v51  ;;  %1940 = vmatpush.bf16.msrb.mxu2 %v5337_v52  ;;  %v6649_v47 = vld [vmem:[#allocation2 + $0x434] sm:$0xf0]  ;;  %v5401_v50 = vor.u32 %v6749_v39, %v5400_v36  ;;  %v5256_v52 = vld [vmem:[#allocation2 + $0x628] sm:$0xf]  ;;  %v6603_v31 = vld [vmem:[#allocation2 + $0x2cc] sm:$0xf] }
  0xba   :  { %1953 = vmatpush.bf16.msrb.mxu3 %v5465_v56  ;;  %v6681_v51 = vld [vmem:[#allocation2 + $0x534] sm:$0xf0]  ;;  %v5384_v54 = vld [vmem:[#allocation2 + $0x728] sm:$0xf]  ;;  %v5001_v56 = vor.u32 %v6649_v47, %v5000_v44  ;;  %v4826_v36 = vld [vmem:[#allocation2 + $0x2d8] sm:$0xf0]  ;;  %v4701_v47 = vor.u32 %v6571_v26, %v4698_v30 }
  0xbb   :  { %v6713_v53 = vld [vmem:[#allocation2 + $0x634] sm:$0xf0]  ;;  %v4984_v57 = vld [vmem:[#allocation2 + $0x408] sm:$0xf]  ;;  %v5129_v60 = vor.u32 %v6681_v51, %v5128_v48  ;;  %v4954_v44 = vld [vmem:[#allocation2 + $0x3d8] sm:$0xf0]  ;;  %v4829_v48 = vor.u32 %v6603_v31, %v4826_v36 }
  0xbc   :  { %1915 = vmatpush.bf16.msrb.mxu0 %v5065_v62  ;;  %v6745_v55 = vld [vmem:[#allocation2 + $0x734] sm:$0xf0]  ;;  %v5257_v61 = vor.u32 %v6713_v53, %v5256_v52  ;;  %v5112_v62 = vld [vmem:[#allocation2 + $0x508] sm:$0xf]  ;;  %v6567_v51 = vld [vmem:[#allocation2 + $0x1ac] sm:$0xf] }
  0xbd   :  { %1928 = vmatpush.bf16.msrb.mxu1 %v5193_v63  ;;  %1941 = vmatpush.bf16.msrb.mxu2 %v5321_v0  ;;  %v6645_v58 = vld [vmem:[#allocation2 + $0x414] sm:$0xf0]  ;;  %v5240_v0 = vld [vmem:[#allocation2 + $0x608] sm:$0xf]  ;;  %v5385_v2 = vor.u32 %v6745_v55, %v5384_v54  ;;  %v4682_v54 = vld [vmem:[#allocation2 + $0x1b8] sm:$0xf0] }
  0xbe   :  { %1954 = vmatpush.bf16.msrb.mxu3 %v5449_v4  ;;  %v6677_v63 = vld [vmem:[#allocation2 + $0x514] sm:$0xf0]  ;;  %v5368_v4 = vld [vmem:[#allocation2 + $0x708] sm:$0xf]  ;;  %v6599_v55 = vld [vmem:[#allocation2 + $0x2ac] sm:$0xf] }
  0xbf   :  { %v6709_v3 = vld [vmem:[#allocation2 + $0x614] sm:$0xf0]  ;;  %v5113_v15 = vor.u32 %v6677_v63, %v5112_v62  ;;  %v6531_v63 = vld [vmem:[#allocation2 + $0x8c] sm:$0xf] }
  0xc0   :  { %1916 = vmatpush.bf16.msrb.mxu0 %v5049_v10  ;;  %v6741_v5 = vld [vmem:[#allocation2 + $0x714] sm:$0xf0]  ;;  %v4985_v10 = vor.u32 %v6645_v58, %v4984_v57  ;;  %v6631_v57 = vld [vmem:[#allocation2 + $0x3ac] sm:$0xf]  ;;  %v4938_v58 = vld [vmem:[#allocation2 + $0x3b8] sm:$0xf0] }
  0xc1   :  { %1929 = vmatpush.bf16.msrb.mxu1 %v5177_v11  ;;  %1942 = vmatpush.bf16.msrb.mxu2 %v5305_v12  ;;  %v4714_v11 = vld [vmem:[#allocation2 + $0x1f8] sm:$0xf0]  ;;  %v6607_v12 = vld [vmem:[#allocation2 + $0x2ec] sm:$0xf]  ;;  %v5369_v19 = vor.u32 %v6741_v5, %v5368_v4 }
  0xc2   :  { %1955 = vmatpush.bf16.msrb.mxu3 %v5433_v16  ;;  %v5241_v16 = vor.u32 %v6709_v3, %v5240_v0  ;;  %v4845_v23 = vor.u32 %v6607_v12, %v4842_v13  ;;  %v4538_v0 = vld [vmem:[#allocation2 + $0x98] sm:$0xf0]  ;;  %v4941_v3 = vor.u32 %v6631_v57, %v4938_v58  ;;  %v6595_v5 = vld [vmem:[#allocation2 + $0x28c] sm:$0xf] }
  0xc3   :  { %v1662_v59 = vpop.f32.mrf.mxu0  ;;  %v4666_v4 = vld [vmem:[#allocation2 + $0x198] sm:$0xf0]  ;;  %v6627_v7 = vld [vmem:[#allocation2 + $0x38c] sm:$0xf]  ;;  %v4797_v12 = vor.u32 %v6595_v5, %v4794_v6 }
  0xc4   :  { %1917 = vmatpush.bf16.msrb.mxu0 %v5033_v22  ;;  %v1663_v1 = vadd.f32 %v1662_v59, %v365_v49  ;;  %v1675_v9 = vpop.f32.mrf.mxu1  ;;  %v4717_v22 = vor.u32 %v6575_v8, %v4714_v11  ;;  %v6535_v49 = vld [vmem:[#allocation2 + $0xac] sm:$0xf]  ;;  %v4922_v8 = vld [vmem:[#allocation2 + $0x398] sm:$0xf0] }
  0xc5   :  { %1930 = vmatpush.bf16.msrb.mxu1 %v5161_v24  ;;  %1943 = vmatpush.bf16.msrb.mxu2 %v5289_v25  ;;  %v6539_v24 = vld [vmem:[#allocation2 + $0xcc] sm:$0xf]  ;;  %v4570_v25 = vld [vmem:[#allocation2 + $0xd8] sm:$0xf0] }
  0xc6   :  { %1956 = vmatpush.bf16.msrb.mxu3 %v5417_v29  ;;  %v1676_v14 = vadd.f32 %v1675_v9, %v1663_v1  ;;  %v4973_v29 = vor.u32 %v6639_v17, %v4970_v18  ;;  %v6563_v1 = vld [vmem:[#allocation2 + $0x18c] sm:$0xf]  ;;  %v4541_v9 = vor.u32 %v6531_v63, %v4538_v0  ;;  %v4925_v18 = vor.u32 %v6627_v7, %v4922_v8  ;;  %v4874_v63 = vld [vmem:[#allocation2 + $0x338] sm:$0xf0] }
  0xc7   :  { %v4669_v11 = vor.u32 %v6563_v1, %v4666_v4  ;;  %v6527_v13 = vld [vmem:[#allocation2 + $0x6c] sm:$0xf]  ;;  %v4602_v6 = vld [vmem:[#allocation2 + $0x118] sm:$0xf0] }
  0xc8   :  { %1918 = vmatpush.bf16.msrb.mxu0 %v5017_v43  ;;  %v1688_v21 = vpop.f32.mrf.mxu2  ;;  %v6635_v43 = vld [vmem:[#allocation2 + $0x3cc] sm:$0xf] }
  0xc9   :  { %1931 = vmatpush.bf16.msrb.mxu1 %v5145_v45  ;;  %1944 = vmatpush.bf16.msrb.mxu2 %v5273_v46  ;;  %v1689_v27 = vadd.f32 %v1688_v21, %v1676_v14  ;;  %v1701_v28 = vpop.f32.mrf.mxu3  ;;  %v4573_v46 = vor.u32 %v6539_v24, %v4570_v25  ;;  %v4957_v53 = vor.u32 %v6635_v43, %v4954_v44  ;;  %v4522_v14 = vld [vmem:[#allocation2 + $0x78] sm:$0xf0]  ;;  %v6555_v30 = vld [vmem:[#allocation2 + $0x14c] sm:$0xf] }
  0xca   :  { %1957 = vmatpush.bf16.msrb.mxu3 %v5401_v50  ;;  %v4554_v50 = vld [vmem:[#allocation2 + $0xb8] sm:$0xf0]  ;;  %v4525_v25 = vor.u32 %v6527_v13, %v4522_v14  ;;  %v6587_v43 = vld [vmem:[#allocation2 + $0x24c] sm:$0xf] }
  0xcb   :  { %v1664_v39 = vpop.f32.mrf.mxu0  ;;  %v1702_v45 = vadd.f32 %v1701_v28, %v1689_v27  ;;  %v4557_v59 = vor.u32 %v6535_v49, %v4554_v50  ;;  %v4778_v21 = vld [vmem:[#allocation2 + $0x278] sm:$0xf0]  ;;  %v6523_v28 = vld [vmem:[#allocation2 + $0x4c] sm:$0xf] }
  0xcc   :  { %1919 = vmatpush.bf16.msrb.mxu0 %v5001_v56  ;;  %v1677_v52 = vpop.f32.mrf.mxu1  ;;  %v4810_v56 = vld [vmem:[#allocation2 + $0x2b8] sm:$0xf0]  ;;  %v6515_v1 = vld [vmem:[#allocation2 + $0xc] sm:$0xf] }
  0xcd   :  { %1932 = vmatpush.bf16.msrb.mxu1 %v5129_v60  ;;  %1945 = vmatpush.bf16.msrb.mxu2 %v5257_v61  ;;  %v4685_v61 = vor.u32 %v6567_v51, %v4682_v54  ;;  %v4813_v62 = vor.u32 %v6599_v55, %v4810_v56  ;;  %v4634_v39 = vld [vmem:[#allocation2 + $0x158] sm:$0xf0]  ;;  %v6519_v54 = vld [vmem:[#allocation2 + $0x2c] sm:$0xf] }
  0xce   :  { %1958 = vmatpush.bf16.msrb.mxu3 %v5385_v2  ;;  %v4762_v44 = vld [vmem:[#allocation2 + $0x258] sm:$0xf0]  ;;  %v4637_v52 = vor.u32 %v6555_v30, %v4634_v39  ;;  %v6551_v56 = vld [vmem:[#allocation2 + $0x12c] sm:$0xf] }
  0xcf   :  { %v4490_v55 = vld [vmem:[#allocation2 + $0x38] sm:$0xf0]  ;;  %v6547_v5 = vld [vmem:[#allocation2 + $0x10c] sm:$0xf] }
  0xd0   :  { %1920 = vmatpush.bf16.msrb.mxu0 %v4985_v10  ;;  %v1690_v60 = vpop.f32.mrf.mxu2  ;;  %v4493_v0 = vor.u32 %v6519_v54, %v4490_v55  ;;  %v6579_v7 = vld [vmem:[#allocation2 + $0x20c] sm:$0xf]  ;;  %v5082_v30 = vld [vmem:[#allocation2 + $0x4d8] sm:$0xf0] }
  0xd1   :  { %1933 = vmatpush.bf16.msrb.mxu1 %v5113_v15  ;;  %1946 = vmatpush.bf16.msrb.mxu2 %v5241_v16  ;;  %v1703_v2 = vpop.f32.mrf.mxu3  ;;  %v6559_v15 = vld [vmem:[#allocation2 + $0x16c] sm:$0xf]  ;;  %v5210_v39 = vld [vmem:[#allocation2 + $0x5d8] sm:$0xf0] }
  0xd2   :  { %1959 = vmatpush.bf16.msrb.mxu3 %v5369_v19  ;;  %v4650_v19 = vld [vmem:[#allocation2 + $0x178] sm:$0xf0]  ;;  %v6583_v60 = vld [vmem:[#allocation2 + $0x22c] sm:$0xf] }
  0xd3   :  { %1921 = vmatmul.bf16.vlgmr.msrb.gmra.mxu0 %v7284_v37  ;;  %v4653_v26 = vor.u32 %v6559_v15, %v4650_v19  ;;  %v4474_v2 = vld [vmem:[#allocation2 + $0x18] sm:$0xf0]  ;;  %v6671_v14 = vld [vmem:[#allocation2 + $0x4ec] sm:$0xf] }
  0xd4   :  { %1965 = vmatpush.bf16.msra.mxu0 %v4589_v20  ;;  %1947 = vmatmul.bf16.vlgmr.msrb.gmra.mxu2 %v7282_v32  ;;  %v1714_v10 = vpop.f32.mrf.mxu0  ;;  %v6591_v20 = vld [vmem:[#allocation2 + $0x26c] sm:$0xf]  ;;  %v5098_v15 = vld [vmem:[#allocation2 + $0x4f8] sm:$0xf0] }
  0xd5   :  { %1978 = vmatpush.bf16.msra.mxu1 %v4717_v22  ;;  %1991 = vmatpush.bf16.msra.mxu2 %v4845_v23  ;;  %v1715_v16 = vadd.f32 %v1714_v10, %v1702_v45  ;;  %v1727_v17 = vpop.f32.mrf.mxu1  ;;  %v6623_v22 = vld [vmem:[#allocation2 + $0x36c] sm:$0xf]  ;;  %v4906_v23 = vld [vmem:[#allocation2 + $0x378] sm:$0xf0]  ;;  %v4781_v27 = vor.u32 %v6591_v20, %v4778_v21  ;;  %v4605_v21 = vor.u32 %v6547_v5, %v4602_v6 }
  0xd6   :  { %2004 = vmatpush.bf16.msra.mxu3 %v4973_v29  ;;  %1934 = vmatmul.bf16.vlgmr.msrb.gmra.mxu1 %v7288_v40  ;;  %v4506_v29 = vld [vmem:[#allocation2 + $0x58] sm:$0xf0]  ;;  %v4909_v36 = vor.u32 %v6623_v22, %v4906_v23  ;;  %v6735_v19 = vld [vmem:[#allocation2 + $0x6ec] sm:$0xf] }
  0xd7   :  { %1960 = vmatmul.bf16.vlgmr.msrb.gmra.mxu3 %v7286_v38  ;;  %v1728_v24 = vadd.f32 %v1727_v17, %v1715_v16  ;;  %v4509_v49 = vor.u32 %v6523_v28, %v4506_v29  ;;  %v4730_v10 = vld [vmem:[#allocation2 + $0x218] sm:$0xf0]  ;;  %v6703_v16 = vld [vmem:[#allocation2 + $0x5ec] sm:$0xf]  ;;  %v4477_v17 = vor.u32 %v6515_v1, %v4474_v2 }
  0xd8   :  { %1966 = vmatpush.bf16.msra.mxu0 %v4573_v46  ;;  %v5354_v20 = vld [vmem:[#allocation2 + $0x6f8] sm:$0xf0]  ;;  %v4733_v22 = vor.u32 %v6579_v7, %v4730_v10  ;;  %v6767_v23 = vld [vmem:[#allocation2 + $0x7ec] sm:$0xf] }
  0xd9   :  { %1979 = vmatpush.bf16.msra.mxu1 %v4701_v47  ;;  %1992 = vmatpush.bf16.msra.mxu2 %v4829_v48  ;;  %v1740_v31 = vpop.f32.mrf.mxu2  ;;  %v6619_v47 = vld [vmem:[#allocation2 + $0x34c] sm:$0xf]  ;;  %v4890_v48 = vld [vmem:[#allocation2 + $0x358] sm:$0xf0]  ;;  %v5357_v28 = vor.u32 %v6735_v19, %v5354_v20 }
  0xda   :  { %2005 = vmatpush.bf16.msra.mxu3 %v4957_v53  ;;  %v1741_v45 = vadd.f32 %v1740_v31, %v1728_v24  ;;  %v1753_v46 = vpop.f32.mrf.mxu3  ;;  %v4765_v53 = vor.u32 %v6587_v43, %v4762_v44  ;;  %v4893_v58 = vor.u32 %v6619_v47, %v4890_v48  ;;  %v5482_v24 = vld [vmem:[#allocation2 + $0x7f8] sm:$0xf0]  ;;  %v6667_v29 = vld [vmem:[#allocation2 + $0x4cc] sm:$0xf] }
  0xdb   :  { %v6699_v31 = vld [vmem:[#allocation2 + $0x5cc] sm:$0xf]  ;;  %v5338_v44 = vld [vmem:[#allocation2 + $0x6d8] sm:$0xf0]  ;;  %v5085_v47 = vor.u32 %v6667_v29, %v5082_v30 }
  0xdc   :  { %1967 = vmatpush.bf16.msra.mxu0 %v4557_v59  ;;  %v7316_v50 = vadd.f32 %v1753_v46, %v1741_v45  ;;  %v1716_v51 = vpop.f32.mrf.mxu0  ;;  %v4618_v59 = vld [vmem:[#allocation2 + $0x138] sm:$0xf0]  ;;  %v6731_v43 = vld [vmem:[#allocation2 + $0x6cc] sm:$0xf]  ;;  %v5213_v48 = vor.u32 %v6699_v31, %v5210_v39 }
  0xdd   :  { %1980 = vmatpush.bf16.msra.mxu1 %v4685_v61  ;;  %1993 = vmatpush.bf16.msra.mxu2 %v4813_v62  ;;  %v1729_v57 = vpop.f32.mrf.mxu1  ;;  %v4746_v61 = vld [vmem:[#allocation2 + $0x238] sm:$0xf0]  ;;  %v6615_v62 = vld [vmem:[#allocation2 + $0x32c] sm:$0xf] }
  0xde   :  { %2006 = vmatpush.bf16.msra.mxu3 %v4941_v3  ;;  %v4621_v3 = vor.u32 %v6551_v56, %v4618_v59  ;;  %v4749_v4 = vor.u32 %v6583_v60, %v4746_v61  ;;  %v6763_v45 = vld [vmem:[#allocation2 + $0x7cc] sm:$0xf]  ;;  %v5466_v46 = vld [vmem:[#allocation2 + $0x7d8] sm:$0xf0] }
  0xdf   :  { %v6663_v51 = vld [vmem:[#allocation2 + $0x4ac] sm:$0xf]  ;;  %v5469_v54 = vor.u32 %v6763_v45, %v5466_v46  ;;  %v5194_v55 = vld [vmem:[#allocation2 + $0x5b8] sm:$0xf0] }
  0xe0   :  { %1968 = vmatpush.bf16.msra.mxu0 %v4541_v9  ;;  %v4877_v9 = vor.u32 %v6615_v62, %v4874_v63  ;;  %v6727_v56 = vld [vmem:[#allocation2 + $0x6ac] sm:$0xf]  ;;  %v5322_v57 = vld [vmem:[#allocation2 + $0x6b8] sm:$0xf0] }
  0xe1   :  { %1981 = vmatpush.bf16.msra.mxu1 %v4669_v11  ;;  %1994 = vmatpush.bf16.msra.mxu2 %v4797_v12  ;;  %v1742_v8 = vpop.f32.mrf.mxu2  ;;  %v6611_v11 = vld [vmem:[#allocation2 + $0x30c] sm:$0xf]  ;;  %v4858_v12 = vld [vmem:[#allocation2 + $0x318] sm:$0xf0]  ;;  %v5325_v62 = vor.u32 %v6727_v56, %v5322_v57  ;;  %v366_v56 = vperm.slane %v7309_v35, 1 }
  0xe2   :  { %2007 = vmatpush.bf16.msra.mxu3 %v4925_v18  ;;  %v1755_v13 = vpop.f32.mrf.mxu3  ;;  %v5226_v18 = vld [vmem:[#allocation2 + $0x5f8] sm:$0xf0]  ;;  %v6659_v63 = vld [vmem:[#allocation2 + $0x48c] sm:$0xf] }
  0xe3   :  { %v5450_v59 = vld [vmem:[#allocation2 + $0x7b8] sm:$0xf0]  ;;  %v6755_v5 = vld [vmem:[#allocation2 + $0x78c] sm:$0xf] }
  0xe4   :  { %1969 = vmatpush.bf16.msra.mxu0 %v4525_v25  ;;  %v4861_v25 = vor.u32 %v6611_v11, %v4858_v12  ;;  %v5178_v2 = vld [vmem:[#allocation2 + $0x598] sm:$0xf0]  ;;  %v6655_v8 = vld [vmem:[#allocation2 + $0x46c] sm:$0xf] }
  0xe5   :  { %1982 = vmatpush.bf16.msra.mxu1 %v4653_v26  ;;  %1995 = vmatpush.bf16.msra.mxu2 %v4781_v27  ;;  %v5101_v26 = vor.u32 %v6671_v14, %v5098_v15  ;;  %v5229_v27 = vor.u32 %v6703_v16, %v5226_v18  ;;  %v6687_v10 = vld [vmem:[#allocation2 + $0x56c] sm:$0xf]  ;;  %v5162_v13 = vld [vmem:[#allocation2 + $0x578] sm:$0xf0] }
  0xe6   :  { %2008 = vmatpush.bf16.msra.mxu3 %v4909_v36  ;;  %v5485_v36 = vor.u32 %v6767_v23, %v5482_v24  ;;  %v6719_v14 = vld [vmem:[#allocation2 + $0x66c] sm:$0xf]  ;;  %v5290_v15 = vld [vmem:[#allocation2 + $0x678] sm:$0xf0]  ;;  %v5165_v19 = vor.u32 %v6687_v10, %v5162_v13 }
  0xe7   :  { %v6751_v16 = vld [vmem:[#allocation2 + $0x76c] sm:$0xf]  ;;  %v5293_v20 = vor.u32 %v6719_v14, %v5290_v15  ;;  %v5402_v31 = vld [vmem:[#allocation2 + $0x758] sm:$0xf0]  ;;  %v2086_v14 = vld [vmem:[%s7686_s3 + $0x68] sm:$0xff] }
  0xe8   :  { %1970 = vmatpush.bf16.msra.mxu0 %v4509_v49  ;;  %v5341_v49 = vor.u32 %v6731_v43, %v5338_v44  ;;  %v6683_v23 = vld [vmem:[#allocation2 + $0x54c] sm:$0xf]  ;;  %v5002_v46 = vld [vmem:[#allocation2 + $0x438] sm:$0xf0] }
  0xe9   :  { %1983 = vmatpush.bf16.msra.mxu1 %v4637_v52  ;;  %1996 = vmatpush.bf16.msra.mxu2 %v4765_v53  ;;  %v5066_v52 = vld [vmem:[#allocation2 + $0x4b8] sm:$0xf0]  ;;  %v6695_v53 = vld [vmem:[#allocation2 + $0x5ac] sm:$0xf] }
  0xea   :  { %2009 = vmatpush.bf16.msra.mxu3 %v4893_v58  ;;  %v6759_v58 = vld [vmem:[#allocation2 + $0x7ac] sm:$0xf]  ;;  %v5069_v60 = vor.u32 %v6663_v51, %v5066_v52  ;;  %v5197_v61 = vor.u32 %v6695_v53, %v5194_v55  ;;  %v5130_v51 = vld [vmem:[#allocation2 + $0x538] sm:$0xf0] }
  0xeb   :  { %v5453_v1 = vor.u32 %v6759_v58, %v5450_v59  ;;  %v6747_v30 = vld [vmem:[#allocation2 + $0x74c] sm:$0xf]  ;;  %v5258_v53 = vld [vmem:[#allocation2 + $0x638] sm:$0xf0] }
  0xec   :  { %1971 = vmatpush.bf16.msra.mxu0 %v4493_v0  ;;  %v5050_v0 = vld [vmem:[#allocation2 + $0x498] sm:$0xf0]  ;;  %v6647_v45 = vld [vmem:[#allocation2 + $0x42c] sm:$0xf] }
  0xed   :  { %1984 = vmatpush.bf16.msra.mxu1 %v4621_v3  ;;  %1997 = vmatpush.bf16.msra.mxu2 %v4749_v4  ;;  %v6723_v3 = vld [vmem:[#allocation2 + $0x68c] sm:$0xf]  ;;  %v5306_v4 = vld [vmem:[#allocation2 + $0x698] sm:$0xf0]  ;;  %v5005_v57 = vor.u32 %v6647_v45, %v5002_v46 }
  0xee   :  { %2010 = vmatpush.bf16.msra.mxu3 %v4877_v9  ;;  %v5309_v7 = vor.u32 %v6723_v3, %v5306_v4  ;;  %v5034_v9 = vld [vmem:[#allocation2 + $0x478] sm:$0xf0]  ;;  %v6711_v52 = vld [vmem:[#allocation2 + $0x62c] sm:$0xf] }
  0xef   :  { %v5037_v18 = vor.u32 %v6655_v8, %v5034_v9  ;;  %v5386_v55 = vld [vmem:[#allocation2 + $0x738] sm:$0xf0]  ;;  %v5261_v59 = vor.u32 %v6711_v52, %v5258_v53  ;;  %v6739_v4 = vld [vmem:[#allocation2 + $0x70c] sm:$0xf]  ;;  %v2088_v9 = vld [vmem:[%s7686_s3 + $0x78] sm:$0xff] }
  0xf0   :  { %1972 = vmatpush.bf16.msra.mxu0 %v4477_v17  ;;  %v7322_v6 = vpop.f32.mrf.mxu0  ;;  %v5418_v17 = vld [vmem:[#allocation2 + $0x778] sm:$0xf0]  ;;  %v2079_v45 = vld [vmem:[%s7686_s3 + $0x30] sm:$0xff]  ;;  %v2078_v52 = vld [vmem:[%s7686_s3 + $0x28] sm:$0xff] }
  0xf1   :  { %1985 = vmatpush.bf16.msra.mxu1 %v4605_v21  ;;  %1998 = vmatpush.bf16.msra.mxu2 %v4733_v22  ;;  %v6651_v21 = vld [vmem:[#allocation2 + $0x44c] sm:$0xf]  ;;  %v5018_v22 = vld [vmem:[#allocation2 + $0x458] sm:$0xf0]  ;;  %v2094_v53 = vld [vmem:[%s7686_s3 + $0xa8] sm:$0xff] }
  0xf2   :  { %2011 = vmatpush.bf16.msra.mxu3 %v4861_v25  ;;  %v5421_v25 = vor.u32 %v6751_v16, %v5418_v17  ;;  %v2085_v15 = vld [vmem:[%s7686_s3 + $0x60] sm:$0xff]  ;;  %v2100_v16 = vld [vmem:[%s7686_s3 + $0xd8] sm:$0xff] }
  0xf3   :  { %1973 = vmatmul.bf16.vlgmr.msra.gmra.mxu0 %v7269_v34  ;;  %v5434_v34 = vld [vmem:[#allocation2 + $0x798] sm:$0xf0]  ;;  %v7324_v11 = vpop.f32.mrf.mxu1  ;;  %v2120_v17 = vld [vmem:[%s7686_s3 + $0x178] sm:$0xff] }
  0xf4   :  { %2017 = vmatpush.bf16.msrb.mxu0 %v5101_v26  ;;  %1999 = vmatmul.bf16.vlgmr.msra.gmra.mxu2 %v7267_v33  ;;  %v6691_v33 = vld [vmem:[#allocation2 + $0x58c] sm:$0xf]  ;;  %v5437_v12 = vor.u32 %v6755_v5, %v5434_v34  ;;  %v5146_v26 = vld [vmem:[#allocation2 + $0x558] sm:$0xf0]  ;;  %v1767_v34 = vadd.f32 %v7322_v6, %v366_v56 }
  0xf5   :  { %2030 = vmatpush.bf16.msrb.mxu1 %v5229_v27  ;;  %2043 = vmatpush.bf16.msrb.mxu2 %v5357_v28  ;;  %v6715_v27 = vld [vmem:[#allocation2 + $0x64c] sm:$0xf]  ;;  %v5274_v28 = vld [vmem:[#allocation2 + $0x658] sm:$0xf0]  ;;  %v5149_v43 = vor.u32 %v6683_v23, %v5146_v26 }
  0xf6   :  { %2056 = vmatpush.bf16.msrb.mxu3 %v5485_v36  ;;  %1986 = vmatmul.bf16.vlgmr.msra.gmra.mxu1 %v7273_v42  ;;  %v5181_v42 = vor.u32 %v6691_v33, %v5178_v2  ;;  %v5021_v36 = vor.u32 %v6651_v21, %v5018_v22  ;;  %v5277_v44 = vor.u32 %v6715_v27, %v5274_v28  ;;  %v5114_v33 = vld [vmem:[#allocation2 + $0x518] sm:$0xf0]  ;;  %v2087_v6 = vld [vmem:[%s7686_s3 + $0x70] sm:$0xff]  ;;  %v2118_v28 = vld [vmem:[%s7686_s3 + $0x168] sm:$0xff] }
  0xf7   :  { %2012 = vmatmul.bf16.vlgmr.msra.gmra.mxu3 %v7271_v41  ;;  %v5053_v41 = vor.u32 %v6659_v63, %v5050_v0  ;;  %v7326_v24 = vpop.f32.mrf.mxu2  ;;  %v5242_v2 = vld [vmem:[#allocation2 + $0x618] sm:$0xf0]  ;;  %v1780_v10 = vadd.f32 %v7324_v11, %v1767_v34  ;;  %v2103_v11 = vld [vmem:[%s7686_s3 + $0xf0] sm:$0xff] }
  0xf8   :  { %2018 = vmatpush.bf16.msrb.mxu0 %v5085_v47  ;;  %v1768_v39 = vpop.f32.mrf.mxu0  ;;  %v6679_v47 = vld [vmem:[#allocation2 + $0x52c] sm:$0xf]  ;;  %v5370_v5 = vld [vmem:[#allocation2 + $0x718] sm:$0xf0] }
  0xf9   :  { %2031 = vmatpush.bf16.msrb.mxu1 %v5213_v48  ;;  %2044 = vmatpush.bf16.msrb.mxu2 %v5341_v49  ;;  %v5405_v49 = vor.u32 %v6747_v30, %v5402_v31  ;;  %v5133_v58 = vor.u32 %v6679_v47, %v5130_v51  ;;  %v5373_v8 = vor.u32 %v6739_v4, %v5370_v5  ;;  %v2119_v23 = vld [vmem:[%s7686_s3 + $0x170] sm:$0xff]  ;;  %v2081_v26 = vld [vmem:[%s7686_s3 + $0x40] sm:$0xff]  ;;  %v2080_v31 = vld [vmem:[%s7686_s3 + $0x38] sm:$0xff] }
  0xfa   :  { %2057 = vmatpush.bf16.msrb.mxu3 %v5469_v54  ;;  %v7328_v29 = vpop.f32.mrf.mxu3  ;;  %v6743_v54 = vld [vmem:[#allocation2 + $0x72c] sm:$0xf]  ;;  %v1793_v13 = vadd.f32 %v7326_v24, %v1780_v10  ;;  %v2082_v24 = vld [vmem:[%s7686_s3 + $0x48] sm:$0xff]  ;;  %v2117_v39 = vld [vmem:[%s7686_s3 + $0x160] sm:$0xff] }
  0xfb   :  { %v1781_v48 = vpop.f32.mrf.mxu1  ;;  %v5389_v0 = vor.u32 %v6743_v54, %v5386_v55  ;;  %v2114_v54 = vld [vmem:[%s7686_s3 + $0x148] sm:$0xff]  ;;  %v2077_v55 = vld [vmem:[%s7686_s3 + $0x20] sm:$0xff]  ;;  %v2112_v5 = vld [vmem:[%s7686_s3 + $0x138] sm:$0xff] }
  0xfc   :  { %2019 = vmatpush.bf16.msrb.mxu0 %v5069_v60  ;;  %v6643_v60 = vld [vmem:[#allocation2 + $0x40c] sm:$0xf] }
  0xfd   :  { %2032 = vmatpush.bf16.msrb.mxu1 %v5197_v61  ;;  %2045 = vmatpush.bf16.msrb.mxu2 %v5325_v62  ;;  %v4986_v61 = vld [vmem:[#allocation2 + $0x418] sm:$0xf0]  ;;  %v6675_v62 = vld [vmem:[#allocation2 + $0x50c] sm:$0xf] }
  0xfe   :  { %2058 = vmatpush.bf16.msrb.mxu3 %v5453_v1  ;;  %v6707_v1 = vld [vmem:[#allocation2 + $0x60c] sm:$0xf] }
  0xff   :  { %v1794_v63 = vpop.f32.mrf.mxu2  ;;  %v2115_v48 = vld [vmem:[%s7686_s3 + $0x150] sm:$0xff] }
 0x100   :  { %2020 = vmatpush.bf16.msrb.mxu0 %v5053_v41  ;;  %v4989_v41 = vor.u32 %v6643_v60, %v4986_v61  ;;  %v2076_v60 = vld [vmem:[%s7686_s3 + $0x18] sm:$0xff]  ;;  %v2075_v63 = vld [vmem:[%s7686_s3 + $0x10] sm:$0xff] }
 0x101   :  { %2033 = vmatpush.bf16.msrb.mxu1 %v5181_v42  ;;  %2046 = vmatpush.bf16.msrb.mxu2 %v5309_v7  ;;  %v5117_v42 = vor.u32 %v6675_v62, %v5114_v33  ;;  %v5245_v7 = vor.u32 %v6707_v1, %v5242_v2  ;;  %v2092_v62 = vld [vmem:[%s7686_s3 + $0x98] sm:$0xff]  ;;  %v2074_v33 = vld [vmem:[%s7686_s3 + $0x8] sm:$0xff]  ;;  %v2089_v2 = vld [vmem:[%s7686_s3 + $0x80] sm:$0xff] }
 0x102   :  { %2059 = vmatpush.bf16.msrb.mxu3 %v5437_v12  ;;  %v1807_v3 = vpop.f32.mrf.mxu3  ;;  %v2104_v12 = vld [vmem:[%s7686_s3 + $0xf8] sm:$0xff]  ;;  %v2090_v1 = vld [vmem:[%s7686_s3 + $0x88] sm:$0xff] }
 0x104   :  { %2021 = vmatpush.bf16.msrb.mxu0 %v5037_v18  ;;  %v2083_v18 = vld [vmem:[%s7686_s3 + $0x50] sm:$0xff] }
 0x105   :  { %2034 = vmatpush.bf16.msrb.mxu1 %v5165_v19  ;;  %2047 = vmatpush.bf16.msrb.mxu2 %v5293_v20  ;;  %v2099_v20 = vld [vmem:[%s7686_s3 + $0xd0] sm:$0xff] }
 0x106   :  { %2060 = vmatpush.bf16.msrb.mxu3 %v5421_v25  ;;  %v2098_v25 = vld [vmem:[%s7686_s3 + $0xc8] sm:$0xff] }
 0x108   :  { %2022 = vmatpush.bf16.msrb.mxu0 %v5021_v36 }
 0x109   :  { %2035 = vmatpush.bf16.msrb.mxu1 %v5149_v43  ;;  %2048 = vmatpush.bf16.msrb.mxu2 %v5277_v44  ;;  %v2116_v43 = vld [vmem:[%s7686_s3 + $0x158] sm:$0xff] }
 0x10a   :  { %2061 = vmatpush.bf16.msrb.mxu3 %v5405_v49  ;;  %v2096_v44 = vld [vmem:[%s7686_s3 + $0xb8] sm:$0xff]  ;;  %v2095_v49 = vld [vmem:[%s7686_s3 + $0xb0] sm:$0xff] }
 0x10c   :  { %2023 = vmatpush.bf16.msrb.mxu0 %v5005_v57  ;;  %v2113_v57 = vld [vmem:[%s7686_s3 + $0x140] sm:$0xff] }
 0x10d   :  { %2036 = vmatpush.bf16.msrb.mxu1 %v5133_v58  ;;  %2049 = vmatpush.bf16.msrb.mxu2 %v5261_v59  ;;  %v2093_v58 = vld [vmem:[%s7686_s3 + $0xa0] sm:$0xff] }
 0x10e   :  { %2062 = vmatpush.bf16.msrb.mxu3 %v5389_v0  ;;  %v2091_v0 = vld [vmem:[%s7686_s3 + $0x90] sm:$0xff] }
 0x110   :  { %2024 = vmatpush.bf16.msrb.mxu0 %v4989_v41  ;;  %v1818_v19 = vpop.f32.mrf.mxu0 }
 0x111   :  { %2037 = vmatpush.bf16.msrb.mxu1 %v5117_v42  ;;  %2050 = vmatpush.bf16.msrb.mxu2 %v5245_v7  ;;  %v2111_v42 = vld [vmem:[%s7686_s3 + $0x130] sm:$0xff]  ;;  %v2110_v7 = vld [vmem:[%s7686_s3 + $0x128] sm:$0xff] }
 0x112   :  { %2063 = vmatpush.bf16.msrb.mxu3 %v5373_v8 }
 0x113   :  { %2025 = vmatmul.bf16.vlgmr.msrb.gmra.mxu0 %v7284_v37  ;;  %v2102_v37 = vld [vmem:[%s7686_s3 + $0xe8] sm:$0xff]  ;;  %v1831_v22 = vpop.f32.mrf.mxu1 }
 0x114   :  { %2141 = vmatpush.msra.mxu0 %v2088_v9  ;;  %2038 = vmatmul.bf16.vlgmr.msrb.gmra.mxu1 %v7288_v40  ;;  %v1806_v40 = vadd.f32 %v7328_v29, %v1793_v13  ;;  %v2097_v29 = vld [vmem:[%s7686_s3 + $0xc0] sm:$0xff]  ;;  %v2107_v13 = vld [vmem:[%s7686_s3 + $0x110] sm:$0xff] }
 0x115   :  { %2161 = vmatpush.msra.mxu1 %v2104_v12  ;;  %2051 = vmatmul.bf16.vlgmr.msrb.gmra.mxu2 %v7282_v32  ;;  %v2101_v32 = vld [vmem:[%s7686_s3 + $0xe0] sm:$0xff] }
 0x116   :  { %2064 = vmatmul.bf16.vlgmr.msrb.gmra.mxu3 %v7286_v38  ;;  %2142 = vmatpush.msra.mxu0 %v2087_v6  ;;  %v2084_v38 = vld [vmem:[%s7686_s3 + $0x58] sm:$0xff]  ;;  %v1819_v21 = vadd.f32 %v1818_v19, %v1806_v40  ;;  %v2109_v12 = vld [vmem:[%s7686_s3 + $0x120] sm:$0xff] }
 0x117   :  { %2162 = vmatpush.msra.mxu1 %v2103_v11  ;;  %2181 = vmatpush.msra.mxu2 %v2120_v17  ;;  %v1844_v30 = vpop.f32.mrf.mxu2  ;;  %v2108_v6 = vld [vmem:[%s7686_s3 + $0x118] sm:$0xff] }
 0x118   :  { %2143 = vmatpush.msra.mxu0 %v2086_v14  ;;  %v1832_v27 = vadd.f32 %v1831_v22, %v1819_v21  ;;  %v1820_v47 = vpop.f32.mrf.mxu0  ;;  %v367_v14 = vperm.slane %v7309_v35, 2 }
 0x119   :  { %2163 = vmatpush.msra.mxu1 %v2102_v37  ;;  %2182 = vmatpush.msra.mxu2 %v2119_v23  ;;  %v2106_v37 = vld [vmem:[%s7686_s3 + $0x108] sm:$0xff]  ;;  %v2129_v47 = vld [vmem:[%s7686_s3 + $0x1c0] sm:$0xff] }
 0x11a   :  { %2144 = vmatpush.msra.mxu0 %v2085_v15  ;;  %v1857_v36 = vpop.f32.mrf.mxu3  ;;  %v1845_v46 = vadd.f32 %v1844_v30, %v1832_v27  ;;  %v2134_v30 = vld [vmem:[%s7686_s3 + $0x1e8] sm:$0xff] }
 0x11b   :  { %2164 = vmatpush.msra.mxu1 %v2101_v32  ;;  %2183 = vmatpush.msra.mxu2 %v2118_v28  ;;  %v1833_v51 = vpop.f32.mrf.mxu1  ;;  %v2105_v32 = vld [vmem:[%s7686_s3 + $0x100] sm:$0xff] }
 0x11c   :  { %2145 = vmatpush.msra.mxu0 %v2084_v38  ;;  %v1858_v56 = vadd.f32 %v1857_v36, %v1845_v46  ;;  %v2130_v46 = vld [vmem:[%s7686_s3 + $0x1c8] sm:$0xff]  ;;  %v2127_v51 = vld [vmem:[%s7686_s3 + $0x1b0] sm:$0xff] }
 0x11d   :  { %2165 = vmatpush.msra.mxu1 %v2100_v16  ;;  %2184 = vmatpush.msra.mxu2 %v2117_v39  ;;  %v2132_v39 = vld [vmem:[%s7686_s3 + $0x1d8] sm:$0xff] }
 0x11e   :  { %2146 = vmatpush.msra.mxu0 %v2083_v18  ;;  %7044 = vtanh.f32 %v1858_v56  ;;  %v2125_v56 = vld [vmem:[%s7686_s3 + $0x1a0] sm:$0xff] }
 0x11f   :  { %2166 = vmatpush.msra.mxu1 %v2099_v20  ;;  %2185 = vmatpush.msra.mxu2 %v2116_v43  ;;  %v1846_v59 = vpop.f32.mrf.mxu2  ;;  %7046 = vtanh.f32 %v7316_v50  ;;  %v2073_v50 = vld [vmem:[%s7686_s3] sm:$0xff] }
 0x120   :  { %2147 = vmatpush.msra.mxu0 %v2082_v24  ;;  %v2123_v59 = vld [vmem:[%s7686_s3 + $0x190] sm:$0xff] }
 0x121   :  { %2167 = vmatpush.msra.mxu1 %v2098_v25  ;;  %2186 = vmatpush.msra.mxu2 %v2115_v48  ;;  %v2136_v25 = vld [vmem:[%s7686_s3 + $0x1f8] sm:$0xff] }
 0x122   :  { %2148 = vmatpush.msra.mxu0 %v2081_v26  ;;  %v1859_v61 = vpop.f32.mrf.mxu3  ;;  %2201 = vmatpush.msra.mxu3 %v2136_v25  ;;  %v2135_v26 = vld [vmem:[%s7686_s3 + $0x1f0] sm:$0xff]  ;;  %v2128_v48 = vld [vmem:[%s7686_s3 + $0x1b8] sm:$0xff] }
 0x123   :  { %2168 = vmatpush.msra.mxu1 %v2097_v29  ;;  %2187 = vmatpush.msra.mxu2 %v2114_v54  ;;  %v7064_v61 = vld [vmem:[%s7685_s2] sm:$0xf]  ;;  %s7181_s2 = smov [#allocation7]  }
 0x124   :  { %2149 = vmatpush.msra.mxu0 %v2080_v31  ;;  %v7045_v3 = vpop.eup %7044  ;;  %2202 = vmatpush.msra.mxu3 %v2135_v26  ;;  %v2133_v31 = vld [vmem:[%s7686_s3 + $0x1e0] sm:$0xff] }
 0x125   :  { %2169 = vmatpush.msra.mxu1 %v2096_v44  ;;  %2188 = vmatpush.msra.mxu2 %v2113_v57  ;;  %v7047_v4 = vpop.eup %7046  ;;  %v2131_v44 = vld [vmem:[%s7686_s3 + $0x1d0] sm:$0xff] }
 0x126   :  { %2150 = vmatpush.msra.mxu0 %v2079_v45  ;;  %2203 = vmatpush.msra.mxu3 %v2134_v30 }
 0x127   :  { %2170 = vmatpush.msra.mxu1 %v2095_v49  ;;  %2189 = vmatpush.msra.mxu2 %v2112_v5 }
 0x128   :  { %2151 = vmatpush.msra.mxu0 %v2078_v52  ;;  %2204 = vmatpush.msra.mxu3 %v2133_v31 }
 0x129   :  { %2171 = vmatpush.msra.mxu1 %v2094_v53  ;;  %2190 = vmatpush.msra.mxu2 %v2111_v42  ;;  %v2126_v53 = vld [vmem:[%s7686_s3 + $0x1a8] sm:$0xff] }
 0x12a   :  { %2152 = vmatpush.msra.mxu0 %v2077_v55  ;;  %2205 = vmatpush.msra.mxu3 %v2132_v39 }
 0x12b   :  { %2172 = vmatpush.msra.mxu1 %v2093_v58  ;;  %2191 = vmatpush.msra.mxu2 %v2110_v7  ;;  %v2124_v58 = vld [vmem:[%s7686_s3 + $0x198] sm:$0xff] }
 0x12c   :  { %2153 = vmatpush.msra.mxu0 %v2076_v60  ;;  %2206 = vmatpush.msra.mxu3 %v2131_v44 }
 0x12d   :  { %2173 = vmatpush.msra.mxu1 %v2092_v62  ;;  %2192 = vmatpush.msra.mxu2 %v2109_v12  ;;  %v368_v62 = vperm.slane %v7064_v61, 3  ;;  %v2316_v61 = vld [vmem:[%s7688_s5 + $0x10] sm:$0xff] }
 0x12e   :  { %2154 = vmatpush.msra.mxu0 %v2075_v63  ;;  %2207 = vmatpush.msra.mxu3 %v2130_v46  ;;  %v2122_v63 = vld [vmem:[%s7686_s3 + $0x188] sm:$0xff] }
 0x12f   :  { %2174 = vmatpush.msra.mxu1 %v2091_v0  ;;  %2193 = vmatpush.msra.mxu2 %v2108_v6  ;;  %v2121_v0 = vld [vmem:[%s7686_s3 + $0x180] sm:$0xff]  ;;  %s4427_s3 = sshll.u32 %s7181_s2, 4  ;;  %s4428_s3 = int_to_ptr.vmem [resolvable:$true] %s4427_s3 }
 0x130   :  { %2155 = vmatpush.msra.mxu0 %v2074_v33  ;;  %v1870_v34 = vpop.f32.mrf.mxu0  ;;  %2208 = vmatpush.msra.mxu3 %v2129_v47 }
 0x131   :  { %2175 = vmatpush.msra.mxu1 %v2090_v1  ;;  %2194 = vmatpush.msra.mxu2 %v2107_v13  ;;  %v1871_v38 = vadd.f32 %v1870_v34, %v367_v14 }
 0x132   :  { %2156 = vmatpush.msra.mxu0 %v2073_v50  ;;  %2209 = vmatpush.msra.mxu3 %v2128_v48  ;;  %v2270_v50 = vld [vmem:[%s7692_s9] sm:$0x3] }
 0x133   :  { %2157 = vmatmul.f32.vlgmr.msra.gmra.mxu0 %v7047_v4  ;;  %2176 = vmatpush.msra.mxu1 %v2089_v2  ;;  %v1883_v41 = vpop.f32.mrf.mxu1 }
 0x134   :  { %2177 = vmatmul.f32.vlgmr.msra.gmra.mxu1 %v7045_v3  ;;  %2195 = vmatpush.msra.mxu2 %v2106_v37  ;;  %v1884_v16 = vadd.f32 %v1883_v41, %v1871_v38  ;;  %v7175_v3 = vmov 0  }
 0x135   :  { %2210 = vmatpush.msra.mxu3 %v2127_v51  ;;  %7040 = vset.pattern.permute.xlu1 %v7175_v3  ;;  %v6822_v3 = vld [vmem:[#allocation5 + $0x19c] sm:$0xf0] }
 0x136   :  { %2196 = vmatpush.msra.mxu2 %v2105_v32  ;;  %2274 = vperm.xlu1 %7040, %v2270_v50  }
 0x137   :  { %v1896_v8 = vpop.f32.mrf.mxu2  ;;  %2211 = vmatpush.msra.mxu3 %v2126_v53 }
 0x138   :  { %v1872_v10 = vpop.f32.mrf.mxu0  ;;  %v1897_v17 = vadd.f32 %v1896_v8, %v1884_v16  ;;  %v2271_v8 = vld [vmem:[%s7692_s9 + $0x2] sm:$0x3]  ;;  %2392 = vmatpush.msrb.mxu2 %v2316_v61 }
 0x139   :  { %2212 = vmatpush.msra.mxu3 %v2125_v56  ;;  %v7176_v10 = vmov 1  }
 0x13a   :  { %v1909_v9 = vpop.f32.mrf.mxu3  ;;  %7041 = vset.pattern.permute.xlu2 %v7176_v10  ;;  %7042 = vset.pattern.permute.xlu0 %v7176_v10 }
 0x13b   :  { %v1885_v11 = vpop.f32.mrf.mxu1  ;;  %v1910_v18 = vadd.f32 %v1909_v9, %v1897_v17  ;;  %2213 = vmatpush.msra.mxu3 %v2124_v58  ;;  %v2248_v9 = vld [vmem:[%s7693_s10] sm:$0x3]  ;;  %2295 = vperm.xlu2 %7041, %v2270_v50   ;;  %v6894_v50 = vld [vmem:[#allocation5 + $0x3dc] sm:$0xf0] }
 0x13c   :  { %2252 = vrot.lane.b32.xlu0 %v2248_v9, %s7177_s15  ;;  %v7043_v17 = vld [vmem:[%s7687_s4] ss:$0 sm:$0xff]  ;;  %s7178_s4 = smov 112   ;;  %v7022_v9 = vld [vmem:[#allocation5 + $0x7dc] sm:$0xf0] }
 0x13d   :  { %2214 = vmatpush.msra.mxu3 %v2123_v59  ;;  %v2314_v59 = vld [vmem:[%s7688_s5] sm:$0xff] }
 0x13e   :  { %2279 = vperm.xlu1 %7040, %v2271_v8   ;;  %2352 = vmatpush.msrb.mxu0 %v2314_v59  ;;  %v6356_v59 = vld [vmem:[#allocation5 + $0x6c0] sm:$0xf] }
 0x13f   :  { %v1898_v15 = vpop.f32.mrf.mxu2  ;;  %2215 = vmatpush.msra.mxu3 %v2122_v63  ;;  %v5716_v63 = vld [vmem:[#allocation5 + $0x1c0] sm:$0xf] }
 0x140   :  { %v2249_v15 = vld [vmem:[%s7693_s10 + $0x2] sm:$0x3]  ;;  %s7179_s10 = smov 104  }
 0x141   :  { %2216 = vmatpush.msra.mxu3 %v2121_v0  ;;  %v6830_v0 = vld [vmem:[#allocation5 + $0x1dc] sm:$0xf0] }
 0x142   :  { %v1911_v40 = vpop.f32.mrf.mxu3 }
 0x143   :  { %2299 = vperm.xlu2 %7041, %v2271_v8   ;;  %v6484_v8 = vld [vmem:[#allocation5 + $0x7c0] sm:$0xf] }
 0x144   :  { %2254 = vrot.lane.b32.xlu0 %v2249_v15, %s7177_s15  ;;  %v6196_v15 = vld [vmem:[#allocation5 + $0x580] sm:$0xf]  ;;  %s4429_s15 = sshll.u32 %s7695_s12, 4  ;;  %s4430_s15 = int_to_ptr.hbm [resolvable:$true] %s4429_s15 }
 0x150   :  { %v1922_v19 = vpop.f32.mrf.mxu0 }
 0x151   :  { %v1923_v35 = vadd.f32 %v1922_v19, %v1910_v18 }
 0x153   :  { %v1935_v20 = vpop.f32.mrf.mxu1 }
 0x154   :  { %v1936_v21 = vadd.f32 %v1935_v20, %v1923_v35 }
 0x157   :  { %v1948_v22 = vpop.f32.mrf.mxu2 }
 0x158   :  { %v1949_v23 = vadd.f32 %v1948_v22, %v1936_v21  ;;  %v1924_v28 = vpop.f32.mrf.mxu0 }
 0x15a   :  { %v1961_v24 = vpop.f32.mrf.mxu3 }
 0x15b   :  { %v1962_v27 = vadd.f32 %v1961_v24, %v1949_v23  ;;  %v1937_v29 = vpop.f32.mrf.mxu1 }
 0x15d   :  { %7048 = vtanh.f32 %v1962_v27 }
 0x15f   :  { %v1950_v36 = vpop.f32.mrf.mxu2 }
 0x162   :  { %v1963_v43 = vpop.f32.mrf.mxu3 }
 0x163   :  { %v7049_v45 = vpop.eup %7048 }
 0x164   :  { %2197 = vmatmul.f32.vlgmr.msra.gmra.mxu2 %v7049_v45 }
 0x170   :  { %v1974_v49 = vpop.f32.mrf.mxu0 }
 0x171   :  { %v1975_v2 = vadd.f32 %v1974_v49, %v368_v62  ;;  %v2317_v62 = vld [vmem:[%s7688_s5 + $0x18] sm:$0xff] }
 0x172   :  { %2412 = vmatpush.msrb.mxu3 %v2317_v62  ;;  %v5556_v62 = vld [vmem:[#allocation5 + $0x80] sm:$0xf] }
 0x173   :  { %v1987_v52 = vpop.f32.mrf.mxu1 }
 0x174   :  { %v1988_v4 = vadd.f32 %v1987_v52, %v1975_v2  ;;  %v5684_v2 = vld [vmem:[#allocation5 + $0x180] sm:$0xf] }
 0x177   :  { %v2000_v54 = vpop.f32.mrf.mxu2 }
 0x178   :  { %v1976_v57 = vpop.f32.mrf.mxu0  ;;  %v2001_v5 = vadd.f32 %v2000_v54, %v1988_v4 }
 0x17a   :  { %v2013_v55 = vpop.f32.mrf.mxu3 }
 0x17b   :  { %v1989_v60 = vpop.f32.mrf.mxu1  ;;  %v2014_v34 = vadd.f32 %v2013_v55, %v2001_v5  ;;  %v5940_v5 = vld [vmem:[#allocation5 + $0x380] sm:$0xf] }
 0x17c   :  { %v2315_v60 = vld [vmem:[%s7688_s5 + $0x8] sm:$0xff] }
 0x17d   :  { %2372 = vmatpush.msrb.mxu1 %v2315_v60  ;;  %v6990_v60 = vld [vmem:[#allocation5 + $0x6dc] sm:$0xf0] }
 0x17f   :  { %v2002_v33 = vpop.f32.mrf.mxu2 }
 0x180   :  { %v5972_v33 = vld [vmem:[#allocation5 + $0x3c0] sm:$0xf] }
 0x181   :  { %v5973_v4 = vor.u32 %v6894_v50, %v5972_v33  ;;  %v6854_v50 = vld [vmem:[#allocation5 + $0x29c] sm:$0xf0] }
 0x182   :  { %v2015_v1 = vpop.f32.mrf.mxu3 }
 0x183   :  { %v5717_v1 = vor.u32 %v6830_v0, %v5716_v63  ;;  %3992 = vmatpush.bf16.msra.mxu1 %v5973_v4  ;;  %v6790_v63 = vld [vmem:[#allocation5 + $0x9c] sm:$0xf0] }
 0x185   :  { %3979 = vmatpush.bf16.msra.mxu0 %v5717_v1  ;;  %v5812_v1 = vld [vmem:[#allocation5 + $0x280] sm:$0xf] }
 0x190   :  { %v2026_v41 = vpop.f32.mrf.mxu0 }
 0x191   :  { %v2039_v42 = vpop.f32.mrf.mxu1  ;;  %v2027_v7 = vadd.f32 %v2026_v41, %v2014_v34  ;;  %v6886_v34 = vld [vmem:[#allocation5 + $0x39c] sm:$0xf0] }
 0x192   :  { %v6228_v41 = vld [vmem:[#allocation5 + $0x5c0] sm:$0xf]  ;;  %v5941_v10 = vor.u32 %v6886_v34, %v5940_v5  ;;  %v6357_v5 = vor.u32 %v6990_v60, %v6356_v59 }
 0x193   :  { %v2040_v12 = vadd.f32 %v2039_v42, %v2027_v7  ;;  %v5685_v42 = vor.u32 %v6822_v3, %v5684_v2  ;;  %v6958_v7 = vld [vmem:[#allocation5 + $0x5dc] sm:$0xf0] }
 0x194   :  { %3993 = vmatpush.bf16.msra.mxu1 %v5941_v10  ;;  %v6068_v34 = vld [vmem:[#allocation5 + $0x480] sm:$0xf] }
 0x195   :  { %v2296_v22 = vpop.permute.xlu2 %2295  ;;  %3980 = vmatpush.bf16.msra.mxu0 %v5685_v42  ;;  %v6982_v10 = vld [vmem:[#allocation5 + $0x69c] sm:$0xf0] }
 0x198   :  { %v2052_v6 = vpop.f32.mrf.mxu2  ;;  %v2028_v14 = vpop.f32.mrf.mxu0 }
 0x199   :  { %v2053_v11 = vadd.f32 %v2052_v6, %v2040_v12  ;;  %v2065_v13 = vpop.f32.mrf.mxu3  ;;  %v2041_v37 = vpop.f32.mrf.mxu1  ;;  %v6229_v12 = vor.u32 %v6958_v7, %v6228_v41  ;;  %v6485_v6 = vor.u32 %v7022_v9, %v6484_v8  ;;  %v5908_v14 = vld [vmem:[#allocation5 + $0x340] sm:$0xf]  ;;  %v5557_v7 = vor.u32 %v6790_v63, %v5556_v62  ;;  %v6946_v63 = vld [vmem:[#allocation5 + $0x584] sm:$0xf] }
 0x19a   :  { %v6878_v37 = vld [vmem:[#allocation5 + $0x35c] sm:$0xf0] }
 0x19b   :  { %v2066_v40 = vadd.f32 %v2065_v13, %v2053_v11  ;;  %v5652_v11 = vld [vmem:[#allocation5 + $0x140] sm:$0xf]  ;;  %4005 = vmatpush.bf16.msra.mxu2 %v6229_v12 }
 0x19c   :  { %v6814_v13 = vld [vmem:[#allocation5 + $0x15c] sm:$0xf0] }
 0x19d   :  { %7050 = vtanh.f32 %v2066_v40  ;;  %v2300_v29 = vpop.permute.xlu2 %2299  ;;  %v6950_v40 = vld [vmem:[#allocation5 + $0x59c] sm:$0xf0] }
 0x19e   :  { %v6918_v8 = vld [vmem:[#allocation5 + $0x49c] sm:$0xf0] }
 0x19f   :  { %v6324_v9 = vld [vmem:[#allocation5 + $0x680] sm:$0xf] }
 0x1a0   :  { %v2054_v32 = vpop.f32.mrf.mxu2 }
 0x1a1   :  { %v2067_v38 = vpop.f32.mrf.mxu3  ;;  %v6197_v32 = vor.u32 %v6950_v40, %v6196_v15  ;;  %v6069_v15 = vor.u32 %v6918_v8, %v6068_v34  ;;  %v6325_v40 = vor.u32 %v6982_v10, %v6324_v9  ;;  %v5910_v34 = vld [vmem:[#allocation5 + $0x360] sm:$0xf0] }
 0x1a2   :  { %v6452_v38 = vld [vmem:[#allocation5 + $0x780] sm:$0xf]  ;;  %v6166_v8 = vld [vmem:[#allocation5 + $0x560] sm:$0xf0] }
 0x1a3   :  { %v7051_v16 = vpop.eup %7050  ;;  %4006 = vmatpush.bf16.msra.mxu2 %v6197_v32  ;;  %v6036_v32 = vld [vmem:[#allocation5 + $0x440] sm:$0xf]  ;;  %v7002_v9 = vld [vmem:[#allocation5 + $0x744] sm:$0xf] }
 0x1a4   :  { %2217 = vmatmul.f32.vlgmr.msra.gmra.mxu3 %v7051_v16  ;;  %v7014_v16 = vld [vmem:[#allocation5 + $0x79c] sm:$0xf0]  ;;  %v6422_v10 = vld [vmem:[#allocation5 + $0x760] sm:$0xf0] }
 0x1a5   :  { %4018 = vmatpush.bf16.msra.mxu3 %v6485_v6  ;;  %v5524_v6 = vld [vmem:[#allocation5 + $0x40] sm:$0xf] }
 0x1a8   :  { %v2275_v26 = vpop.permute.xlu1 %2274 }
 0x1ae   :  { %v2253_v43 = vpop.permute.xlu0 %2252 }
 0x1b0   :  { %v2158_v18 = vpop.f32.mrf.mxu0  ;;  %v2280_v56 = vpop.permute.xlu1 %2279 }
 0x1b1   :  { %v2159_v19 = vadd.f32 %v7043_v17, %v2158_v18  ;;  %v2178_v35 = vpop.f32.mrf.mxu1  ;;  %v5653_v17 = vor.u32 %v6814_v13, %v5652_v11  ;;  %v6453_v18 = vor.u32 %v7014_v16, %v6452_v38  ;;  %v6782_v11 = vld [vmem:[#allocation5 + $0x5c] sm:$0xf0] }
 0x1b2   :  { %v6910_v38 = vld [vmem:[#allocation5 + $0x45c] sm:$0xf0]  ;;  %v5525_v16 = vor.u32 %v6782_v11, %v5524_v6  ;;  %v6802_v6 = vld [vmem:[#allocation5 + $0x104] sm:$0xf] }
 0x1b3   :  { %v2179_v21 = vadd.f32 %v2178_v35, %v2159_v19  ;;  %v5620_v19 = vld [vmem:[#allocation5 + $0x100] sm:$0xf]  ;;  %4019 = vmatpush.bf16.msra.mxu3 %v6453_v18  ;;  %3981 = vmatpush.bf16.msra.mxu0 %v5653_v17  ;;  %v5622_v11 = vld [vmem:[#allocation5 + $0x120] sm:$0xf0] }
 0x1b4   :  { %v6806_v35 = vld [vmem:[#allocation5 + $0x11c] sm:$0xf0] }
 0x1b5   :  { %v6292_v17 = vld [vmem:[#allocation5 + $0x640] sm:$0xf] }
 0x1b6   :  { %v2255_v51 = vpop.permute.xlu0 %2254  ;;  %v6974_v18 = vld [vmem:[#allocation5 + $0x65c] sm:$0xf0] }
 0x1e7   :  { %v2198_v20 = vpop.f32.mrf.mxu2 }
 0x1e8   :  { %v2199_v23 = vadd.f32 %v2198_v20, %v2179_v21  ;;  %v5909_v20 = vor.u32 %v6878_v37, %v5908_v14  ;;  %v6164_v21 = vld [vmem:[#allocation5 + $0x540] sm:$0xf] }
 0x1e9   :  { %v5780_v14 = vld [vmem:[#allocation5 + $0x240] sm:$0xf] }
 0x1ea   :  { %3994 = vmatpush.bf16.msra.mxu1 %v5909_v20  ;;  %v6846_v37 = vld [vmem:[#allocation5 + $0x25c] sm:$0xf0] }
 0x1eb   :  { %v6774_v20 = vld [vmem:[#allocation5 + $0x1c] sm:$0xf0] }
 0x227   :  { %v2218_v24 = vpop.f32.mrf.mxu3 }
 0x228   :  { %v7551_v25 = vadd.f32 %v2218_v24, %v2199_v23  ;;  %v6420_v23 = vld [vmem:[#allocation5 + $0x740] sm:$0xf] }
 0x22a   :  { %v2221_v27 = vmul.f32 1.442695, %v7551_v25  ;;  %v2282_v28 = vmul.f32 %v2275_v26, %v7551_v25  ;;  %2224 = vst.msk [vmem:[#allocation7] sm:$0x3] %vm2223_vm0, %v7551_v25  ;;  %v2303_v31 = vmul.f32 %v2300_v29, %v7551_v25  ;;  %v2283_v57 = vmul.f32 %v2280_v56, %v7551_v25  ;;  %v5876_v26 = vld [vmem:[#allocation5 + $0x300] sm:$0xf] }
 0x22b   :  { %v2302_v58 = vmul.f32 %v2296_v22, %v7551_v25  ;;  %v6942_v22 = vld [vmem:[#allocation5 + $0x55c] sm:$0xf0]  ;;  %4432 = dma.vmem_to_hbm [thread:$0]  %s4428_s3, 32, %s4430_s15, [#allocation4]  }
 0x22c   :  { %7052 = vpow2.f32 %v2221_v27  ;;  %2286 = vrot.lane.b32.xlu2 %v2282_v28, %s7178_s4  ;;  %v6870_v27 = vld [vmem:[#allocation5 + $0x31c] sm:$0xf0] }
 0x22d   :  { %v7006_v28 = vld [vmem:[#allocation5 + $0x75c] sm:$0xf0] }
 0x22e   :  { %v6100_v56 = vld [vmem:[#allocation5 + $0x4c0] sm:$0xf] }
 0x232   :  { %v7053_v30 = vpop.eup %7052 }
 0x233   :  { %7054 = vrsqrt.f32 %v7053_v30  ;;  %vm2243_vm1 = vcmp.eq.f32.partialorder %v7053_v30, inf  ;;  %v2246_v49 = vand.u32 2147483648, %v7053_v30  ;;  %vm2245_vm2 = vcmp.eq.f32.partialorder %v7053_v30, 0.0 }
 0x234   :  { %2308 = vrot.lane.b32.xlu2 %v2303_v31, %s7179_s10  ;;  %v6165_v31 = vor.u32 %v6942_v22, %v6164_v21  ;;  %v5748_v21 = vld [vmem:[#allocation5 + $0x200] sm:$0xf] }
 0x235   :  { %v6838_v22 = vld [vmem:[#allocation5 + $0x21c] sm:$0xf0] }
 0x236   :  { %4007 = vmatpush.bf16.msra.mxu2 %v6165_v31  ;;  %v6293_v31 = vor.u32 %v6974_v18, %v6292_v17  ;;  %v6858_v17 = vld [vmem:[#allocation5 + $0x2c4] sm:$0xf] }
 0x237   :  { %v5846_v18 = vld [vmem:[#allocation5 + $0x2e0] sm:$0xf0] }
 0x239   :  { %v7055_v36 = vpop.eup %7054 }
 0x23a   :  { %v2237_v39 = vmul.f32 %v7055_v36, %v7053_v30 }
 0x23c   :  { %v2238_v44 = vmul.f32 %v7055_v36, %v2237_v39  ;;  %v6132_v39 = vld [vmem:[#allocation5 + $0x500] sm:$0xf] }
 0x23e   :  { %v2239_v45 = vmul.f32 0.5, %v2238_v44  ;;  %v6934_v44 = vld [vmem:[#allocation5 + $0x51c] sm:$0xf0] }
 0x240   :  { %v2240_v46 = vsub.f32 1.5, %v2239_v45  ;;  %v6388_v45 = vld [vmem:[#allocation5 + $0x700] sm:$0xf] }
 0x242   :  { %v2241_v47 = vmul.f32 %v7055_v36, %v2240_v46  ;;  %v6421_v36 = vor.u32 %v7006_v28, %v6420_v23  ;;  %v6998_v46 = vld [vmem:[#allocation5 + $0x71c] sm:$0xf0]  ;;  %v6826_v23 = vld [vmem:[#allocation5 + $0x1c4] sm:$0xf] }
 0x243   :  { %v6890_v28 = vld [vmem:[#allocation5 + $0x3c4] sm:$0xf] }
 0x244   :  { %v2242_v48 = vmul.f32 %v7053_v30, %v2241_v47  ;;  %v5877_v47 = vor.u32 %v6870_v27, %v5876_v26  ;;  %4020 = vmatpush.bf16.msra.mxu3 %v6421_v36  ;;  %v6004_v36 = vld [vmem:[#allocation5 + $0x400] sm:$0xf] }
 0x246   :  { %v2244_v52 = vsel %vm2243_vm1, %v7053_v30, %v2242_v48  ;;  %v5588_v48 = vld [vmem:[#allocation5 + $0xc0] sm:$0xf]  ;;  %3995 = vmatpush.bf16.msra.mxu1 %v5877_v47  ;;  %v5749_v47 = vor.u32 %v6838_v22, %v5748_v21  ;;  %v6134_v21 = vld [vmem:[#allocation5 + $0x520] sm:$0xf0] }
 0x247   :  { %v2247_v53 = vsel %vm2245_vm2, %v2246_v49, %v2244_v52  ;;  %v6798_v49 = vld [vmem:[#allocation5 + $0xdc] sm:$0xf0]  ;;  %v6994_v22 = vld [vmem:[#allocation5 + $0x704] sm:$0xf] }
 0x248   :  { %v2258_v54 = vmul.f32 %v2253_v43, %v2247_v53  ;;  %v2259_v55 = vmul.f32 %v2255_v51, %v2247_v53  ;;  %v5621_v43 = vor.u32 %v6806_v35, %v5620_v19  ;;  %v5844_v52 = vld [vmem:[#allocation5 + $0x2c0] sm:$0xf]  ;;  %v5781_v19 = vor.u32 %v6846_v37, %v5780_v14  ;;  %v5878_v14 = vld [vmem:[#allocation5 + $0x320] sm:$0xf0] }
 0x249   :  { %v6862_v53 = vld [vmem:[#allocation5 + $0x2dc] sm:$0xf0] }
 0x24a   :  { %2264 = vrot.lane.b32.xlu1 %v2259_v55, %s7180_s19  ;;  %2262 = vrot.lane.b32.xlu0 %v2258_v54, %s7180_s19  ;;  %v6133_v54 = vor.u32 %v6934_v44, %v6132_v39  ;;  %v6389_v55 = vor.u32 %v6998_v46, %v6388_v45  ;;  %v5845_v61 = vor.u32 %v6862_v53, %v5844_v52  ;;  %v5492_v35 = vld [vmem:[#allocation5] sm:$0xf]  ;;  %v6954_v45 = vld [vmem:[#allocation5 + $0x5c4] sm:$0xf] }
 0x24b   :  { %3982 = vmatpush.bf16.msra.mxu0 %v5621_v43  ;;  %v6902_v39 = vld [vmem:[#allocation5 + $0x41c] sm:$0xf0]  ;;  %v5493_v46 = vor.u32 %v6774_v20, %v5492_v35  ;;  %v5849_v35 = vor.u32 %v6858_v17, %v5846_v18  ;;  %v6930_v20 = vld [vmem:[#allocation5 + $0x504] sm:$0xf]  ;;  %v5980_v18 = vld [vmem:[#allocation5 + $0x3c8] sm:$0xf] }
 0x24c   :  { %4008 = vmatpush.bf16.msra.mxu2 %v6133_v54  ;;  %4021 = vmatpush.bf16.msra.mxu3 %v6389_v55  ;;  %v6260_v43 = vld [vmem:[#allocation5 + $0x600] sm:$0xf]  ;;  %v6818_v55 = vld [vmem:[#allocation5 + $0x184] sm:$0xf]  ;;  %v6005_v59 = vor.u32 %v6902_v39, %v6004_v36 }
 0x24d   :  { %3996 = vmatpush.bf16.msra.mxu1 %v5845_v61  ;;  %v6966_v44 = vld [vmem:[#allocation5 + $0x61c] sm:$0xf0]  ;;  %v6922_v39 = vld [vmem:[#allocation5 + $0x4c4] sm:$0xf] }
 0x24e   :  { %v6261_v60 = vor.u32 %v6966_v44, %v6260_v43  ;;  %v6102_v43 = vld [vmem:[#allocation5 + $0x4e0] sm:$0xf0] }
 0x24f   :  { %v6986_v44 = vld [vmem:[#allocation5 + $0x6c4] sm:$0xf] }
 0x250   :  { %4022 = vmatpush.bf16.msra.mxu3 %v6357_v5  ;;  %v6874_v5 = vld [vmem:[#allocation5 + $0x344] sm:$0xf] }
 0x252   :  { %2306 = vrot.lane.b32.xlu1 %v2302_v58, %s7179_s10  ;;  %2288 = vrot.lane.b32.xlu0 %v2283_v57, %s7178_s4  ;;  %v5589_v57 = vor.u32 %v6798_v49, %v5588_v48  ;;  %v6926_v58 = vld [vmem:[#allocation5 + $0x4dc] sm:$0xf0]  ;;  %v6230_v48 = vld [vmem:[#allocation5 + $0x5e0] sm:$0xf0] }
 0x253   :  { %v6101_v4 = vor.u32 %v6926_v58, %v6100_v56  ;;  %v7018_v49 = vld [vmem:[#allocation5 + $0x7c4] sm:$0xf]  ;;  %v6233_v61 = vor.u32 %v6954_v45, %v6230_v48  ;;  %v6105_v45 = vor.u32 %v6922_v39, %v6102_v43  ;;  %v6236_v39 = vld [vmem:[#allocation5 + $0x5c8] sm:$0xf] }
 0x254   :  { %3983 = vmatpush.bf16.msra.mxu0 %v5589_v57  ;;  %4023 = vmatpush.bf16.msra.mxu3 %v6325_v40  ;;  %v5686_v56 = vld [vmem:[#allocation5 + $0x1a0] sm:$0xf0]  ;;  %v5625_v40 = vor.u32 %v6802_v6, %v5622_v11  ;;  %v6959_v43 = vld [vmem:[#allocation5 + $0x5e4] sm:$0xf0] }
 0x255   :  { %4009 = vmatpush.bf16.msra.mxu2 %v6101_v4  ;;  %v6882_v57 = vld [vmem:[#allocation5 + $0x384] sm:$0xf] }
 0x256   :  { %v5942_v58 = vld [vmem:[#allocation5 + $0x3a0] sm:$0xf0] }
 0x257   :  { %v5654_v4 = vld [vmem:[#allocation5 + $0x160] sm:$0xf0] }
 0x258   :  { %3984 = vmatpush.bf16.msra.mxu0 %v5557_v7  ;;  %4024 = vmatpush.bf16.msra.mxu3 %v6293_v31  ;;  %v6938_v7 = vld [vmem:[#allocation5 + $0x544] sm:$0xf] }
 0x259   :  { %4010 = vmatpush.bf16.msra.mxu2 %v6069_v15  ;;  %v6169_v37 = vor.u32 %v6938_v7, %v6166_v8  ;;  %v6425_v15 = vor.u32 %v7002_v9, %v6422_v10  ;;  %v5814_v31 = vld [vmem:[#allocation5 + $0x2a0] sm:$0xf0] }
 0x25a   :  { %2231 = vrot.lane.b32.xlu1 %v7551_v25, %s7178_s4  ;;  %2226 = vrot.lane.b32.xlu0 %v7053_v30, %s7180_s19  ;;  %v6778_v48 = vld [vmem:[#allocation5 + $0x44] sm:$0xf]  ;;  %s4440_s4 = sshll.u32 %s7696_s13, 4  ;;  %s4441_s4 = int_to_ptr.hbm [resolvable:$true] %s4440_s4 }
 0x25b   :  { %v6962_v8 = vld [vmem:[#allocation5 + $0x604] sm:$0xf] }
 0x25c   :  { %3985 = vmatpush.bf16.msra.mxu0 %v5525_v16  ;;  %4025 = vmatpush.bf16.msra.mxu3 %v6261_v60  ;;  %v5590_v16 = vld [vmem:[#allocation5 + $0xe0] sm:$0xf0] }
 0x25d   :  { %v6262_v9 = vld [vmem:[#allocation5 + $0x620] sm:$0xf0] }
 0x25e   :  { %v6265_v10 = vor.u32 %v6962_v8, %v6262_v9  ;;  %v5596_v8 = vld [vmem:[#allocation5 + $0xc8] sm:$0xf] }
 0x25f   :  { %v6799_v9 = vld [vmem:[#allocation5 + $0xe4] sm:$0xf0] }
 0x260   :  { %3986 = vmatpush.bf16.msra.mxu0 %v5493_v46  ;;  %v6358_v46 = vld [vmem:[#allocation5 + $0x6e0] sm:$0xf0] }
 0x286   :  { %v2287_v24 = vpop.permute.xlu2 %2286 }
 0x28e   :  { %v2309_v12 = vpop.permute.xlu2 %2308 }
 0x2bc   :  { %v2265_v29 = vpop.permute.xlu1 %2264  ;;  %v2263_v30 = vpop.permute.xlu0 %2262 }
 0x2bd   :  { %v2268_v51 = vadd.f32 %v2263_v30, %v7551_v25  ;;  %v2269_v0 = vadd.f32 %v2265_v29, %v7551_v25  ;;  %v5813_v25 = vor.u32 %v6854_v50, %v5812_v1  ;;  %v5974_v29 = vld [vmem:[#allocation5 + $0x3e0] sm:$0xf0]  ;;  %v6037_v30 = vor.u32 %v6910_v38, %v6036_v32 }
 0x2be   :  { %v5977_v54 = vor.u32 %v6890_v28, %v5974_v29  ;;  %v6454_v1 = vld [vmem:[#allocation5 + $0x7a0] sm:$0xf0]  ;;  %v5689_v50 = vor.u32 %v6818_v55, %v5686_v56 }
 0x2bf   :  { %v2292_v33 = vadd.f32 %v2287_v24, %v2268_v51  ;;  %3997 = vmatpush.bf16.msra.mxu1 %v5813_v25  ;;  %v5718_v24 = vld [vmem:[#allocation5 + $0x1e0] sm:$0xf0]  ;;  %4011 = vmatpush.bf16.msra.mxu2 %v6037_v30  ;;  %v5913_v25 = vor.u32 %v6874_v5, %v5910_v34 }
 0x2c0   :  { %v6486_v51 = vld [vmem:[#allocation5 + $0x7e0] sm:$0xf0]  ;;  %v5721_v53 = vor.u32 %v6826_v23, %v5718_v24  ;;  %v6137_v23 = vor.u32 %v6930_v20, %v6134_v21 }
 0x2c1   :  { %v6489_v62 = vor.u32 %v7018_v49, %v6486_v51  ;;  %v6794_v38 = vld [vmem:[#allocation5 + $0xc4] sm:$0xf] }
 0x2c2   :  { %v6390_v24 = vld [vmem:[#allocation5 + $0x720] sm:$0xf0] }
 0x2c3   :  { %3998 = vmatpush.bf16.msra.mxu1 %v5781_v19  ;;  %4012 = vmatpush.bf16.msra.mxu2 %v6005_v59  ;;  %v5593_v19 = vor.u32 %v6794_v38, %v5590_v16  ;;  %v5558_v28 = vld [vmem:[#allocation5 + $0xa0] sm:$0xf0]  ;;  %v6831_v38 = vld [vmem:[#allocation5 + $0x1e4] sm:$0xf0] }
 0x2c4   :  { %v2307_v2 = vpop.permute.xlu1 %2306  ;;  %v2289_v3 = vpop.permute.xlu0 %2288  ;;  %v6850_v29 = vld [vmem:[#allocation5 + $0x284] sm:$0xf] }
 0x2c5   :  { %v2312_v41 = vadd.f32 %v2307_v2, %v2292_v33  ;;  %v2293_v42 = vadd.f32 %v2289_v3, %v2269_v0  ;;  %v6198_v0 = vld [vmem:[#allocation5 + $0x5a0] sm:$0xf0]  ;;  %v5945_v2 = vor.u32 %v6882_v57, %v5942_v58  ;;  %v5817_v36 = vor.u32 %v6850_v29, %v5814_v31  ;;  %v6887_v31 = vld [vmem:[#allocation5 + $0x3a4] sm:$0xf0] }
 0x2c6   :  { %v7010_v33 = vld [vmem:[#allocation5 + $0x784] sm:$0xf] }
 0x2c7   :  { %2330 = vst [vmem:[#allocation1] ss:$4 sm:$0xff] %v2312_v41  ;;  %v2313_v13 = vadd.f32 %v2309_v12, %v2293_v42  ;;  %3999 = vmatpush.bf16.msra.mxu1 %v5749_v47  ;;  %v6810_v3 = vld [vmem:[#allocation5 + $0x144] sm:$0xf]  ;;  %v6201_v41 = vor.u32 %v6946_v63, %v6198_v0  ;;  %v6457_v42 = vor.u32 %v7010_v33, %v6454_v1 }
 0x2c8   :  { %v5657_v12 = vor.u32 %v6810_v3, %v5654_v4  ;;  %v6361_v47 = vor.u32 %v6986_v44, %v6358_v46  ;;  %v5526_v49 = vld [vmem:[#allocation5 + $0x60] sm:$0xf0]  ;;  %v6492_v44 = vld [vmem:[#allocation5 + $0x7c8] sm:$0xf] }
 0x2c9   :  { %2332 = vst [vmem:[#allocation1 + $0x1] ss:$4 sm:$0xff] %v2313_v13  ;;  %v6866_v13 = vld [vmem:[#allocation5 + $0x304] sm:$0xf]  ;;  %v5529_v51 = vor.u32 %v6778_v48, %v5526_v49  ;;  %v7023_v46 = vld [vmem:[#allocation5 + $0x7e4] sm:$0xf0] }
 0x2ca   :  { %v5881_v32 = vor.u32 %v6866_v13, %v5878_v14  ;;  %v6914_v55 = vld [vmem:[#allocation5 + $0x484] sm:$0xf]  ;;  %v6815_v48 = vld [vmem:[#allocation5 + $0x164] sm:$0xf0] }
 0x2cb   :  { %v6070_v56 = vld [vmem:[#allocation5 + $0x4a0] sm:$0xf0]  ;;  %v5916_v49 = vld [vmem:[#allocation5 + $0x348] sm:$0xf] }
 0x2cc   :  { %v2232_v26 = vpop.permute.xlu1 %2231  ;;  %v2227_v27 = vpop.permute.xlu0 %2226  ;;  %v6978_v57 = vld [vmem:[#allocation5 + $0x684] sm:$0xf]  ;;  %v6073_v58 = vor.u32 %v6914_v55, %v6070_v56  ;;  %v6493_v56 = vor.u32 %v7023_v46, %v6492_v44  ;;  %v6919_v44 = vld [vmem:[#allocation5 + $0x4a4] sm:$0xf0] }
 0x2cd   :  { %2235 = vst.msk [vmem:[%s7697_s14] sm:$0x3] %vm2234_vm3, %v2232_v26  ;;  %v6393_v26 = vor.u32 %v6994_v22, %v6390_v24  ;;  %v6326_v59 = vld [vmem:[#allocation5 + $0x6a0] sm:$0xf0] }
 0x2ce   :  { %2229 = vst.msk [vmem:[#allocation8] sm:$0x3] %vm2223_vm0, %v2227_v27  ;;  %v6786_v27 = vld [vmem:[#allocation5 + $0x84] sm:$0xf]  ;;  %v6329_v60 = vor.u32 %v6978_v57, %v6326_v59  ;;  %v6951_v59 = vld [vmem:[#allocation5 + $0x5a4] sm:$0xf0] }
 0x2cf   :  { %v5561_v30 = vor.u32 %v6786_v27, %v5558_v28  ;;  %v6834_v63 = vld [vmem:[#allocation5 + $0x204] sm:$0xf]  ;;  %v5692_v27 = vld [vmem:[#allocation5 + $0x188] sm:$0xf]  ;;  %4443 = dma.vmem_to_hbm [thread:$0]  %s4439_s17, 32, %s4441_s4, [#allocation9]  }
 0x2d0   :  { %v2333_v52 = vld.sshfl [vmem:[#allocation1] sm:$0xff pattern:$0x73625140]  ;;  %v5750_v33 = vld [vmem:[#allocation5 + $0x220] sm:$0xf0] }
 0x2d1   :  { %5486 = vmatmul.msk.f32.vlgmr.msrb.gmra.mxu0 %vm2334_vm4, %v2333_v52  ;;  %5487 = vmatmul.msk.f32.vlgmr.msrb.gmra.mxu1 %vm2334_vm4, %v2333_v52  ;;  %v5753_v1 = vor.u32 %v6834_v63, %v5750_v33  ;;  %v6970_v3 = vld [vmem:[#allocation5 + $0x644] sm:$0xf]  ;;  %v6823_v28 = vld [vmem:[#allocation5 + $0x1a4] sm:$0xf0] }
 0x2d2   :  { %5488 = vmatmul.msk.f32.vlgmr.msrb.gmra.mxu2 %vm2334_vm4, %v2333_v52  ;;  %5489 = vmatmul.msk.f32.vlgmr.msrb.gmra.mxu3 %vm2334_vm4, %v2333_v52  ;;  %v6842_v52 = vld [vmem:[#allocation5 + $0x244] sm:$0xf]  ;;  %v7015_v63 = vld [vmem:[#allocation5 + $0x7a4] sm:$0xf0] }
 0x2d3   :  { %4031 = vmatpush.bf16.msrb.mxu0 %v5721_v53  ;;  %4044 = vmatpush.bf16.msrb.mxu1 %v5977_v54  ;;  %v5782_v53 = vld [vmem:[#allocation5 + $0x260] sm:$0xf0]  ;;  %v6807_v33 = vld [vmem:[#allocation5 + $0x124] sm:$0xf0] }
 0x2d4   :  { %4057 = vmatpush.bf16.msrb.mxu2 %v6233_v61  ;;  %4070 = vmatpush.bf16.msrb.mxu3 %v6489_v62  ;;  %v5785_v54 = vor.u32 %v6842_v52, %v5782_v53  ;;  %v6770_v61 = vld [vmem:[#allocation5 + $0x4] sm:$0xf]  ;;  %v6237_v53 = vor.u32 %v6959_v43, %v6236_v39  ;;  %v6076_v43 = vld [vmem:[#allocation5 + $0x488] sm:$0xf] }
 0x2d5   :  { %v5494_v62 = vld [vmem:[#allocation5 + $0x20] sm:$0xf0] }
 0x2d6   :  { %v5497_v0 = vor.u32 %v6770_v61, %v5494_v62  ;;  %v6294_v4 = vld [vmem:[#allocation5 + $0x660] sm:$0xf0] }
 0x2d7   :  { %4032 = vmatpush.bf16.msrb.mxu0 %v5689_v50  ;;  %4045 = vmatpush.bf16.msrb.mxu1 %v5945_v2  ;;  %v6906_v50 = vld [vmem:[#allocation5 + $0x444] sm:$0xf]  ;;  %v6297_v34 = vor.u32 %v6970_v3, %v6294_v4 }
 0x2d8   :  { %4058 = vmatpush.bf16.msrb.mxu2 %v6201_v41  ;;  %4071 = vmatpush.bf16.msrb.mxu3 %v6457_v42  ;;  %v6038_v2 = vld [vmem:[#allocation5 + $0x460] sm:$0xf0] }
 0x2d9   :  { %v6041_v5 = vor.u32 %v6906_v50, %v6038_v2  ;;  %v6898_v41 = vld [vmem:[#allocation5 + $0x404] sm:$0xf]  ;;  %v6871_v50 = vld [vmem:[#allocation5 + $0x324] sm:$0xf0] }
 0x2da   :  { %v6006_v42 = vld [vmem:[#allocation5 + $0x420] sm:$0xf0] }
 0x2db   :  { %4033 = vmatpush.bf16.msrb.mxu0 %v5657_v12  ;;  %4046 = vmatpush.bf16.msrb.mxu1 %v5913_v25  ;;  %v6009_v7 = vor.u32 %v6898_v41, %v6006_v42  ;;  %v2318_v12 = vld [vmem:[%s7689_s6] sm:$0xf]  ;;  %v6428_v42 = vld [vmem:[#allocation5 + $0x748] sm:$0xf] }
 0x2dc   :  { %4059 = vmatpush.bf16.msrb.mxu2 %v6169_v37  ;;  %4072 = vmatpush.bf16.msrb.mxu3 %v6425_v15  ;;  %v2320_v25 = vperm.slane %v2318_v12, 0  ;;  %v2321_v6 = vperm.slane %v2318_v12, 1  ;;  %v2322_v15 = vperm.slane %v2318_v12, 2 }
 0x2df   :  { %4034 = vmatpush.bf16.msrb.mxu0 %v5625_v40  ;;  %4047 = vmatpush.bf16.msrb.mxu1 %v5881_v32  ;;  %v2323_v40 = vperm.slane %v2318_v12, 3  ;;  %v5724_v32 = vld [vmem:[#allocation5 + $0x1c8] sm:$0xf] }
 0x2e0   :  { %4060 = vmatpush.bf16.msrb.mxu2 %v6137_v23  ;;  %4073 = vmatpush.bf16.msrb.mxu3 %v6393_v26  ;;  %v5725_v22 = vor.u32 %v6831_v38, %v5724_v32  ;;  %v6863_v12 = vld [vmem:[#allocation5 + $0x2e4] sm:$0xf0] }
 0x2e1   :  { %v5564_v32 = vld [vmem:[#allocation5 + $0x88] sm:$0xf] }
 0x2e2   :  { %v6791_v38 = vld [vmem:[#allocation5 + $0xa4] sm:$0xf0] }
 0x2e3   :  { %4035 = vmatpush.bf16.msrb.mxu0 %v5593_v19  ;;  %4048 = vmatpush.bf16.msrb.mxu1 %v5849_v35  ;;  %v6895_v19 = vld [vmem:[#allocation5 + $0x3e4] sm:$0xf0] }
 0x2e4   :  { %4061 = vmatpush.bf16.msrb.mxu2 %v6105_v45  ;;  %4074 = vmatpush.bf16.msrb.mxu3 %v6361_v47  ;;  %v5981_v26 = vor.u32 %v6895_v19, %v5980_v18  ;;  %v5660_v47 = vld [vmem:[#allocation5 + $0x148] sm:$0xf] }
 0x2e5   :  { %v5661_v57 = vor.u32 %v6815_v48, %v5660_v47  ;;  %v6983_v48 = vld [vmem:[#allocation5 + $0x6a4] sm:$0xf0] }
 0x2e7   :  { %4036 = vmatpush.bf16.msrb.mxu0 %v5561_v30  ;;  %4049 = vmatpush.bf16.msrb.mxu1 %v5817_v36  ;;  %v5948_v30 = vld [vmem:[#allocation5 + $0x388] sm:$0xf]  ;;  %v5693_v36 = vor.u32 %v6823_v28, %v5692_v27 }
 0x2e8   :  { %4062 = vmatpush.bf16.msrb.mxu2 %v6073_v58  ;;  %4075 = vmatpush.bf16.msrb.mxu3 %v6329_v60  ;;  %v5949_v45 = vor.u32 %v6887_v31, %v5948_v30  ;;  %v6204_v58 = vld [vmem:[#allocation5 + $0x588] sm:$0xf] }
 0x2e9   :  { %v6460_v60 = vld [vmem:[#allocation5 + $0x788] sm:$0xf]  ;;  %v6205_v2 = vor.u32 %v6951_v59, %v6204_v58  ;;  %v6891_v58 = vld [vmem:[#allocation5 + $0x3cc] sm:$0xf] }
 0x2ea   :  { %v6461_v3 = vor.u32 %v7015_v63, %v6460_v60  ;;  %v5532_v27 = vld [vmem:[#allocation5 + $0x48] sm:$0xf]  ;;  %v5982_v59 = vld [vmem:[#allocation5 + $0x3e8] sm:$0xf0] }
 0x2eb   :  { %4037 = vmatpush.bf16.msrb.mxu0 %v5529_v51  ;;  %4050 = vmatpush.bf16.msrb.mxu1 %v5785_v54  ;;  %v6879_v51 = vld [vmem:[#allocation5 + $0x364] sm:$0xf0] }
 0x2ec   :  { %4063 = vmatpush.bf16.msrb.mxu2 %v6041_v5  ;;  %4076 = vmatpush.bf16.msrb.mxu3 %v6297_v34  ;;  %v5917_v62 = vor.u32 %v6879_v51, %v5916_v49  ;;  %v6172_v5 = vld [vmem:[#allocation5 + $0x548] sm:$0xf] }
 0x2ed   :  { %v6943_v34 = vld [vmem:[#allocation5 + $0x564] sm:$0xf0] }
 0x2ee   :  { %v6783_v28 = vld [vmem:[#allocation5 + $0x64] sm:$0xf0] }
 0x2ef   :  { %4038 = vmatpush.bf16.msrb.mxu0 %v5497_v0  ;;  %4051 = vmatpush.bf16.msrb.mxu1 %v5753_v1  ;;  %v5628_v0 = vld [vmem:[#allocation5 + $0x108] sm:$0xf]  ;;  %v5533_v46 = vor.u32 %v6783_v28, %v5532_v27  ;;  %v6803_v27 = vld [vmem:[#allocation5 + $0x10c] sm:$0xf] }
 0x2f0   :  { %4064 = vmatpush.bf16.msrb.mxu2 %v6009_v7  ;;  %4077 = vmatpush.bf16.msrb.mxu3 %v6265_v10  ;;  %v5884_v1 = vld [vmem:[#allocation5 + $0x308] sm:$0xf]  ;;  %v5629_v4 = vor.u32 %v6807_v33, %v5628_v0  ;;  %v5630_v28 = vld [vmem:[#allocation5 + $0x128] sm:$0xf0] }
 0x2f1   :  { %v5885_v41 = vor.u32 %v6871_v50, %v5884_v1  ;;  %v7007_v7 = vld [vmem:[#allocation5 + $0x764] sm:$0xf0] }
 0x2f2   :  { %v5852_v10 = vld [vmem:[#allocation5 + $0x2c8] sm:$0xf] }
 0x2f3   :  { %v5788_v30 = vld [vmem:[#allocation5 + $0x248] sm:$0xf] }
 0x2f4   :  { %v6847_v31 = vld [vmem:[#allocation5 + $0x264] sm:$0xf0] }
 0x2f5   :  { %v5789_v47 = vor.u32 %v6847_v31, %v5788_v30  ;;  %v5500_v49 = vld [vmem:[#allocation5 + $0x8] sm:$0xf]  ;;  %v6867_v30 = vld [vmem:[#allocation5 + $0x30c] sm:$0xf] }
 0x2f6   :  { %v6775_v51 = vld [vmem:[#allocation5 + $0x24] sm:$0xf0]  ;;  %v5886_v31 = vld [vmem:[#allocation5 + $0x328] sm:$0xf0] }
 0x2f7   :  { %v6911_v63 = vld [vmem:[#allocation5 + $0x464] sm:$0xf0]  ;;  %v5501_v0 = vor.u32 %v6775_v51, %v5500_v49  ;;  %v6795_v49 = vld [vmem:[#allocation5 + $0xcc] sm:$0xf] }
 0x2f8   :  { %v6300_v1 = vld [vmem:[#allocation5 + $0x648] sm:$0xf]  ;;  %v5598_v51 = vld [vmem:[#allocation5 + $0xe8] sm:$0xf0] }
 0x2f9   :  { %v6975_v50 = vld [vmem:[#allocation5 + $0x664] sm:$0xf0] }
 0x34e   :  { %v2354_v11 = vpop.f32.mrf.mxu0  ;;  %v2374_v13 = vpop.f32.mrf.mxu1 }
 0x34f   :  { %v2355_v14 = vadd.f32 %v2354_v11, %v2320_v25  ;;  %v2375_v37 = vadd.f32 %v2374_v13, %v2321_v6  ;;  %v6173_v25 = vor.u32 %v6943_v34, %v6172_v5  ;;  %v6429_v6 = vor.u32 %v7007_v7, %v6428_v42  ;;  %v6140_v11 = vld [vmem:[#allocation5 + $0x508] sm:$0xf]  ;;  %v5694_v34 = vld [vmem:[#allocation5 + $0x1a8] sm:$0xf0] }
 0x350   :  { %v6935_v13 = vld [vmem:[#allocation5 + $0x524] sm:$0xf0]  ;;  %v5950_v42 = vld [vmem:[#allocation5 + $0x3a8] sm:$0xf0]  ;;  %v6301_v7 = vor.u32 %v6975_v50, %v6300_v1 }
 0x351   :  { %7056 = vtanh.f32 %v2355_v14  ;;  %v5597_v14 = vor.u32 %v6799_v9, %v5596_v8  ;;  %v6141_v18 = vor.u32 %v6935_v13, %v6140_v11  ;;  %v6012_v8 = vld [vmem:[#allocation5 + $0x408] sm:$0xf]  ;;  %v6851_v1 = vld [vmem:[#allocation5 + $0x28c] sm:$0xf] }
 0x352   :  { %7058 = vtanh.f32 %v2375_v37  ;;  %v5853_v37 = vor.u32 %v6863_v12, %v5852_v10  ;;  %v6903_v9 = vld [vmem:[#allocation5 + $0x424] sm:$0xf0]  ;;  %v5822_v50 = vld [vmem:[#allocation5 + $0x2a8] sm:$0xf0] }
 0x353   :  { %v6268_v10 = vld [vmem:[#allocation5 + $0x608] sm:$0xf] }
 0x354   :  { %v6967_v12 = vld [vmem:[#allocation5 + $0x624] sm:$0xf0] }
 0x355   :  { %v2394_v16 = vpop.f32.mrf.mxu2  ;;  %v2414_v17 = vpop.f32.mrf.mxu3 }
 0x356   :  { %v2395_v35 = vadd.f32 %v2394_v16, %v2322_v15  ;;  %v2415_v20 = vadd.f32 %v2414_v17, %v2323_v40  ;;  %v6396_v15 = vld [vmem:[#allocation5 + $0x708] sm:$0xf] }
 0x357   :  { %v7057_v21 = vpop.eup %7056  ;;  %v6999_v40 = vld [vmem:[#allocation5 + $0x724] sm:$0xf0] }
 0x358   :  { %v7059_v23 = vpop.eup %7058  ;;  %v7590_v24 = vpack.c.bf16 %v7057_v21, %v7057_v21  ;;  %7060 = vtanh.f32 %v2395_v35  ;;  %v5820_v16 = vld [vmem:[#allocation5 + $0x288] sm:$0xf]  ;;  %v6397_v19 = vor.u32 %v6999_v40, %v6396_v15  ;;  %v5565_v21 = vor.u32 %v6791_v38, %v5564_v32  ;;  %v6811_v15 = vld [vmem:[#allocation5 + $0x14c] sm:$0xf] }
 0x359   :  { %v7592_v29 = vpack.c.bf16 %v7059_v23, %v7059_v23  ;;  %7062 = vtanh.f32 %v2415_v20  ;;  %v6855_v17 = vld [vmem:[#allocation5 + $0x2a4] sm:$0xf0]  ;;  %v6013_v40 = vor.u32 %v6903_v9, %v6012_v8  ;;  %v5662_v32 = vld [vmem:[#allocation5 + $0x168] sm:$0xf0] }
 0x35a   :  { %3987 = vmatmul.bf16.vlgmr.msra.gmra.mxu0 %v7590_v24  ;;  %v6108_v35 = vld [vmem:[#allocation5 + $0x4c8] sm:$0xf]  ;;  %v6875_v38 = vld [vmem:[#allocation5 + $0x34c] sm:$0xf] }
 0x35b   :  { %4000 = vmatmul.bf16.vlgmr.msra.gmra.mxu1 %v7592_v29  ;;  %4083 = vmatpush.bf16.msra.mxu0 %v5725_v22  ;;  %v6927_v20 = vld [vmem:[#allocation5 + $0x4e4] sm:$0xf0]  ;;  %v5821_v22 = vor.u32 %v6855_v17, %v5820_v16  ;;  %v5918_v16 = vld [vmem:[#allocation5 + $0x368] sm:$0xf0]  ;;  %v6269_v17 = vor.u32 %v6967_v12, %v6268_v10 }
 0x35c   :  { %4096 = vmatpush.bf16.msra.mxu1 %v5981_v26  ;;  %v6364_v23 = vld [vmem:[#allocation5 + $0x6c8] sm:$0xf]  ;;  %v6779_v8 = vld [vmem:[#allocation5 + $0x4c] sm:$0xf] }
 0x35d   :  { %v6991_v26 = vld [vmem:[#allocation5 + $0x6e4] sm:$0xf0]  ;;  %v5534_v9 = vld [vmem:[#allocation5 + $0x68] sm:$0xf0] }
 0x35e   :  { %v7061_v52 = vpop.eup %7060  ;;  %v6365_v39 = vor.u32 %v6991_v26, %v6364_v23  ;;  %v7011_v23 = vld [vmem:[#allocation5 + $0x78c] sm:$0xf] }
 0x35f   :  { %v7063_v54 = vpop.eup %7062  ;;  %v7596_v55 = vpack.c.bf16 %v7061_v52, %v7061_v52  ;;  %4084 = vmatpush.bf16.msra.mxu0 %v5693_v36  ;;  %v6109_v36 = vor.u32 %v6927_v20, %v6108_v35  ;;  %v5756_v52 = vld [vmem:[#allocation5 + $0x208] sm:$0xf]  ;;  %v6947_v35 = vld [vmem:[#allocation5 + $0x58c] sm:$0xf] }
 0x360   :  { %v7598_v61 = vpack.c.bf16 %v7063_v54, %v7063_v54  ;;  %4097 = vmatpush.bf16.msra.mxu1 %v5949_v45  ;;  %v6332_v45 = vld [vmem:[#allocation5 + $0x688] sm:$0xf]  ;;  %v6827_v54 = vld [vmem:[#allocation5 + $0x1cc] sm:$0xf] }
 0x361   :  { %4013 = vmatmul.bf16.vlgmr.msra.gmra.mxu2 %v7596_v55  ;;  %v6333_v60 = vor.u32 %v6983_v48, %v6332_v45  ;;  %v6206_v20 = vld [vmem:[#allocation5 + $0x5a8] sm:$0xf0]  ;;  %v5633_v45 = vor.u32 %v6803_v27, %v5630_v28 }
 0x362   :  { %4026 = vmatmul.bf16.vlgmr.msra.gmra.mxu3 %v7598_v61  ;;  %4109 = vmatpush.bf16.msra.mxu2 %v6237_v53  ;;  %v6839_v53 = vld [vmem:[#allocation5 + $0x224] sm:$0xf0]  ;;  %v6462_v26 = vld [vmem:[#allocation5 + $0x7a8] sm:$0xf0] }
 0x363   :  { %4122 = vmatpush.bf16.msra.mxu3 %v6493_v56  ;;  %4085 = vmatpush.bf16.msra.mxu0 %v5661_v57  ;;  %v6077_v56 = vor.u32 %v6919_v44, %v6076_v43  ;;  %v5726_v57 = vld [vmem:[#allocation5 + $0x1e8] sm:$0xf0]  ;;  %v5757_v33 = vor.u32 %v6839_v53, %v5756_v52 }
 0x364   :  { %4098 = vmatpush.bf16.msra.mxu1 %v5917_v62  ;;  %v6044_v62 = vld [vmem:[#allocation5 + $0x448] sm:$0xf]  ;;  %v6939_v43 = vld [vmem:[#allocation5 + $0x54c] sm:$0xf] }
 0x365   :  { %v6045_v5 = vor.u32 %v6911_v63, %v6044_v62  ;;  %v6174_v44 = vld [vmem:[#allocation5 + $0x568] sm:$0xf0] }
 0x366   :  { %4110 = vmatpush.bf16.msra.mxu2 %v6205_v2  ;;  %v5729_v2 = vor.u32 %v6827_v54, %v5726_v57  ;;  %v6430_v48 = vld [vmem:[#allocation5 + $0x768] sm:$0xf0]  ;;  %v6177_v54 = vor.u32 %v6939_v43, %v6174_v44  ;;  %v5700_v43 = vld [vmem:[#allocation5 + $0x190] sm:$0xf] }
 0x367   :  { %4123 = vmatpush.bf16.msra.mxu3 %v6461_v3  ;;  %4086 = vmatpush.bf16.msra.mxu0 %v5629_v4  ;;  %v5985_v3 = vor.u32 %v6891_v58, %v5982_v59  ;;  %v6819_v4 = vld [vmem:[#allocation5 + $0x18c] sm:$0xf]  ;;  %v5601_v59 = vor.u32 %v6795_v49, %v5598_v51 }
 0x368   :  { %4099 = vmatpush.bf16.msra.mxu1 %v5885_v41  ;;  %v6883_v41 = vld [vmem:[#allocation5 + $0x38c] sm:$0xf]  ;;  %v5697_v11 = vor.u32 %v6819_v4, %v5694_v34 }
 0x369   :  { %v5953_v13 = vor.u32 %v6883_v41, %v5950_v42  ;;  %v6859_v52 = vld [vmem:[#allocation5 + $0x2cc] sm:$0xf]  ;;  %v5825_v41 = vor.u32 %v6851_v1, %v5822_v50  ;;  %v5924_v50 = vld [vmem:[#allocation5 + $0x350] sm:$0xf] }
 0x36a   :  { %4111 = vmatpush.bf16.msra.mxu2 %v6173_v25  ;;  %4039 = vmatmul.bf16.vlgmr.msrb.gmra.mxu0 %v7590_v24  ;;  %v6955_v25 = vld [vmem:[#allocation5 + $0x5cc] sm:$0xf] }
 0x36b   :  { %4124 = vmatpush.bf16.msra.mxu3 %v6429_v6  ;;  %4052 = vmatmul.bf16.vlgmr.msrb.gmra.mxu1 %v7592_v29  ;;  %v6238_v6 = vld [vmem:[#allocation5 + $0x5e8] sm:$0xf0] }
 0x36c   :  { %4087 = vmatpush.bf16.msra.mxu0 %v5597_v14  ;;  %4100 = vmatpush.bf16.msra.mxu1 %v5853_v37  ;;  %v7019_v14 = vld [vmem:[#allocation5 + $0x7cc] sm:$0xf] }
 0x36d   :  { %v6494_v37 = vld [vmem:[#allocation5 + $0x7e8] sm:$0xf0] }
 0x36e   :  { %4112 = vmatpush.bf16.msra.mxu2 %v6141_v18  ;;  %v6241_v18 = vor.u32 %v6955_v25, %v6238_v6  ;;  %v5854_v53 = vld [vmem:[#allocation5 + $0x2e8] sm:$0xf0] }
 0x36f   :  { %4125 = vmatpush.bf16.msra.mxu3 %v6397_v19  ;;  %v6497_v19 = vor.u32 %v7019_v14, %v6494_v37  ;;  %v6931_v57 = vld [vmem:[#allocation5 + $0x50c] sm:$0xf]  ;;  %v5537_v37 = vor.u32 %v6779_v8, %v5534_v9  ;;  %v5636_v8 = vld [vmem:[#allocation5 + $0x110] sm:$0xf] }
 0x370   :  { %4088 = vmatpush.bf16.msra.mxu0 %v5565_v21  ;;  %4101 = vmatpush.bf16.msra.mxu1 %v5821_v22  ;;  %v5665_v21 = vor.u32 %v6811_v15, %v5662_v32  ;;  %v5921_v22 = vor.u32 %v6875_v38, %v5918_v16  ;;  %v6142_v58 = vld [vmem:[#allocation5 + $0x528] sm:$0xf0]  ;;  %v6808_v9 = vld [vmem:[#allocation5 + $0x12c] sm:$0xf0] }
 0x371   :  { %4065 = vmatmul.bf16.vlgmr.msrb.gmra.mxu2 %v7596_v55  ;;  %v6995_v62 = vld [vmem:[#allocation5 + $0x70c] sm:$0xf] }
 0x372   :  { %4078 = vmatmul.bf16.vlgmr.msrb.gmra.mxu3 %v7598_v61  ;;  %4113 = vmatpush.bf16.msra.mxu2 %v6109_v36  ;;  %v6209_v36 = vor.u32 %v6947_v35, %v6206_v20  ;;  %v6398_v63 = vld [vmem:[#allocation5 + $0x728] sm:$0xf0]  ;;  %v6832_v35 = vld [vmem:[#allocation5 + $0x1ec] sm:$0xf0] }
 0x373   :  { %4126 = vmatpush.bf16.msra.mxu3 %v6365_v39  ;;  %v6465_v39 = vor.u32 %v7011_v23, %v6462_v26  ;;  %v6923_v4 = vld [vmem:[#allocation5 + $0x4cc] sm:$0xf]  ;;  %v5988_v20 = vld [vmem:[#allocation5 + $0x3d0] sm:$0xf] }
 0x374   :  { %4089 = vmatpush.bf16.msra.mxu0 %v5533_v46  ;;  %4102 = vmatpush.bf16.msra.mxu1 %v5789_v47  ;;  %v5889_v46 = vor.u32 %v6867_v30, %v5886_v31  ;;  %v7003_v47 = vld [vmem:[#allocation5 + $0x74c] sm:$0xf] }
 0x375   :  { %v6987_v42 = vld [vmem:[#allocation5 + $0x6cc] sm:$0xf] }
 0x376   :  { %4114 = vmatpush.bf16.msra.mxu2 %v6077_v56  ;;  %v6433_v56 = vor.u32 %v7003_v47, %v6430_v48  ;;  %v6843_v10 = vld [vmem:[#allocation5 + $0x24c] sm:$0xf]  ;;  %v6888_v47 = vld [vmem:[#allocation5 + $0x3ac] sm:$0xf0] }
 0x377   :  { %4127 = vmatpush.bf16.msra.mxu3 %v6333_v60  ;;  %v5857_v60 = vor.u32 %v6859_v52, %v5854_v53  ;;  %v5790_v12 = vld [vmem:[#allocation5 + $0x268] sm:$0xf0] }
 0x378   :  { %4090 = vmatpush.bf16.msra.mxu0 %v5501_v0  ;;  %4103 = vmatpush.bf16.msra.mxu1 %v5757_v33  ;;  %v6787_v0 = vld [vmem:[#allocation5 + $0x8c] sm:$0xf]  ;;  %v5793_v15 = vor.u32 %v6843_v10, %v5790_v12  ;;  %v5892_v12 = vld [vmem:[#allocation5 + $0x310] sm:$0xf] }
 0x379   :  { %v5566_v33 = vld [vmem:[#allocation5 + $0xa8] sm:$0xf0] }
 0x37a   :  { %4115 = vmatpush.bf16.msra.mxu2 %v6045_v5  ;;  %v6110_v5 = vld [vmem:[#allocation5 + $0x4e8] sm:$0xf0]  ;;  %v5569_v34 = vor.u32 %v6787_v0, %v5566_v33  ;;  %v6816_v0 = vld [vmem:[#allocation5 + $0x16c] sm:$0xf0] }
 0x37b   :  { %4128 = vmatpush.bf16.msra.mxu3 %v6301_v7  ;;  %4091 = vmatmul.bf16.vlgmr.msra.gmra.mxu0 %v7590_v24  ;;  %v6366_v7 = vld [vmem:[#allocation5 + $0x6e8] sm:$0xf0]  ;;  %v6113_v25 = vor.u32 %v6923_v4, %v6110_v5  ;;  %v6212_v4 = vld [vmem:[#allocation5 + $0x590] sm:$0xf] }
 0x37c   :  { %4135 = vmatpush.bf16.msrb.mxu0 %v5729_v2  ;;  %4148 = vmatpush.bf16.msrb.mxu1 %v5985_v3  ;;  %v6145_v2 = vor.u32 %v6931_v57, %v6142_v58  ;;  %v6401_v3 = vor.u32 %v6995_v62, %v6398_v63  ;;  %v6369_v6 = vor.u32 %v6987_v42, %v6366_v7  ;;  %v6979_v14 = vld [vmem:[#allocation5 + $0x68c] sm:$0xf]  ;;  %v5668_v63 = vld [vmem:[#allocation5 + $0x150] sm:$0xf] }
 0x37d   :  { %4104 = vmatmul.bf16.vlgmr.msra.gmra.mxu1 %v7592_v29  ;;  %v6771_v32 = vld [vmem:[#allocation5 + $0xc] sm:$0xf]  ;;  %v6952_v5 = vld [vmem:[#allocation5 + $0x5ac] sm:$0xf0] }
 0x37e   :  { %4116 = vmatpush.bf16.msra.mxu2 %v6013_v40  ;;  %v6334_v40 = vld [vmem:[#allocation5 + $0x6a8] sm:$0xf0]  ;;  %v7016_v42 = vld [vmem:[#allocation5 + $0x7ac] sm:$0xf0]  ;;  %v6213_v10 = vor.u32 %v6952_v5, %v6212_v4  ;;  %v5734_v4 = vld [vmem:[#allocation5 + $0x1f0] sm:$0xf0] }
 0x37f   :  { %4129 = vmatpush.bf16.msra.mxu3 %v6269_v17  ;;  %v5502_v38 = vld [vmem:[#allocation5 + $0x28] sm:$0xf0]  ;;  %v6892_v5 = vld [vmem:[#allocation5 + $0x3d4] sm:$0xf] }
 0x380   :  { %4136 = vmatpush.bf16.msrb.mxu0 %v5697_v11  ;;  %4149 = vmatpush.bf16.msrb.mxu1 %v5953_v13  ;;  %v6915_v11 = vld [vmem:[#allocation5 + $0x48c] sm:$0xf]  ;;  %v5505_v27 = vor.u32 %v6771_v32, %v5502_v38  ;;  %v5604_v32 = vld [vmem:[#allocation5 + $0xd0] sm:$0xf] }
 0x381   :  { %4117 = vmatmul.bf16.vlgmr.msra.gmra.mxu2 %v7596_v55  ;;  %v6078_v13 = vld [vmem:[#allocation5 + $0x4a8] sm:$0xf0]  ;;  %v6800_v38 = vld [vmem:[#allocation5 + $0xec] sm:$0xf0] }
 0x382   :  { %4161 = vmatpush.bf16.msrb.mxu2 %v6241_v18  ;;  %4130 = vmatmul.bf16.vlgmr.msra.gmra.mxu3 %v7598_v61  ;;  %v6835_v16 = vld [vmem:[#allocation5 + $0x20c] sm:$0xf]  ;;  %v5732_v18 = vld [vmem:[#allocation5 + $0x1d0] sm:$0xf] }
 0x383   :  { %4174 = vmatpush.bf16.msrb.mxu3 %v6497_v19  ;;  %v5758_v17 = vld [vmem:[#allocation5 + $0x228] sm:$0xf0]  ;;  %v6081_v19 = vor.u32 %v6915_v11, %v6078_v13  ;;  %v6180_v11 = vld [vmem:[#allocation5 + $0x550] sm:$0xf] }
 0x384   :  { %4137 = vmatpush.bf16.msrb.mxu0 %v5665_v21  ;;  %4150 = vmatpush.bf16.msrb.mxu1 %v5921_v22  ;;  %v6896_v21 = vld [vmem:[#allocation5 + $0x3ec] sm:$0xf0]  ;;  %v6337_v22 = vor.u32 %v6979_v14, %v6334_v40  ;;  %v6907_v23 = vld [vmem:[#allocation5 + $0x44c] sm:$0xf]  ;;  %v5761_v28 = vor.u32 %v6835_v16, %v5758_v17  ;;  %v5637_v14 = vor.u32 %v6808_v9, %v5636_v8 }
 0x385   :  { %v6046_v26 = vld [vmem:[#allocation5 + $0x468] sm:$0xf0]  ;;  %v6944_v13 = vld [vmem:[#allocation5 + $0x56c] sm:$0xf0] }
 0x386   :  { %4162 = vmatpush.bf16.msrb.mxu2 %v6209_v36  ;;  %v6971_v30 = vld [vmem:[#allocation5 + $0x64c] sm:$0xf]  ;;  %v5733_v36 = vor.u32 %v6832_v35, %v5732_v18  ;;  %v6049_v44 = vor.u32 %v6907_v23, %v6046_v26  ;;  %v6181_v16 = vor.u32 %v6944_v13, %v6180_v11  ;;  %v5860_v17 = vld [vmem:[#allocation5 + $0x2d0] sm:$0xf] }
 0x387   :  { %4175 = vmatpush.bf16.msrb.mxu3 %v6465_v39  ;;  %v6302_v31 = vld [vmem:[#allocation5 + $0x668] sm:$0xf0]  ;;  %v5989_v39 = vor.u32 %v6896_v21, %v5988_v20  ;;  %v6864_v18 = vld [vmem:[#allocation5 + $0x2ec] sm:$0xf0]  ;;  %v5605_v21 = vor.u32 %v6800_v38, %v5604_v32 }
 0x388   :  { %4138 = vmatpush.bf16.msrb.mxu0 %v5633_v45  ;;  %4151 = vmatpush.bf16.msrb.mxu1 %v5889_v46  ;;  %v6824_v45 = vld [vmem:[#allocation5 + $0x1ac] sm:$0xf0]  ;;  %v6305_v48 = vor.u32 %v6971_v30, %v6302_v31  ;;  %v6899_v49 = vld [vmem:[#allocation5 + $0x40c] sm:$0xf]  ;;  %v5861_v26 = vor.u32 %v6864_v18, %v5860_v17  ;;  %v6956_v18 = vld [vmem:[#allocation5 + $0x5d4] sm:$0xf] }
 0x389   :  { %v5956_v46 = vld [vmem:[#allocation5 + $0x390] sm:$0xf]  ;;  %v6014_v51 = vld [vmem:[#allocation5 + $0x428] sm:$0xf0]  ;;  %v5701_v57 = vor.u32 %v6824_v45, %v5700_v43 }
 0x38a   :  { %4163 = vmatpush.bf16.msrb.mxu2 %v6177_v54  ;;  %v6963_v52 = vld [vmem:[#allocation5 + $0x60c] sm:$0xf]  ;;  %v6244_v54 = vld [vmem:[#allocation5 + $0x5d0] sm:$0xf]  ;;  %v5957_v58 = vor.u32 %v6888_v47, %v5956_v46  ;;  %v6017_v62 = vor.u32 %v6899_v49, %v6014_v51 }
 0x38b   :  { %4176 = vmatpush.bf16.msrb.mxu3 %v6433_v56  ;;  %v6270_v53 = vld [vmem:[#allocation5 + $0x628] sm:$0xf0]  ;;  %v6960_v56 = vld [vmem:[#allocation5 + $0x5ec] sm:$0xf0] }
 0x38c   :  { %4139 = vmatpush.bf16.msrb.mxu0 %v5601_v59  ;;  %4152 = vmatpush.bf16.msrb.mxu1 %v5857_v60  ;;  %v6500_v59 = vld [vmem:[#allocation5 + $0x7d0] sm:$0xf]  ;;  %v6273_v33 = vor.u32 %v6963_v52, %v6270_v53  ;;  %v6245_v1 = vor.u32 %v6960_v56, %v6244_v54 }
 0x38d   :  { %v7024_v60 = vld [vmem:[#allocation5 + $0x7ec] sm:$0xf0] }
 0x38e   :  { %4164 = vmatpush.bf16.msrb.mxu2 %v6145_v2  ;;  %v6880_v2 = vld [vmem:[#allocation5 + $0x36c] sm:$0xf0] }
 0x38f   :  { %4177 = vmatpush.bf16.msrb.mxu3 %v6401_v3  ;;  %v6501_v3 = vor.u32 %v7024_v60, %v6500_v59  ;;  %v5925_v7 = vor.u32 %v6880_v2, %v5924_v50  ;;  %v6148_v35 = vld [vmem:[#allocation5 + $0x510] sm:$0xf] }
 0x390   :  { %4140 = vmatpush.bf16.msrb.mxu0 %v5569_v34  ;;  %4153 = vmatpush.bf16.msrb.mxu1 %v5825_v41  ;;  %v5669_v34 = vor.u32 %v6816_v0, %v5668_v63  ;;  %v6468_v41 = vld [vmem:[#allocation5 + $0x790] sm:$0xf] }
 0x391   :  { %v6936_v20 = vld [vmem:[#allocation5 + $0x52c] sm:$0xf0] }
 0x392   :  { %4165 = vmatpush.bf16.msrb.mxu2 %v6113_v25  ;;  %v6872_v25 = vld [vmem:[#allocation5 + $0x32c] sm:$0xf0]  ;;  %v6149_v30 = vor.u32 %v6936_v20, %v6148_v35  ;;  %v7020_v20 = vld [vmem:[#allocation5 + $0x7d4] sm:$0xf] }
 0x393   :  { %4178 = vmatpush.bf16.msrb.mxu3 %v6369_v6  ;;  %v6469_v6 = vor.u32 %v7016_v42, %v6468_v41  ;;  %v5893_v40 = vor.u32 %v6872_v25, %v5892_v12  ;;  %v7000_v23 = vld [vmem:[#allocation5 + $0x72c] sm:$0xf0]  ;;  %v5990_v41 = vld [vmem:[#allocation5 + $0x3f0] sm:$0xf0] }
 0x394   :  { %4141 = vmatpush.bf16.msrb.mxu0 %v5537_v37  ;;  %4154 = vmatpush.bf16.msrb.mxu1 %v5793_v15  ;;  %v6436_v37 = vld [vmem:[#allocation5 + $0x750] sm:$0xf]  ;;  %v5993_v11 = vor.u32 %v6892_v5, %v5990_v41  ;;  %v6150_v5 = vld [vmem:[#allocation5 + $0x530] sm:$0xf0] }
 0x395   :  { %v7008_v15 = vld [vmem:[#allocation5 + $0x76c] sm:$0xf0]  ;;  %v6996_v41 = vld [vmem:[#allocation5 + $0x714] sm:$0xf] }
 0x396   :  { %4166 = vmatpush.bf16.msrb.mxu2 %v6081_v19  ;;  %v6437_v19 = vor.u32 %v7008_v15, %v6436_v37  ;;  %v5828_v31 = vld [vmem:[#allocation5 + $0x290] sm:$0xf]  ;;  %v6884_v37 = vld [vmem:[#allocation5 + $0x394] sm:$0xf] }
 0x397   :  { %4179 = vmatpush.bf16.msrb.mxu3 %v6337_v22  ;;  %v6404_v22 = vld [vmem:[#allocation5 + $0x710] sm:$0xf]  ;;  %v5958_v15 = vld [vmem:[#allocation5 + $0x3b0] sm:$0xf0] }
 0x398   :  { %4142 = vmatpush.bf16.msrb.mxu0 %v5505_v27  ;;  %4155 = vmatpush.bf16.msrb.mxu1 %v5761_v28  ;;  %v5572_v27 = vld [vmem:[#allocation5 + $0x90] sm:$0xf] }
 0x399   :  { %v6792_v28 = vld [vmem:[#allocation5 + $0xac] sm:$0xf0] }
 0x39a   :  { %4167 = vmatpush.bf16.msrb.mxu2 %v6049_v44  ;;  %v6116_v43 = vld [vmem:[#allocation5 + $0x4d0] sm:$0xf]  ;;  %v5573_v45 = vor.u32 %v6792_v28, %v5572_v27  ;;  %v5670_v27 = vld [vmem:[#allocation5 + $0x170] sm:$0xf0] }
 0x39b   :  { %4180 = vmatpush.bf16.msrb.mxu3 %v6305_v48  ;;  %4143 = vmatmul.bf16.vlgmr.msrb.gmra.mxu0 %v7590_v24  ;;  %v6928_v44 = vld [vmem:[#allocation5 + $0x4ec] sm:$0xf0] }
 0x39c   :  { %4187 = vmatpush.bf16.msra.mxu0 %v5733_v36  ;;  %4200 = vmatpush.bf16.msra.mxu1 %v5989_v39  ;;  %v6856_v36 = vld [vmem:[#allocation5 + $0x2ac] sm:$0xf0]  ;;  %v6405_v39 = vor.u32 %v7000_v23, %v6404_v22  ;;  %v6117_v52 = vor.u32 %v6928_v44, %v6116_v43  ;;  %v5961_v22 = vor.u32 %v6884_v37, %v5958_v15  ;;  %v6948_v43 = vld [vmem:[#allocation5 + $0x594] sm:$0xf] }
 0x39d   :  { %4156 = vmatmul.bf16.vlgmr.msrb.gmra.mxu1 %v7592_v29  ;;  %v6372_v46 = vld [vmem:[#allocation5 + $0x6d0] sm:$0xf]  ;;  %v5829_v48 = vor.u32 %v6856_v36, %v5828_v31  ;;  %v6876_v31 = vld [vmem:[#allocation5 + $0x354] sm:$0xf] }
 0x39e   :  { %4168 = vmatpush.bf16.msrb.mxu2 %v6017_v62  ;;  %v6992_v47 = vld [vmem:[#allocation5 + $0x6ec] sm:$0xf0]  ;;  %v5926_v36 = vld [vmem:[#allocation5 + $0x370] sm:$0xf0] }
 0x39f   :  { %4181 = vmatpush.bf16.msrb.mxu3 %v6273_v33  ;;  %v5540_v49 = vld [vmem:[#allocation5 + $0x50] sm:$0xf]  ;;  %v6373_v56 = vor.u32 %v6992_v47, %v6372_v46  ;;  %v6214_v44 = vld [vmem:[#allocation5 + $0x5b0] sm:$0xf0] }
 0x3a0   :  { %4188 = vmatpush.bf16.msra.mxu0 %v5701_v57  ;;  %4201 = vmatpush.bf16.msra.mxu1 %v5957_v58  ;;  %v6784_v51 = vld [vmem:[#allocation5 + $0x6c] sm:$0xf0]  ;;  %v7012_v46 = vld [vmem:[#allocation5 + $0x794] sm:$0xf] }
 0x3a1   :  { %4169 = vmatmul.bf16.vlgmr.msrb.gmra.mxu2 %v7596_v55  ;;  %v5796_v53 = vld [vmem:[#allocation5 + $0x250] sm:$0xf]  ;;  %v5541_v59 = vor.u32 %v6784_v51, %v5540_v49  ;;  %v6470_v47 = vld [vmem:[#allocation5 + $0x7b0] sm:$0xf0] }
 0x3a2   :  { %4213 = vmatpush.bf16.msra.mxu2 %v6245_v1  ;;  %4182 = vmatmul.bf16.vlgmr.msrb.gmra.mxu3 %v7598_v61  ;;  %v6848_v54 = vld [vmem:[#allocation5 + $0x26c] sm:$0xf0]  ;;  %v6804_v49 = vld [vmem:[#allocation5 + $0x114] sm:$0xf] }
 0x3a3   :  { %4226 = vmatpush.bf16.msra.mxu3 %v6501_v3  ;;  %v6084_v57 = vld [vmem:[#allocation5 + $0x490] sm:$0xf]  ;;  %v5797_v0 = vor.u32 %v6848_v54, %v5796_v53  ;;  %v6828_v3 = vld [vmem:[#allocation5 + $0x1d4] sm:$0xf] }
 0x3a4   :  { %4189 = vmatpush.bf16.msra.mxu0 %v5669_v34  ;;  %4202 = vmatpush.bf16.msra.mxu1 %v5925_v7  ;;  %v6920_v58 = vld [vmem:[#allocation5 + $0x4ac] sm:$0xf0]  ;;  %v5737_v25 = vor.u32 %v6828_v3, %v5734_v4  ;;  %v5638_v51 = vld [vmem:[#allocation5 + $0x130] sm:$0xf0] }
 0x3a5   :  { %v6340_v60 = vld [vmem:[#allocation5 + $0x690] sm:$0xf]  ;;  %v6085_v2 = vor.u32 %v6920_v58, %v6084_v57  ;;  %v6868_v53 = vld [vmem:[#allocation5 + $0x314] sm:$0xf] }
 0x3a6   :  { %4214 = vmatpush.bf16.msra.mxu2 %v6213_v10  ;;  %v6984_v62 = vld [vmem:[#allocation5 + $0x6ac] sm:$0xf0]  ;;  %v5894_v54 = vld [vmem:[#allocation5 + $0x330] sm:$0xf0] }
 0x3a7   :  { %4227 = vmatpush.bf16.msra.mxu3 %v6469_v6  ;;  %v5508_v63 = vld [vmem:[#allocation5 + $0x10] sm:$0xf]  ;;  %v6341_v34 = vor.u32 %v6984_v62, %v6340_v60  ;;  %v6820_v6 = vld [vmem:[#allocation5 + $0x194] sm:$0xf] }
 0x3a8   :  { %4190 = vmatpush.bf16.msra.mxu0 %v5637_v14  ;;  %4203 = vmatpush.bf16.msra.mxu1 %v5893_v40  ;;  %v6776_v33 = vld [vmem:[#allocation5 + $0x2c] sm:$0xf0]  ;;  %v5702_v14 = vld [vmem:[#allocation5 + $0x1b0] sm:$0xf0] }
 0x3a9   :  { %v5764_v1 = vld [vmem:[#allocation5 + $0x210] sm:$0xf]  ;;  %v5509_v8 = vor.u32 %v6776_v33, %v5508_v63  ;;  %v5705_v35 = vor.u32 %v6820_v6, %v5702_v14  ;;  %v6940_v57 = vld [vmem:[#allocation5 + $0x554] sm:$0xf]  ;;  %v5897_v63 = vor.u32 %v6868_v53, %v5894_v54 }
 0x3aa   :  { %4215 = vmatpush.bf16.msra.mxu2 %v6181_v16  ;;  %v6840_v50 = vld [vmem:[#allocation5 + $0x22c] sm:$0xf0]  ;;  %v6182_v58 = vld [vmem:[#allocation5 + $0x570] sm:$0xf0] }
 0x3ab   :  { %4228 = vmatpush.bf16.msra.mxu3 %v6437_v19  ;;  %v6052_v42 = vld [vmem:[#allocation5 + $0x450] sm:$0xf]  ;;  %v5765_v12 = vor.u32 %v6840_v50, %v5764_v1  ;;  %v6246_v19 = vld [vmem:[#allocation5 + $0x5f0] sm:$0xf0]  ;;  %v6185_v1 = vor.u32 %v6940_v57, %v6182_v58 }
 0x3ac   :  { %4191 = vmatpush.bf16.msra.mxu0 %v5605_v21  ;;  %4204 = vmatpush.bf16.msra.mxu1 %v5861_v26  ;;  %v6912_v7 = vld [vmem:[#allocation5 + $0x46c] sm:$0xf0]  ;;  %v6502_v21 = vld [vmem:[#allocation5 + $0x7f0] sm:$0xf0] }
 0x3ad   :  { %v6308_v9 = vld [vmem:[#allocation5 + $0x650] sm:$0xf]  ;;  %v6053_v13 = vor.u32 %v6912_v7, %v6052_v42  ;;  %v6812_v26 = vld [vmem:[#allocation5 + $0x154] sm:$0xf] }
 0x3ae   :  { %4216 = vmatpush.bf16.msra.mxu2 %v6149_v30  ;;  %v6976_v10 = vld [vmem:[#allocation5 + $0x66c] sm:$0xf0]  ;;  %v6249_v30 = vor.u32 %v6956_v18, %v6246_v19  ;;  %v7004_v60 = vld [vmem:[#allocation5 + $0x754] sm:$0xf] }
 0x3af   :  { %4229 = vmatpush.bf16.msra.mxu3 %v6405_v39  ;;  %v6309_v40 = vor.u32 %v6976_v10, %v6308_v9  ;;  %v6020_v32 = vld [vmem:[#allocation5 + $0x410] sm:$0xf]  ;;  %v6505_v39 = vor.u32 %v7020_v20, %v6502_v21  ;;  %v6438_v62 = vld [vmem:[#allocation5 + $0x770] sm:$0xf0] }
 0x3b0   :  { %4192 = vmatpush.bf16.msra.mxu0 %v5573_v45  ;;  %4205 = vmatpush.bf16.msra.mxu1 %v5829_v48  ;;  %v6904_v38 = vld [vmem:[#allocation5 + $0x42c] sm:$0xf0]  ;;  %v5673_v45 = vor.u32 %v6812_v26, %v5670_v27  ;;  %v5929_v48 = vor.u32 %v6876_v31, %v5926_v36  ;;  %v5606_v33 = vld [vmem:[#allocation5 + $0xf0] sm:$0xf0]  ;;  %v6441_v3 = vor.u32 %v7004_v60, %v6438_v62  ;;  %v5964_v60 = vld [vmem:[#allocation5 + $0x398] sm:$0xf] }
 0x3b1   :  { %v6276_v16 = vld [vmem:[#allocation5 + $0x610] sm:$0xf]  ;;  %v6021_v23 = vor.u32 %v6904_v38, %v6020_v32  ;;  %v6860_v50 = vld [vmem:[#allocation5 + $0x2d4] sm:$0xf]  ;;  %v6889_v62 = vld [vmem:[#allocation5 + $0x3b4] sm:$0xf0] }
 0x3b2   :  { %4217 = vmatpush.bf16.msra.mxu2 %v6117_v52  ;;  %v6968_v17 = vld [vmem:[#allocation5 + $0x62c] sm:$0xf0]  ;;  %v6217_v52 = vor.u32 %v6948_v43, %v6214_v44  ;;  %v6932_v4 = vld [vmem:[#allocation5 + $0x514] sm:$0xf]  ;;  %v6833_v43 = vld [vmem:[#allocation5 + $0x1f4] sm:$0xf0] }
 0x3b3   :  { %4230 = vmatpush.bf16.msra.mxu3 %v6373_v56  ;;  %v6277_v28 = vor.u32 %v6968_v17, %v6276_v16  ;;  %v6473_v56 = vor.u32 %v7012_v46, %v6470_v47  ;;  %v6406_v42 = vld [vmem:[#allocation5 + $0x730] sm:$0xf0]  ;;  %v6153_v10 = vor.u32 %v6932_v4, %v6150_v5  ;;  %v5996_v44 = vld [vmem:[#allocation5 + $0x3d8] sm:$0xf] }
 0x3b4   :  { %4193 = vmatpush.bf16.msra.mxu0 %v5541_v59  ;;  %4206 = vmatpush.bf16.msra.mxu1 %v5797_v0  ;;  %v5641_v59 = vor.u32 %v6804_v49, %v5638_v51  ;;  %v6796_v0 = vld [vmem:[#allocation5 + $0xd4] sm:$0xf]  ;;  %v6409_v6 = vor.u32 %v6996_v41, %v6406_v42  ;;  %v6897_v46 = vld [vmem:[#allocation5 + $0x3f4] sm:$0xf0]  ;;  %v5965_v41 = vor.u32 %v6889_v62, %v5964_v60 }
 0x3b5   :  { %v5574_v9 = vld [vmem:[#allocation5 + $0xb0] sm:$0xf0]  ;;  %v5997_v57 = vor.u32 %v6897_v46, %v5996_v44  ;;  %v6508_v5 = vld [vmem:[#allocation5 + $0x7d8] sm:$0xf] }
 0x3b6   :  { %4218 = vmatpush.bf16.msra.mxu2 %v6085_v2  ;;  %v5862_v2 = vld [vmem:[#allocation5 + $0x2f0] sm:$0xf0]  ;;  %v6937_v46 = vld [vmem:[#allocation5 + $0x534] sm:$0xf0] }
 0x3b7   :  { %4231 = vmatpush.bf16.msra.mxu3 %v6341_v34  ;;  %v5609_v34 = vor.u32 %v6796_v0, %v5606_v33  ;;  %v5865_v7 = vor.u32 %v6860_v50, %v5862_v2  ;;  %v6988_v37 = vld [vmem:[#allocation5 + $0x6d4] sm:$0xf]  ;;  %v6252_v2 = vld [vmem:[#allocation5 + $0x5d8] sm:$0xf] }
 0x3b8   :  { %4194 = vmatpush.bf16.msra.mxu0 %v5509_v8  ;;  %4207 = vmatpush.bf16.msra.mxu1 %v5765_v12  ;;  %v6788_v8 = vld [vmem:[#allocation5 + $0x94] sm:$0xf]  ;;  %v6124_v60 = vld [vmem:[#allocation5 + $0x4d8] sm:$0xf] }
 0x3b9   :  { %v6852_v12 = vld [vmem:[#allocation5 + $0x294] sm:$0xf]  ;;  %v5577_v14 = vor.u32 %v6788_v8, %v5574_v9  ;;  %v6817_v8 = vld [vmem:[#allocation5 + $0x174] sm:$0xf0] }
 0x3ba   :  { %4219 = vmatpush.bf16.msra.mxu2 %v6053_v13  ;;  %v6118_v13 = vld [vmem:[#allocation5 + $0x4f0] sm:$0xf0]  ;;  %v6929_v62 = vld [vmem:[#allocation5 + $0x4f4] sm:$0xf0] }
 0x3bb   :  { %4232 = vmatpush.bf16.msra.mxu3 %v6309_v40  ;;  %4195 = vmatmul.bf16.vlgmr.msra.gmra.mxu0 %v7590_v24  ;;  %v6374_v15 = vld [vmem:[#allocation5 + $0x6f0] sm:$0xf0] }
 0x3bc   :  { %4239 = vmatpush.bf16.msrb.mxu0 %v5737_v25  ;;  %4252 = vmatpush.bf16.msrb.mxu1 %v5993_v11  ;;  %v5830_v25 = vld [vmem:[#allocation5 + $0x2b0] sm:$0xf0]  ;;  %v6377_v19 = vor.u32 %v6988_v37, %v6374_v15  ;;  %v6476_v37 = vld [vmem:[#allocation5 + $0x798] sm:$0xf] }
 0x3bd   :  { %4208 = vmatmul.bf16.vlgmr.msra.gmra.mxu1 %v7592_v29  ;;  %v6924_v11 = vld [vmem:[#allocation5 + $0x4d4] sm:$0xf]  ;;  %v5833_v40 = vor.u32 %v6852_v12, %v5830_v25  ;;  %v5932_v12 = vld [vmem:[#allocation5 + $0x358] sm:$0xf] }
 0x3be   :  { %4220 = vmatpush.bf16.msra.mxu2 %v6021_v23  ;;  %v6780_v32 = vld [vmem:[#allocation5 + $0x54] sm:$0xf]  ;;  %v6121_v16 = vor.u32 %v6924_v11, %v6118_v13  ;;  %v6881_v25 = vld [vmem:[#allocation5 + $0x374] sm:$0xf0] }
 0x3bf   :  { %4233 = vmatpush.bf16.msra.mxu3 %v6277_v28  ;;  %v5542_v38 = vld [vmem:[#allocation5 + $0x70] sm:$0xf0]  ;;  %v6220_v11 = vld [vmem:[#allocation5 + $0x598] sm:$0xf] }
 0x3c0   :  { %4240 = vmatpush.bf16.msrb.mxu0 %v5705_v35  ;;  %4253 = vmatpush.bf16.msrb.mxu1 %v5961_v22  ;;  %v6844_v17 = vld [vmem:[#allocation5 + $0x254] sm:$0xf]  ;;  %v5545_v21 = vor.u32 %v6780_v32, %v5542_v38  ;;  %v6953_v13 = vld [vmem:[#allocation5 + $0x5b4] sm:$0xf0] }
 0x3c1   :  { %4221 = vmatmul.bf16.vlgmr.msra.gmra.mxu2 %v7596_v55  ;;  %v5798_v18 = vld [vmem:[#allocation5 + $0x270] sm:$0xf0]  ;;  %v7017_v15 = vld [vmem:[#allocation5 + $0x7b4] sm:$0xf0] }
 0x3c2   :  { %4265 = vmatpush.bf16.msrb.mxu2 %v6249_v30  ;;  %4234 = vmatmul.bf16.vlgmr.msra.gmra.mxu3 %v7598_v61  ;;  %v6916_v35 = vld [vmem:[#allocation5 + $0x494] sm:$0xf]  ;;  %v5801_v27 = vor.u32 %v6844_v17, %v5798_v18  ;;  %v5644_v32 = vld [vmem:[#allocation5 + $0x118] sm:$0xf] }
 0x3c3   :  { %4278 = vmatpush.bf16.msrb.mxu3 %v6505_v39  ;;  %v6086_v20 = vld [vmem:[#allocation5 + $0x4b0] sm:$0xf0]  ;;  %v5740_v39 = vld [vmem:[#allocation5 + $0x1d8] sm:$0xf] }
 0x3c4   :  { %4241 = vmatpush.bf16.msrb.mxu0 %v5673_v45  ;;  %4254 = vmatpush.bf16.msrb.mxu1 %v5929_v48  ;;  %v6980_v22 = vld [vmem:[#allocation5 + $0x694] sm:$0xf]  ;;  %v6089_v36 = vor.u32 %v6916_v35, %v6086_v20  ;;  %v5741_v54 = vor.u32 %v6833_v43, %v5740_v39  ;;  %v6809_v38 = vld [vmem:[#allocation5 + $0x134] sm:$0xf0]  ;;  %v6477_v35 = vor.u32 %v7017_v15, %v6476_v37 }
 0x3c5   :  { %v6342_v23 = vld [vmem:[#allocation5 + $0x6b0] sm:$0xf0]  ;;  %v5900_v17 = vld [vmem:[#allocation5 + $0x318] sm:$0xf] }
 0x3c6   :  { %4266 = vmatpush.bf16.msrb.mxu2 %v6217_v52  ;;  %v6772_v26 = vld [vmem:[#allocation5 + $0x14] sm:$0xf]  ;;  %v6345_v45 = vor.u32 %v6980_v22, %v6342_v23  ;;  %v6873_v18 = vld [vmem:[#allocation5 + $0x334] sm:$0xf0]  ;;  %v5645_v23 = vor.u32 %v6809_v38, %v5644_v32  ;;  %v6829_v32 = vld [vmem:[#allocation5 + $0x1dc] sm:$0xf] }
 0x3c7   :  { %4279 = vmatpush.bf16.msrb.mxu3 %v6473_v56  ;;  %v5510_v28 = vld [vmem:[#allocation5 + $0x30] sm:$0xf0]  ;;  %v5708_v56 = vld [vmem:[#allocation5 + $0x198] sm:$0xf]  ;;  %v5742_v38 = vld [vmem:[#allocation5 + $0x1f8] sm:$0xf0] }
 0x3c8   :  { %4242 = vmatpush.bf16.msrb.mxu0 %v5641_v59  ;;  %4255 = vmatpush.bf16.msrb.mxu1 %v5897_v63  ;;  %v6836_v30 = vld [vmem:[#allocation5 + $0x214] sm:$0xf]  ;;  %v5513_v49 = vor.u32 %v6772_v26, %v5510_v28  ;;  %v6825_v59 = vld [vmem:[#allocation5 + $0x1b4] sm:$0xf0]  ;;  %v5901_v28 = vor.u32 %v6873_v18, %v5900_v17 }
 0x3c9   :  { %v5766_v31 = vld [vmem:[#allocation5 + $0x230] sm:$0xf0]  ;;  %v5709_v4 = vor.u32 %v6825_v59, %v5708_v56  ;;  %v6188_v20 = vld [vmem:[#allocation5 + $0x558] sm:$0xf] }
 0x3ca   :  { %4267 = vmatpush.bf16.msrb.mxu2 %v6185_v1  ;;  %v6908_v47 = vld [vmem:[#allocation5 + $0x454] sm:$0xf]  ;;  %v5769_v53 = vor.u32 %v6836_v30, %v5766_v31  ;;  %v6444_v26 = vld [vmem:[#allocation5 + $0x758] sm:$0xf] }
 0x3cb   :  { %4280 = vmatpush.bf16.msrb.mxu3 %v6441_v3  ;;  %v6054_v48 = vld [vmem:[#allocation5 + $0x470] sm:$0xf0]  ;;  %v6961_v3 = vld [vmem:[#allocation5 + $0x5f4] sm:$0xf0] }
 0x3cc   :  { %4243 = vmatpush.bf16.msrb.mxu0 %v5609_v34  ;;  %4256 = vmatpush.bf16.msrb.mxu1 %v5865_v7  ;;  %v6972_v51 = vld [vmem:[#allocation5 + $0x654] sm:$0xf]  ;;  %v6057_v58 = vor.u32 %v6908_v47, %v6054_v48  ;;  %v7025_v34 = vld [vmem:[#allocation5 + $0x7f4] sm:$0xf0] }
 0x3cd   :  { %v6310_v52 = vld [vmem:[#allocation5 + $0x670] sm:$0xf0]  ;;  %v5676_v7 = vld [vmem:[#allocation5 + $0x158] sm:$0xf] }
 0x3ce   :  { %4268 = vmatpush.bf16.msrb.mxu2 %v6153_v10  ;;  %v6313_v63 = vor.u32 %v6972_v51, %v6310_v52  ;;  %v6900_v0 = vld [vmem:[#allocation5 + $0x414] sm:$0xf]  ;;  %v6253_v10 = vor.u32 %v6961_v3, %v6252_v2  ;;  %v5612_v30 = vld [vmem:[#allocation5 + $0xd8] sm:$0xf] }
 0x3cf   :  { %4281 = vmatpush.bf16.msrb.mxu3 %v6409_v6  ;;  %v6022_v33 = vld [vmem:[#allocation5 + $0x430] sm:$0xf0]  ;;  %v6509_v6 = vor.u32 %v7025_v34, %v6508_v5  ;;  %v6801_v31 = vld [vmem:[#allocation5 + $0xf4] sm:$0xf0] }
 0x3d0   :  { %4244 = vmatpush.bf16.msrb.mxu0 %v5577_v14  ;;  %4257 = vmatpush.bf16.msrb.mxu1 %v5833_v40  ;;  %v6964_v1 = vld [vmem:[#allocation5 + $0x614] sm:$0xf]  ;;  %v6025_v42 = vor.u32 %v6900_v0, %v6022_v33  ;;  %v5677_v14 = vor.u32 %v6817_v8, %v5676_v7  ;;  %v5933_v40 = vor.u32 %v6881_v25, %v5932_v12  ;;  %v5868_v39 = vld [vmem:[#allocation5 + $0x2d8] sm:$0xf] }
 0x3d1   :  { %v6278_v50 = vld [vmem:[#allocation5 + $0x630] sm:$0xf0]  ;;  %v6865_v43 = vld [vmem:[#allocation5 + $0x2f4] sm:$0xf0]  ;;  %v5613_v47 = vor.u32 %v6801_v31, %v5612_v30 }
 0x3d2   :  { %4269 = vmatpush.bf16.msrb.mxu2 %v6121_v16  ;;  %v6281_v9 = vor.u32 %v6964_v1, %v6278_v50  ;;  %v6221_v16 = vor.u32 %v6953_v13, %v6220_v11  ;;  %v6412_v48 = vld [vmem:[#allocation5 + $0x718] sm:$0xf]  ;;  %v5869_v51 = vor.u32 %v6865_v43, %v5868_v39  ;;  %v5745_v39 = vor.u32 %v6829_v32, %v5742_v38  ;;  %v6821_v43 = vld [vmem:[#allocation5 + $0x19c] sm:$0xf] }
 0x3d3   :  { %4282 = vmatpush.bf16.msrb.mxu3 %v6377_v19  ;;  %v5580_v52 = vld [vmem:[#allocation5 + $0x98] sm:$0xf] }
 0x3d4   :  { %4245 = vmatpush.bf16.msrb.mxu0 %v5545_v21  ;;  %4258 = vmatpush.bf16.msrb.mxu1 %v5801_v27  ;;  %v6945_v21 = vld [vmem:[#allocation5 + $0x574] sm:$0xf0] }
 0x3d5   :  { %v7009_v27 = vld [vmem:[#allocation5 + $0x774] sm:$0xf0] }
 0x3d6   :  { %4270 = vmatpush.bf16.msrb.mxu2 %v6089_v36  ;;  %v6189_v36 = vor.u32 %v6945_v21, %v6188_v20  ;;  %v6445_v44 = vor.u32 %v7009_v27, %v6444_v26  ;;  %v5836_v56 = vld [vmem:[#allocation5 + $0x298] sm:$0xf] }
 0x3d7   :  { %4283 = vmatpush.bf16.msrb.mxu3 %v6345_v45  ;;  %v7620_v19 = vpop.f32.mrf.mxu0  ;;  %v6156_v45 = vld [vmem:[#allocation5 + $0x518] sm:$0xf] }
 0x3d8   :  { %4246 = vmatpush.bf16.msrb.mxu0 %v5513_v49  ;;  %4259 = vmatpush.bf16.msrb.mxu1 %v5769_v53  ;;  %v7623_v22 = vpop.f32.mrf.mxu1  ;;  %v7001_v49 = vld [vmem:[#allocation5 + $0x734] sm:$0xf0] }
 0x3d9   :  { %v6793_v53 = vld [vmem:[#allocation5 + $0xb4] sm:$0xf0]  ;;  %v6413_v59 = vor.u32 %v7001_v49, %v6412_v48  ;;  %v5966_v48 = vld [vmem:[#allocation5 + $0x3b8] sm:$0xf0] }
 0x3da   :  { %4271 = vmatpush.bf16.msrb.mxu2 %v6057_v58  ;;  %v5581_v0 = vor.u32 %v6793_v53, %v5580_v52  ;;  %v6380_v33 = vld [vmem:[#allocation5 + $0x6d8] sm:$0xf] }
 0x3db   :  { %4284 = vmatpush.bf16.msrb.mxu3 %v6313_v63  ;;  %4247 = vmatmul.bf16.vlgmr.msrb.gmra.mxu0 %v7590_v24  ;;  %v6993_v1 = vld [vmem:[#allocation5 + $0x6f4] sm:$0xf0] }
 0x3dc   :  { %4291 = vmatpush.bf16.msra.mxu0 %v5741_v54  ;;  %4304 = vmatpush.bf16.msra.mxu1 %v5997_v57  ;;  %v6157_v54 = vor.u32 %v6937_v46, %v6156_v45  ;;  %v6857_v57 = vld [vmem:[#allocation5 + $0x2b4] sm:$0xf0] }
 0x3dd   :  { %4260 = vmatmul.bf16.vlgmr.msrb.gmra.mxu1 %v7592_v29  ;;  %v5837_v50 = vor.u32 %v6857_v57, %v5836_v56  ;;  %v5548_v2 = vld [vmem:[#allocation5 + $0x58] sm:$0xf]  ;;  %v6957_v57 = vld [vmem:[#allocation5 + $0x5dc] sm:$0xf] }
 0x3de   :  { %4272 = vmatpush.bf16.msrb.mxu2 %v6025_v42  ;;  %v6785_v3 = vld [vmem:[#allocation5 + $0x74] sm:$0xf0] }
 0x3df   :  { %4285 = vmatpush.bf16.msrb.mxu3 %v6281_v9  ;;  %v3990_v58 = vpop.f32.mrf.mxu0  ;;  %v5804_v5 = vld [vmem:[#allocation5 + $0x258] sm:$0xf] }
 0x3e0   :  { %4292 = vmatpush.bf16.msra.mxu0 %v5709_v4  ;;  %4305 = vmatpush.bf16.msra.mxu1 %v5965_v41  ;;  %v4003_v63 = vpop.f32.mrf.mxu1  ;;  %v6125_v4 = vor.u32 %v6929_v62, %v6124_v60  ;;  %v6849_v34 = vld [vmem:[#allocation5 + $0x274] sm:$0xf0]  ;;  %v6381_v41 = vor.u32 %v6993_v1, %v6380_v33  ;;  %v6254_v58 = vld [vmem:[#allocation5 + $0x5f8] sm:$0xf0] }
 0x3e1   :  { %4273 = vmatmul.bf16.vlgmr.msrb.gmra.mxu2 %v7596_v55  ;;  %v6092_v42 = vld [vmem:[#allocation5 + $0x498] sm:$0xf]  ;;  %v5805_v13 = vor.u32 %v6849_v34, %v5804_v5  ;;  %v7021_v62 = vld [vmem:[#allocation5 + $0x7dc] sm:$0xf]  ;;  %v6257_v34 = vor.u32 %v6957_v57, %v6254_v58 }
 0x3e2   :  { %4317 = vmatpush.bf16.msra.mxu2 %v6253_v10  ;;  %4286 = vmatmul.bf16.vlgmr.msrb.gmra.mxu3 %v7598_v61  ;;  %v6921_v7 = vld [vmem:[#allocation5 + $0x4b4] sm:$0xf0]  ;;  %v5549_v10 = vor.u32 %v6785_v3, %v5548_v2  ;;  %v6510_v63 = vld [vmem:[#allocation5 + $0x7f8] sm:$0xf0] }
 0x3e3   :  { %4330 = vmatpush.bf16.msra.mxu3 %v6509_v6  ;;  %v7629_v8 = vld [vmem:[%s7691_s8] sm:$0xff] }
 0x3e4   :  { %4293 = vmatpush.bf16.msra.mxu0 %v5677_v14  ;;  %4306 = vmatpush.bf16.msra.mxu1 %v5933_v40  ;;  %v7631_v9 = vpop.f32.mrf.mxu2  ;;  %v6348_v12 = vld [vmem:[#allocation5 + $0x698] sm:$0xf]  ;;  %v6093_v40 = vor.u32 %v6921_v7, %v6092_v42  ;;  %v2683_v30 = vperm.slane %v7629_v8, 0  ;;  %v2684_v31 = vperm.slane %v7629_v8, 1  ;;  %v5678_v2 = vld [vmem:[#allocation5 + $0x178] sm:$0xf0] }
 0x3e5   :  { %v6985_v25 = vld [vmem:[#allocation5 + $0x6b4] sm:$0xf0]  ;;  %v7633_v11 = vpop.f32.mrf.mxu3  ;;  %v5934_v42 = vld [vmem:[#allocation5 + $0x378] sm:$0xf0] }
 0x3e6   :  { %4318 = vmatpush.bf16.msra.mxu2 %v6221_v16  ;;  %v5516_v6 = vld [vmem:[#allocation5 + $0x18] sm:$0xf]  ;;  %v6893_v16 = vld [vmem:[#allocation5 + $0x3dc] sm:$0xf]  ;;  %v6349_v18 = vor.u32 %v6985_v25, %v6348_v12  ;;  %v3989_v3 = vadd.f32 %v7620_v19, %v2683_v30 }
 0x3e7   :  { %4331 = vmatpush.bf16.msra.mxu3 %v6477_v35  ;;  %v6777_v14 = vld [vmem:[#allocation5 + $0x34] sm:$0xf0]  ;;  %v4040_v17 = vpop.f32.mrf.mxu0  ;;  %v5998_v35 = vld [vmem:[#allocation5 + $0x3f8] sm:$0xf0] }
 0x3e8   :  { %4294 = vmatpush.bf16.msra.mxu0 %v5645_v23  ;;  %4307 = vmatpush.bf16.msra.mxu1 %v5901_v28  ;;  %v5772_v37 = vld [vmem:[#allocation5 + $0x218] sm:$0xf]  ;;  %v4053_v23 = vpop.f32.mrf.mxu1  ;;  %v5517_v26 = vor.u32 %v6777_v14, %v5516_v6  ;;  %v6001_v45 = vor.u32 %v6893_v16, %v5998_v35  ;;  %v6949_v12 = vld [vmem:[#allocation5 + $0x59c] sm:$0xf] }
 0x3e9   :  { %v6841_v15 = vld [vmem:[#allocation5 + $0x234] sm:$0xf0]  ;;  %v6222_v25 = vld [vmem:[#allocation5 + $0x5b8] sm:$0xf0] }
 0x3ea   :  { %4319 = vmatpush.bf16.msra.mxu2 %v6189_v36  ;;  %v6060_v20 = vld [vmem:[#allocation5 + $0x458] sm:$0xf]  ;;  %v5773_v36 = vor.u32 %v6841_v15, %v5772_v37  ;;  %v6478_v14 = vld [vmem:[#allocation5 + $0x7b8] sm:$0xf0]  ;;  %v6225_v38 = vor.u32 %v6949_v12, %v6222_v25 }
 0x3eb   :  { %4332 = vmatpush.bf16.msra.mxu3 %v6445_v44  ;;  %v6913_v21 = vld [vmem:[#allocation5 + $0x474] sm:$0xf0]  ;;  %v5710_v44 = vld [vmem:[#allocation5 + $0x1b8] sm:$0xf0] }
 0x3ec   :  { %4295 = vmatpush.bf16.msra.mxu0 %v5613_v47  ;;  %4308 = vmatpush.bf16.msra.mxu1 %v5869_v51  ;;  %v6316_v27 = vld [vmem:[#allocation5 + $0x658] sm:$0xf]  ;;  %v6061_v46 = vor.u32 %v6913_v21, %v6060_v20  ;;  %v6885_v47 = vld [vmem:[#allocation5 + $0x39c] sm:$0xf]  ;;  %v4016_v56 = vpop.f32.mrf.mxu2  ;;  %v5713_v60 = vor.u32 %v6821_v43, %v5710_v44 }
 0x3ed   :  { %v6977_v28 = vld [vmem:[#allocation5 + $0x674] sm:$0xf0]  ;;  %v6805_v37 = vld [vmem:[#allocation5 + $0x11c] sm:$0xf] }
 0x3ee   :  { %4320 = vmatpush.bf16.msra.mxu2 %v6157_v54  ;;  %v6028_v49 = vld [vmem:[#allocation5 + $0x418] sm:$0xf]  ;;  %v6317_v51 = vor.u32 %v6977_v28, %v6316_v27  ;;  %v5646_v15 = vld [vmem:[#allocation5 + $0x138] sm:$0xf0] }
 0x3ef   :  { %4333 = vmatpush.bf16.msra.mxu3 %v6413_v59  ;;  %v6905_v52 = vld [vmem:[#allocation5 + $0x434] sm:$0xf0]  ;;  %v4029_v59 = vpop.f32.mrf.mxu3  ;;  %v4042_v5 = vpop.f32.mrf.mxu0  ;;  %v6869_v16 = vld [vmem:[#allocation5 + $0x31c] sm:$0xf]  ;;  %v5649_v30 = vor.u32 %v6805_v37, %v5646_v15 }
 0x3f0   :  { %4296 = vmatpush.bf16.msra.mxu0 %v5581_v0  ;;  %4309 = vmatpush.bf16.msra.mxu1 %v5837_v50  ;;  %v6284_v53 = vld [vmem:[#allocation5 + $0x618] sm:$0xf]  ;;  %v5969_v0 = vor.u32 %v6885_v47, %v5966_v48  ;;  %v6029_v33 = vor.u32 %v6905_v52, %v6028_v49  ;;  %v6813_v50 = vld [vmem:[#allocation5 + $0x15c] sm:$0xf]  ;;  %v4055_v7 = vpop.f32.mrf.mxu1 }
 0x3f1   :  { %v6969_v54 = vld [vmem:[#allocation5 + $0x634] sm:$0xf0]  ;;  %v5681_v6 = vor.u32 %v6813_v50, %v5678_v2  ;;  %v6941_v20 = vld [vmem:[#allocation5 + $0x55c] sm:$0xf] }
 0x3f2   :  { %4321 = vmatpush.bf16.msra.mxu2 %v6125_v4  ;;  %v6285_v1 = vor.u32 %v6969_v54, %v6284_v53  ;;  %v4041_v4 = vadd.f32 %v4040_v17, %v2684_v31  ;;  %v5902_v17 = vld [vmem:[#allocation5 + $0x338] sm:$0xf0] }
 0x3f3   :  { %4334 = vmatpush.bf16.msra.mxu3 %v6381_v41  ;;  %v6877_v41 = vld [vmem:[#allocation5 + $0x35c] sm:$0xf]  ;;  %v5905_v31 = vor.u32 %v6869_v16, %v5902_v17 }
 0x3f4   :  { %4297 = vmatpush.bf16.msra.mxu0 %v5549_v10  ;;  %4310 = vmatpush.bf16.msra.mxu1 %v5805_v13  ;;  %v6513_v10 = vor.u32 %v7021_v62, %v6510_v63  ;;  %v7013_v13 = vld [vmem:[#allocation5 + $0x79c] sm:$0xf]  ;;  %v5937_v19 = vor.u32 %v6877_v41, %v5934_v42  ;;  %v4054_v32 = vadd.f32 %v4053_v23, %v4041_v4 }
 0x3f5   :  { %v6481_v35 = vor.u32 %v7013_v13, %v6478_v14  ;;  %v6190_v21 = vld [vmem:[#allocation5 + $0x578] sm:$0xf0] }
 0x3f6   :  { %4322 = vmatpush.bf16.msra.mxu2 %v6093_v40  ;;  %v4002_v40 = vadd.f32 %v7623_v22, %v3989_v3  ;;  %v7005_v22 = vld [vmem:[#allocation5 + $0x75c] sm:$0xf]  ;;  %v6193_v44 = vor.u32 %v6941_v20, %v6190_v21 }
 0x3f7   :  { %4335 = vmatpush.bf16.msra.mxu3 %v6349_v18  ;;  %v4066_v18 = vpop.f32.mrf.mxu2  ;;  %v4079_v28 = vpop.f32.mrf.mxu3  ;;  %v6446_v23 = vld [vmem:[#allocation5 + $0x778] sm:$0xf0] }
 0x3f8   :  { %4298 = vmatpush.bf16.msra.mxu0 %v5517_v26  ;;  %4311 = vmatpush.bf16.msra.mxu1 %v5773_v36  ;;  %v4015_v26 = vadd.f32 %v7631_v9, %v4002_v40  ;;  %v4067_v27 = vadd.f32 %v4066_v18, %v4054_v32  ;;  %v6797_v36 = vld [vmem:[#allocation5 + $0xdc] sm:$0xf]  ;;  %v7644_v9 = vpop.f32.mrf.mxu0  ;;  %v6449_v47 = vor.u32 %v7005_v22, %v6446_v23 }
 0x3f9   :  { %v6933_v48 = vld [vmem:[#allocation5 + $0x51c] sm:$0xf] }
 0x3fa   :  { %4323 = vmatpush.bf16.msra.mxu2 %v6061_v46  ;;  %v4080_v43 = vadd.f32 %v4079_v28, %v4067_v27  ;;  %v5870_v46 = vld [vmem:[#allocation5 + $0x2f8] sm:$0xf0]  ;;  %v7647_v53 = vpop.f32.mrf.mxu1 }
 0x3fb   :  { %4336 = vmatpush.bf16.msra.mxu3 %v6317_v51  ;;  %4299 = vmatmul.bf16.vlgmr.msra.gmra.mxu0 %v7590_v24  ;;  %v6158_v49 = vld [vmem:[#allocation5 + $0x538] sm:$0xf0]  ;;  %v4028_v51 = vadd.f32 %v7633_v11, %v4015_v26 }
 0x3fc   :  { %4343 = vmatpush.bf16.msrb.mxu0 %v5745_v39  ;;  %4356 = vmatpush.bf16.msrb.mxu1 %v6001_v45  ;;  %v5614_v39 = vld [vmem:[#allocation5 + $0xf8] sm:$0xf0]  ;;  %v4403_v52 = vrot.slane %v4080_v43, 4  ;;  %v6161_v63 = vor.u32 %v6933_v48, %v6158_v49 }
 0x3fd   :  { %4312 = vmatmul.bf16.vlgmr.msra.gmra.mxu1 %v7592_v29  ;;  %v6861_v45 = vld [vmem:[#allocation5 + $0x2dc] sm:$0xf]  ;;  %v5617_v54 = vor.u32 %v6797_v36, %v5614_v39 }
 0x3fe   :  { %4324 = vmatpush.bf16.msra.mxu2 %v6029_v33  ;;  %v6997_v56 = vld [vmem:[#allocation5 + $0x71c] sm:$0xf]  ;;  %v5873_v58 = vor.u32 %v6861_v45, %v5870_v46  ;;  %v4408_v62 = vsel %vm4407_vm5, %v4028_v51, %v4403_v52 }
 0x3ff   :  { %4337 = vmatpush.bf16.msra.mxu3 %v6285_v1  ;;  %v6414_v57 = vld [vmem:[#allocation5 + $0x738] sm:$0xf0]  ;;  %4416 = vst [vmem:[%s7694_s11] sm:$0xff] %v4408_v62  ;;  %v4068_v11 = vpop.f32.mrf.mxu2  ;;  %v4081_v3 = vpop.f32.mrf.mxu3 }
 0x400   :  { %4344 = vmatpush.bf16.msrb.mxu0 %v5713_v60  ;;  %4357 = vmatpush.bf16.msrb.mxu1 %v5969_v0  ;;  %v6789_v59 = vld [vmem:[#allocation5 + $0x9c] sm:$0xf]  ;;  %v6417_v1 = vor.u32 %v6997_v56, %v6414_v57  ;;  %v2685_v57 = vperm.slane %v7629_v8, 2 }
 0x401   :  { %4325 = vmatmul.bf16.vlgmr.msra.gmra.mxu2 %v7596_v55  ;;  %v5582_v60 = vld [vmem:[#allocation5 + $0xb8] sm:$0xf0] }
 0x402   :  { %4369 = vmatpush.bf16.msrb.mxu2 %v6257_v34  ;;  %4338 = vmatmul.bf16.vlgmr.msra.gmra.mxu3 %v7598_v61  ;;  %v6853_v0 = vld [vmem:[#allocation5 + $0x29c] sm:$0xf]  ;;  %v5585_v4 = vor.u32 %v6789_v59, %v5582_v60  ;;  %v4107_v37 = vpop.f32.mrf.mxu1  ;;  %v4093_v59 = vadd.f32 %v7644_v9, %v2685_v57 }
 0x403   :  { %4382 = vmatpush.bf16.msrb.mxu3 %v6513_v10  ;;  %v5838_v33 = vld [vmem:[#allocation5 + $0x2b8] sm:$0xf0] }
 0x404   :  { %4345 = vmatpush.bf16.msrb.mxu0 %v5681_v6  ;;  %4358 = vmatpush.bf16.msrb.mxu1 %v5937_v19  ;;  %v6925_v50 = vld [vmem:[#allocation5 + $0x4dc] sm:$0xf]  ;;  %v5841_v41 = vor.u32 %v6853_v0, %v5838_v33  ;;  %v4094_v6 = vpop.f32.mrf.mxu0 }
 0x405   :  { %v6126_v2 = vld [vmem:[#allocation5 + $0x4f8] sm:$0xf0]  ;;  %v2687_v6 = vperm.slane %v7629_v8, 4 }
 0x406   :  { %4370 = vmatpush.bf16.msrb.mxu2 %v6225_v38  ;;  %v6989_v5 = vld [vmem:[#allocation5 + $0x6dc] sm:$0xf]  ;;  %v6129_v10 = vor.u32 %v6925_v50, %v6126_v2 }
 0x407   :  { %4383 = vmatpush.bf16.msrb.mxu3 %v6481_v35  ;;  %v6382_v34 = vld [vmem:[#allocation5 + $0x6f8] sm:$0xf0]  ;;  %v4118_v28 = vpop.f32.mrf.mxu2 }
 0x408   :  { %4346 = vmatpush.bf16.msrb.mxu0 %v5649_v30  ;;  %4359 = vmatpush.bf16.msrb.mxu1 %v5905_v31  ;;  %v6781_v42 = vld [vmem:[#allocation5 + $0x5c] sm:$0xf]  ;;  %v6385_v13 = vor.u32 %v6989_v5, %v6382_v34  ;;  %v4131_v30 = vpop.f32.mrf.mxu3 }
 0x409   :  { %v5550_v7 = vld [vmem:[#allocation5 + $0x78] sm:$0xf0] }
 0x40a   :  { %4371 = vmatpush.bf16.msrb.mxu2 %v6193_v44  ;;  %v6845_v12 = vld [vmem:[#allocation5 + $0x25c] sm:$0xf]  ;;  %v5553_v15 = vor.u32 %v6781_v42, %v5550_v7 }
 0x40b   :  { %4384 = vmatpush.bf16.msrb.mxu3 %v6449_v47  ;;  %v5806_v25 = vld [vmem:[#allocation5 + $0x278] sm:$0xf0] }
 0x40c   :  { %4347 = vmatpush.bf16.msrb.mxu0 %v5617_v54  ;;  %4360 = vmatpush.bf16.msrb.mxu1 %v5873_v58  ;;  %v6917_v14 = vld [vmem:[#allocation5 + $0x49c] sm:$0xf]  ;;  %v5809_v38 = vor.u32 %v6845_v12, %v5806_v25  ;;  %v2686_v58 = vperm.slane %v7629_v8, 3 }
 0x40d   :  { %v6094_v19 = vld [vmem:[#allocation5 + $0x4b8] sm:$0xf0] }
 0x40e   :  { %4372 = vmatpush.bf16.msrb.mxu2 %v6161_v63  ;;  %v6981_v40 = vld [vmem:[#allocation5 + $0x69c] sm:$0xf]  ;;  %v6097_v18 = vor.u32 %v6917_v14, %v6094_v19 }
 0x40f   :  { %4385 = vmatpush.bf16.msrb.mxu3 %v6417_v1  ;;  %v6350_v32 = vld [vmem:[#allocation5 + $0x6b8] sm:$0xf0]  ;;  %v4120_v51 = vpop.f32.mrf.mxu2 }
 0x410   :  { %4348 = vmatpush.bf16.msrb.mxu0 %v5585_v4  ;;  %4361 = vmatpush.bf16.msrb.mxu1 %v5841_v41  ;;  %v6773_v16 = vld [vmem:[#allocation5 + $0x1c] sm:$0xf]  ;;  %v6353_v21 = vor.u32 %v6981_v40, %v6350_v32  ;;  %v4133_v52 = vpop.f32.mrf.mxu3 }
 0x411   :  { %v5518_v17 = vld [vmem:[#allocation5 + $0x38] sm:$0xf0] }
 0x412   :  { %4373 = vmatpush.bf16.msrb.mxu2 %v6129_v10  ;;  %v6837_v35 = vld [vmem:[#allocation5 + $0x21c] sm:$0xf]  ;;  %v5521_v22 = vor.u32 %v6773_v16, %v5518_v17 }
 0x413   :  { %v5774_v20 = vld [vmem:[#allocation5 + $0x238] sm:$0xf0]  ;;  %4386 = vmatpush.bf16.msrb.mxu3 %v6385_v13  ;;  %v2688_v13 = vperm.slane %v7629_v8, 5 }
 0x414   :  { %v6909_v26 = vld [vmem:[#allocation5 + $0x45c] sm:$0xf]  ;;  %4349 = vmatpush.bf16.msrb.mxu0 %v5553_v15  ;;  %4362 = vmatpush.bf16.msrb.mxu1 %v5809_v38  ;;  %v5777_v36 = vor.u32 %v6837_v35, %v5774_v20 }
 0x415   :  { %v6062_v27 = vld [vmem:[#allocation5 + $0x478] sm:$0xf0] }
 0x416   :  { %v6973_v23 = vld [vmem:[#allocation5 + $0x65c] sm:$0xf]  ;;  %4374 = vmatpush.bf16.msrb.mxu2 %v6097_v18  ;;  %v6065_v39 = vor.u32 %v6909_v26, %v6062_v27 }
 0x417   :  { %v6318_v31 = vld [vmem:[#allocation5 + $0x678] sm:$0xf0]  ;;  %4387 = vmatpush.bf16.msrb.mxu3 %v6353_v21 }
 0x418   :  { %v6321_v43 = vor.u32 %v6973_v23, %v6318_v31  ;;  %v6901_v44 = vld [vmem:[#allocation5 + $0x41c] sm:$0xf]  ;;  %4350 = vmatpush.bf16.msrb.mxu0 %v5521_v22  ;;  %4363 = vmatpush.bf16.msrb.mxu1 %v5777_v36  ;;  %v4144_v54 = vpop.f32.mrf.mxu0 }
 0x419   :  { %v6030_v45 = vld [vmem:[#allocation5 + $0x438] sm:$0xf0] }
 0x41a   :  { %v6965_v46 = vld [vmem:[#allocation5 + $0x61c] sm:$0xf]  ;;  %4375 = vmatpush.bf16.msrb.mxu2 %v6065_v39  ;;  %v6033_v48 = vor.u32 %v6901_v44, %v6030_v45  ;;  %v4157_v56 = vpop.f32.mrf.mxu1 }
 0x41b   :  { %v6286_v47 = vld [vmem:[#allocation5 + $0x638] sm:$0xf0]  ;;  %4388 = vmatpush.bf16.msrb.mxu3 %v6321_v43  ;;  %4351 = vmatmul.bf16.vlgmr.msrb.gmra.mxu0 %v7590_v24  ;;  %v4145_v24 = vadd.f32 %v4144_v54, %v2686_v58 }
 0x41c   :  { %v6289_v49 = vor.u32 %v6965_v46, %v6286_v47  ;;  %4364 = vmatmul.bf16.vlgmr.msrb.gmra.mxu1 %v7592_v29  ;;  %v2689_v47 = vperm.slane %v7629_v8, 6 }
 0x41d   :  { %v4158_v9 = vadd.f32 %v4157_v56, %v4145_v24 }
 0x41e   :  { %4376 = vmatpush.bf16.msrb.mxu2 %v6033_v48  ;;  %v2690_v48 = vperm.slane %v7629_v8, 7 }
 0x41f   :  { %4389 = vmatpush.bf16.msrb.mxu3 %v6289_v49 }
 0x420   :  { %v4146_v29 = vpop.f32.mrf.mxu0 }
 0x421   :  { %4377 = vmatmul.bf16.vlgmr.msrb.gmra.mxu2 %v7596_v55 }
 0x422   :  { %4390 = vmatmul.bf16.vlgmr.msrb.gmra.mxu3 %v7598_v61  ;;  %v4159_v55 = vpop.f32.mrf.mxu1  ;;  %v4106_v61 = vadd.f32 %v7647_v53, %v4093_v59 }
 0x424   :  { %v4170_v60 = vpop.f32.mrf.mxu2  ;;  %v4119_v62 = vadd.f32 %v4118_v28, %v4106_v61 }
 0x425   :  { %v4171_v63 = vadd.f32 %v4170_v60, %v4158_v9  ;;  %v4183_v0 = vpop.f32.mrf.mxu3 }
 0x426   :  { %v4132_v11 = vadd.f32 %v4131_v30, %v4119_v62 }
 0x427   :  { %v4184_v33 = vadd.f32 %v4183_v0, %v4171_v63 }
 0x429   :  { %v4404_v1 = vrot.slane %v4184_v33, 4 }
 0x42b   :  { %v4409_v50 = vsel %vm4407_vm5, %v4132_v11, %v4404_v1 }
 0x42c   :  { %4417 = vst [vmem:[%s7694_s11 + $0x8] sm:$0xff] %v4409_v50  ;;  %v4172_v2 = vpop.f32.mrf.mxu2 }
 0x42d   :  { %v4185_v3 = vpop.f32.mrf.mxu3 }
 0x438   :  { %v4196_v53 = vpop.f32.mrf.mxu0 }
 0x439   :  { %v4197_v14 = vadd.f32 %v4196_v53, %v2687_v6 }
 0x43a   :  { %v4209_v4 = vpop.f32.mrf.mxu1 }
 0x43b   :  { %v4210_v40 = vadd.f32 %v4209_v4, %v4197_v14 }
 0x440   :  { %v4198_v5 = vpop.f32.mrf.mxu0 }
 0x442   :  { %v4211_v34 = vpop.f32.mrf.mxu1 }
 0x444   :  { %v4222_v41 = vpop.f32.mrf.mxu2 }
 0x445   :  { %v4235_v42 = vpop.f32.mrf.mxu3  ;;  %v4223_v16 = vadd.f32 %v4222_v41, %v4210_v40 }
 0x447   :  { %v4236_v20 = vadd.f32 %v4235_v42, %v4223_v16 }
 0x44c   :  { %v4224_v7 = vpop.f32.mrf.mxu2 }
 0x44d   :  { %v4237_v10 = vpop.f32.mrf.mxu3 }
 0x458   :  { %v4248_v12 = vpop.f32.mrf.mxu0 }
 0x459   :  { %v4249_v19 = vadd.f32 %v4248_v12, %v2688_v13 }
 0x45a   :  { %v4261_v25 = vpop.f32.mrf.mxu1 }
 0x45b   :  { %v4262_v32 = vadd.f32 %v4261_v25, %v4249_v19 }
 0x460   :  { %v4250_v37 = vpop.f32.mrf.mxu0 }
 0x462   :  { %v4263_v15 = vpop.f32.mrf.mxu1 }
 0x464   :  { %v4274_v38 = vpop.f32.mrf.mxu2 }
 0x465   :  { %v4275_v17 = vadd.f32 %v4274_v38, %v4262_v32  ;;  %v4287_v18 = vpop.f32.mrf.mxu3 }
 0x467   :  { %v4288_v35 = vadd.f32 %v4287_v18, %v4275_v17 }
 0x469   :  { %v4405_v21 = vrot.slane %v4288_v35, 4 }
 0x46b   :  { %v4410_v26 = vsel %vm4407_vm5, %v4236_v20, %v4405_v21 }
 0x46c   :  { %4418 = vst [vmem:[%s7694_s11 + $0x10] sm:$0xff] %v4410_v26  ;;  %v4276_v27 = vpop.f32.mrf.mxu2 }
 0x46d   :  { %v4289_v28 = vpop.f32.mrf.mxu3 }
 0x478   :  { %v4300_v30 = vpop.f32.mrf.mxu0 }
 0x479   :  { %v4301_v49 = vadd.f32 %v4300_v30, %v2689_v47 }
 0x47a   :  { %v4313_v22 = vpop.f32.mrf.mxu1 }
 0x47b   :  { %v4314_v56 = vadd.f32 %v4313_v22, %v4301_v49 }
 0x480   :  { %v4302_v23 = vpop.f32.mrf.mxu0 }
 0x482   :  { %v4315_v31 = vpop.f32.mrf.mxu1 }
 0x484   :  { %v4326_v36 = vpop.f32.mrf.mxu2 }
 0x485   :  { %v4339_v39 = vpop.f32.mrf.mxu3  ;;  %v4327_v59 = vadd.f32 %v4326_v36, %v4314_v56 }
 0x487   :  { %v4340_v61 = vadd.f32 %v4339_v39, %v4327_v59 }
 0x48c   :  { %v4328_v43 = vpop.f32.mrf.mxu2 }
 0x48d   :  { %v4341_v44 = vpop.f32.mrf.mxu3 }
 0x498   :  { %v4352_v45 = vpop.f32.mrf.mxu0 }
 0x499   :  { %v4365_v46 = vpop.f32.mrf.mxu1  ;;  %v4353_v51 = vadd.f32 %v4352_v45, %v2690_v48 }
 0x49b   :  { %v4366_v57 = vadd.f32 %v4365_v46, %v4353_v51 }
 0x4a0   :  { %v4354_v52 = vpop.f32.mrf.mxu0 }
 0x4a1   :  { %v4367_v54 = vpop.f32.mrf.mxu1 }
 0x4a4   :  { %v4378_v58 = vpop.f32.mrf.mxu2 }
 0x4a5   :  { %v4379_v24 = vadd.f32 %v4378_v58, %v4366_v57  ;;  %v4391_v29 = vpop.f32.mrf.mxu3 }
 0x4a7   :  { %v4392_v55 = vadd.f32 %v4391_v29, %v4379_v24 }
 0x4a9   :  { %v4406_v9 = vrot.slane %v4392_v55, 4 }
 0x4ab   :  { %v4411_v60 = vsel %vm4407_vm5, %v4340_v61, %v4406_v9 }
 0x4ac   :  { %4419 = vst [vmem:[%s7694_s11 + $0x18] sm:$0xff] %v4411_v60  ;;  %v4380_v8 = vpop.f32.mrf.mxu2 }
 0x4ad   :  { %v4393_v62 = vpop.f32.mrf.mxu3 }
 0x4ae   :  { %7165 = dma.done.wait [#allocation4], 32  }
 0x4af   :  { %7166 = vsyncadd [#allocation4], 4294967264 }
 0x4b0   :  { %7167 = dma.done.wait [#allocation9], 32  }
 0x4b1   :  { %7168 = vsyncadd [#allocation9], 4294967264 }
 0x4b2   :  { %4458 = vsyncpa [#allocation3], 1 }
 0x4b3   :  { %4459 = vsyncpa [#allocation6], 1 }
 0x4b4   :  { %4460 = vsyncpa [#allocation4], 1 }
 0x4b5   :  { %4461 = vsyncpa [#allocation9], 1 }

</bundles_post_ra>
